<compile_context>
chip_gen: v7x
topology: tpu7x:2x2x1
jax: 0.10.0
libtpu: 0.0.40
codegen_flags: <defaults>
</compile_context>

<pallas_src>
import jax
import jax.numpy as jnp
from jax.experimental import pallas as pl
from jax.experimental.pallas import tpu as pltpu

# ---------------------------------------------------------------------------
# Model hyper-parameters (scaled-down but structurally identical to PyTorch).
# ---------------------------------------------------------------------------
VOCAB = 1000          # nn.Embedding(30522, 768) -> (1000, 64)
EMBED = 64
SEQ = 8

IMG_C, IMG_H, IMG_W = 3, 16, 16      # Conv2d(3, 16, 3, pad=1)
AUD_H, AUD_W = 16, 8                 # Conv2d(1, 16, 3, pad=1) on unsqueezed audio
CONV_OUT = 16
ENC_DIM = 64                         # image/audio encoder Linear out (512 -> 64)

BATCH = 2

IMG_HW = IMG_H * IMG_W               # 256  (lane-dense, 2 vregs wide)
AUD_HW = AUD_H * AUD_W               # 128  (lane-dense, 1 vreg wide)

_VMEM = pltpu.MemorySpace.VMEM
_SMEM = pltpu.MemorySpace.SMEM


# ---------------------------------------------------------------------------
# Single fused kernel: embedding-mean + 2x (im2col conv + ReLU + Linear) + head
# ---------------------------------------------------------------------------
def fused_forward_kernel(
    ids_ref,                                            # SMEM (B*L,) int32
    emb_ref,                                            # VMEM (VOCAB, EMBED) f32
    img_pat_ref, img_w_ref, img_b_ref, img_fcw_ref, img_fcb_ref,
    aud_pat_ref, aud_w_ref, aud_b_ref, aud_fcw_ref, aud_fcb_ref,
    hw_txt_ref, hw_img_ref, hw_aud_ref,                 # head weight, per modality
    head_b_ref,                                         # SMEM (1,) f32
    out_ref,                                            # VMEM (B, 1) f32
    text_scr,                                           # VMEM (B, EMBED) f32
    img_act,                                            # VMEM (B, CONV_OUT*IMG_HW) f32
    aud_act,                                            # VMEM (B, CONV_OUT*AUD_HW) f32
):
    B = out_ref.shape[0]
    L = ids_ref.shape[0] // B

    # ---- text encoder: unrolled SMEM-id row gather + mean over the sequence.
    # Static Python loops (B*L = 16 independent row loads -> full scheduler
    # visibility), rows written straight into a (B, EMBED) scratch tile.
    inv_l = 1.0 / L
    for b in range(B):
        acc = emb_ref[pl.ds(ids_ref[b * L], 1), :]              # (1, E)
        for j in range(1, L):
            acc = acc + emb_ref[pl.ds(ids_ref[b * L + j], 1), :]
        text_scr[b:b + 1, :] = acc * inv_l
    text_feat = text_scr[...]                                    # (B, E) f32

    # ---- conv encoder: 1 im2col MXU matmul + bias + ReLU, then a store-based
    # (C,H,W)-order flatten into a (B, Cout*HW) scratch, then 1 FC MXU matmul.
    def conv_encoder(pat_ref, w_ref, cb_ref, fcw_ref, fcb_ref, act_ref):
        # pat_ref: (9*Cin, B*HW) bf16 im2col patches, spatial dense in lanes
        # w_ref:   (Cout, 9*Cin) bf16 conv weight, PyTorch (co,ci,ky,kx) flatten
        conv = jnp.dot(w_ref[...], pat_ref[...],
                       preferred_element_type=jnp.float32)      # (Cout, B*HW) f32
        conv = jnp.maximum(conv + cb_ref[...], 0.0)             # bias + ReLU
        cout, bhw = conv.shape
        hw = bhw // B
        # Relayout (Cout, B*HW) -> (B, Cout*HW) in PyTorch (C,H,W) flatten
        # order via vreg-aligned single-row stores (idle vst slots; no
        # sublane concats, no per-channel matmuls).
        for co in range(cout):
            for b in range(B):
                act_ref[b:b + 1, co * hw:(co + 1) * hw] = (
                    conv[co:co + 1, b * hw:(b + 1) * hw])
        act = act_ref[...].astype(jnp.bfloat16)                 # (B, Cout*HW)
        # ONE MXU matmul per encoder: (B, Cout*HW) @ (Cout*HW, ENC_DIM)
        return (jnp.dot(act, fcw_ref[...],
                        preferred_element_type=jnp.float32)
                + fcb_ref[...])                                  # (B, ENC_DIM) f32

    img_feat = conv_encoder(img_pat_ref, img_w_ref, img_b_ref,
                            img_fcw_ref, img_fcb_ref, img_act)
    aud_feat = conv_encoder(aud_pat_ref, aud_w_ref, aud_b_ref,
                            aud_fcw_ref, aud_fcb_ref, aud_act)

    # ---- fusion head on VPU/XLU (N=1: broadcast-mul + lane reduce per
    # modality; head weight pre-split in the wrapper, so no feature concat).
    out_ref[...] = (jnp.sum(text_feat * hw_txt_ref[...], axis=-1, keepdims=True)
                    + jnp.sum(img_feat * hw_img_ref[...], axis=-1, keepdims=True)
                    + jnp.sum(aud_feat * hw_aud_ref[...], axis=-1, keepdims=True)
                    + head_b_ref[0])


# ---------------------------------------------------------------------------
# Wrapper-side im2col (input preprocessing only; tiny, free layout plumbing).
# ---------------------------------------------------------------------------
def _im2col_T(x, k=3):
    """x: (B, C, H, W) -> (C*k*k, B*H*W) patches for a stride-1 'same' conv.

    K-dim ordering (ci, ky, kx) matches PyTorch's Conv2d weight flatten;
    column ordering is b*H*W + y*W + x (row-major spatial), which matches the
    (C, H, W) flatten order expected by the FC weight rows.
    """
    B, C, H, W = x.shape
    xp = jnp.pad(x, ((0, 0), (0, 0), (1, 1), (1, 1)))
    cols = []
    for ky in range(k):
        for kx in range(k):
            cols.append(xp[:, :, ky:ky + H, kx:kx + W])     # (B, C, H, W)
    pat = jnp.stack(cols, axis=2)                           # (B, C, k*k, H, W)
    pat = pat.reshape(B, C * k * k, H * W)                  # (B, C*k*k, HW)
    pat = jnp.transpose(pat, (1, 0, 2))                     # (C*k*k, B, HW)
    return pat.reshape(C * k * k, B * H * W)


# ---------------------------------------------------------------------------
# Parameter construction (deterministic, synthetic; PyTorch-style layouts).
# ---------------------------------------------------------------------------
def init_params(key):
    ks = jax.random.split(key, 10)
    s = 0.02
    return {
        "emb": jax.random.normal(ks[0], (VOCAB, EMBED), jnp.float32) * s,
        # conv weights in PyTorch (Cout, Cin, kh, kw) layout
        "img_conv_w": jax.random.normal(ks[1], (CONV_OUT, IMG_C, 3, 3), jnp.float32) * s,
        "img_conv_b": jax.random.normal(ks[2], (CONV_OUT,), jnp.float32) * s,
        "aud_conv_w": jax.random.normal(ks[3], (CONV_OUT, 1, 3, 3), jnp.float32) * s,
        "aud_conv_b": jax.random.normal(ks[4], (CONV_OUT,), jnp.float32) * s,
        # linear weights stored as (in, out) == torch weight.T, rows in (C,H,W) order
        "img_fc_w": jax.random.normal(ks[5], (CONV_OUT * IMG_HW, ENC_DIM), jnp.float32) * s,
        "img_fc_b": jax.random.normal(ks[6], (ENC_DIM,), jnp.float32) * s,
        "aud_fc_w": jax.random.normal(ks[7], (CONV_OUT * AUD_HW, ENC_DIM), jnp.float32) * s,
        "aud_fc_b": jax.random.normal(ks[8], (ENC_DIM,), jnp.float32) * s,
        "fc_w": jax.random.normal(ks[9], (EMBED + 2 * ENC_DIM, 1), jnp.float32) * s,
        "fc_b": jnp.zeros((1,), jnp.float32),
    }


# ---------------------------------------------------------------------------
# Forward pass (mirrors MultimodalModel.forward) — ONE grid-less pallas_call.
# ---------------------------------------------------------------------------
@jax.jit
def multimodal_forward(params, text, image, audio):
    B, L = text.shape
    # Clamp ids: TPU does no runtime bounds check on VMEM refs, so an id
    # >= VOCAB would silently read adjacent VMEM.
    ids = jnp.clip(text.reshape(B * L), 0, VOCAB - 1).astype(jnp.int32)

    # Input-side im2col + weight reshapes / casts (tiny, raw inputs & params
    # only; free layout plumbing).  bf16 operands, f32 accumulation in-kernel.
    img_pat = _im2col_T(image).astype(jnp.bfloat16)              # (27, B*256)
    aud_pat = _im2col_T(audio[:, None, :, :]).astype(jnp.bfloat16)  # (9, B*128)

    img_w2 = params["img_conv_w"].reshape(CONV_OUT, -1).astype(jnp.bfloat16)
    aud_w2 = params["aud_conv_w"].reshape(CONV_OUT, -1).astype(jnp.bfloat16)
    img_b2 = params["img_conv_b"].reshape(CONV_OUT, 1)
    aud_b2 = params["aud_conv_b"].reshape(CONV_OUT, 1)
    img_fcw = params["img_fc_w"].astype(jnp.bfloat16)            # (4096, 64)
    aud_fcw = params["aud_fc_w"].astype(jnp.bfloat16)            # (2048, 64)
    img_fcb = params["img_fc_b"].reshape(1, ENC_DIM)
    aud_fcb = params["aud_fc_b"].reshape(1, ENC_DIM)

    # Head weight split per modality (so no feature concat is needed in-kernel).
    hw = params["fc_w"][:, 0]
    hw_txt = hw[:EMBED].reshape(1, EMBED)
    hw_img = hw[EMBED:EMBED + ENC_DIM].reshape(1, ENC_DIM)
    hw_aud = hw[EMBED + ENC_DIM:].reshape(1, ENC_DIM)
    head_b = params["fc_b"].reshape(1)

    vmem = pl.BlockSpec(memory_space=_VMEM)
    smem = pl.BlockSpec(memory_space=_SMEM)

    flops = 2 * (CONV_OUT * 9 * IMG_C * B * IMG_HW          # img conv
                 + B * CONV_OUT * IMG_HW * ENC_DIM          # img FC
                 + CONV_OUT * 9 * 1 * B * AUD_HW            # aud conv
                 + B * CONV_OUT * AUD_HW * ENC_DIM)          # aud FC
    bytes_accessed = (VOCAB * EMBED * 4
                      + (9 * IMG_C * B * IMG_HW + 9 * B * AUD_HW) * 2
                      + (CONV_OUT * IMG_HW + CONV_OUT * AUD_HW) * ENC_DIM * 2
                      + 8192)

    # TODO(synk): at full scale, add a "parallel" grid axis (modalities /
    # batch tiles) for v7x's second TensorCore and stream the FC weights with
    # a gridded K contraction; unnecessary at this demo size.
    return pl.pallas_call(
        fused_forward_kernel,
        out_shape=jax.ShapeDtypeStruct((B, 1), jnp.float32),
        in_specs=[smem] + [vmem] * 14 + [smem],
        out_specs=vmem,
        scratch_shapes=[
            pltpu.VMEM((B, EMBED), jnp.float32),
            pltpu.VMEM((B, CONV_OUT * IMG_HW), jnp.float32),
            pltpu.VMEM((B, CONV_OUT * AUD_HW), jnp.float32),
        ],
        compiler_params=pltpu.CompilerParams(vmem_limit_bytes=16 * 1024 * 1024),
        cost_estimate=pl.CostEstimate(flops=flops, transcendentals=0,
                                      bytes_accessed=bytes_accessed),
    )(ids, params["emb"],
      img_pat, img_w2, img_b2, img_fcw, img_fcb,
      aud_pat, aud_w2, aud_b2, aud_fcw, aud_fcb,
      hw_txt, hw_img, hw_aud, head_b)


# ---------------------------------------------------------------------------
# Pure-JAX reference (mirrors the PyTorch module exactly) for validation.
# ---------------------------------------------------------------------------
def reference_forward(params, text, image, audio):
    text_feat = params["emb"][text].mean(axis=1)

    def enc(x, wc, bc, wl, bl):
        y = jax.lax.conv_general_dilated(
            x, wc, window_strides=(1, 1), padding="SAME",
            dimension_numbers=("NCHW", "OIHW", "NCHW"))
        y = jax.nn.relu(y + bc[None, :, None, None])
        y = y.reshape(y.shape[0], -1)                    # (C, H, W) flatten
        return y @ wl + bl

    img_feat = enc(image, params["img_conv_w"], params["img_conv_b"],
                   params["img_fc_w"], params["img_fc_b"])
    aud_feat = enc(audio[:, None, :, :], params["aud_conv_w"], params["aud_conv_b"],
                   params["aud_fc_w"], params["aud_fc_b"])
    feats = jnp.concatenate([text_feat, img_feat, aud_feat], axis=1)
    return feats @ params["fc_w"] + params["fc_b"]


# ---------------------------------------------------------------------------
if __name__ == "__main__":
    key = jax.random.PRNGKey(0)
    k_par, k_txt, k_img, k_aud = jax.random.split(key, 4)

    params = init_params(k_par)

    text = jax.random.randint(k_txt, (BATCH, SEQ), 0, VOCAB, dtype=jnp.int32)
    image = jax.random.normal(k_img, (BATCH, IMG_C, IMG_H, IMG_W), jnp.float32)
    audio = jax.random.normal(k_aud, (BATCH, AUD_H, AUD_W), jnp.float32)

    out = multimodal_forward(params, text, image, audio)
    out = jax.block_until_ready(out)

    assert out.shape == (BATCH, 1), out.shape
    assert out.dtype == jnp.float32

    ref = reference_forward(params, text, image, audio)
    assert jnp.allclose(out, ref, rtol=5e-2, atol=5e-3), (
        float(jnp.max(jnp.abs(out - ref))))

    print("KERNEL_OK")
</pallas_src>

<mosaic_0001>
module attributes {stable_mosaic.version = 11 : i64} {
  func.func @fused_forward_kernel(%arg0: memref<16xi32, #tpu.memory_space<smem>>, %arg1: memref<1000x64xf32, #tpu.memory_space<vmem>>, %arg2: memref<27x512xbf16, #tpu.memory_space<vmem>>, %arg3: memref<16x27xbf16, #tpu.memory_space<vmem>>, %arg4: memref<16x1xf32, #tpu.memory_space<vmem>>, %arg5: memref<4096x64xbf16, #tpu.memory_space<vmem>>, %arg6: memref<1x64xf32, #tpu.memory_space<vmem>>, %arg7: memref<9x256xbf16, #tpu.memory_space<vmem>>, %arg8: memref<16x9xbf16, #tpu.memory_space<vmem>>, %arg9: memref<16x1xf32, #tpu.memory_space<vmem>>, %arg10: memref<2048x64xbf16, #tpu.memory_space<vmem>>, %arg11: memref<1x64xf32, #tpu.memory_space<vmem>>, %arg12: memref<1x64xf32, #tpu.memory_space<vmem>>, %arg13: memref<1x64xf32, #tpu.memory_space<vmem>>, %arg14: memref<1x64xf32, #tpu.memory_space<vmem>>, %arg15: memref<1xf32, #tpu.memory_space<smem>>, %arg16: memref<2x1xf32, #tpu.memory_space<vmem>>, %arg17: memref<2x64xf32, #tpu.memory_space<vmem>>, %arg18: memref<2x4096xf32, #tpu.memory_space<vmem>>, %arg19: memref<2x2048xf32, #tpu.memory_space<vmem>>) attributes {dimension_semantics = [], scalar_prefetch = 0 : i64, scratch_operands = 3 : i64, tpu.core_type = #tpu.core_type<tc>} {
    %c0 = arith.constant 0 : index
    %0 = memref.load %arg0[%c0] : memref<16xi32, #tpu.memory_space<smem>>
    %1 = arith.index_cast %0 : i32 to index
    %c0_0 = arith.constant 0 : index
    %2 = vector.load %arg1[%1, %c0_0] : memref<1000x64xf32, #tpu.memory_space<vmem>>, vector<1x64xf32>
    %c1 = arith.constant 1 : index
    %3 = memref.load %arg0[%c1] : memref<16xi32, #tpu.memory_space<smem>>
    %4 = arith.index_cast %3 : i32 to index
    %c0_1 = arith.constant 0 : index
    %5 = vector.load %arg1[%4, %c0_1] : memref<1000x64xf32, #tpu.memory_space<vmem>>, vector<1x64xf32>
    %6 = arith.addf %2, %5 : vector<1x64xf32>
    %c2 = arith.constant 2 : index
    %7 = memref.load %arg0[%c2] : memref<16xi32, #tpu.memory_space<smem>>
    %8 = arith.index_cast %7 : i32 to index
    %c0_2 = arith.constant 0 : index
    %9 = vector.load %arg1[%8, %c0_2] : memref<1000x64xf32, #tpu.memory_space<vmem>>, vector<1x64xf32>
    %10 = arith.addf %6, %9 : vector<1x64xf32>
    %c3 = arith.constant 3 : index
    %11 = memref.load %arg0[%c3] : memref<16xi32, #tpu.memory_space<smem>>
    %12 = arith.index_cast %11 : i32 to index
    %c0_3 = arith.constant 0 : index
    %13 = vector.load %arg1[%12, %c0_3] : memref<1000x64xf32, #tpu.memory_space<vmem>>, vector<1x64xf32>
    %14 = arith.addf %10, %13 : vector<1x64xf32>
    %c4 = arith.constant 4 : index
    %15 = memref.load %arg0[%c4] : memref<16xi32, #tpu.memory_space<smem>>
    %16 = arith.index_cast %15 : i32 to index
    %c0_4 = arith.constant 0 : index
    %17 = vector.load %arg1[%16, %c0_4] : memref<1000x64xf32, #tpu.memory_space<vmem>>, vector<1x64xf32>
    %18 = arith.addf %14, %17 : vector<1x64xf32>
    %c5 = arith.constant 5 : index
    %19 = memref.load %arg0[%c5] : memref<16xi32, #tpu.memory_space<smem>>
    %20 = arith.index_cast %19 : i32 to index
    %c0_5 = arith.constant 0 : index
    %21 = vector.load %arg1[%20, %c0_5] : memref<1000x64xf32, #tpu.memory_space<vmem>>, vector<1x64xf32>
    %22 = arith.addf %18, %21 : vector<1x64xf32>
    %c6 = arith.constant 6 : index
    %23 = memref.load %arg0[%c6] : memref<16xi32, #tpu.memory_space<smem>>
    %24 = arith.index_cast %23 : i32 to index
    %c0_6 = arith.constant 0 : index
    %25 = vector.load %arg1[%24, %c0_6] : memref<1000x64xf32, #tpu.memory_space<vmem>>, vector<1x64xf32>
    %26 = arith.addf %22, %25 : vector<1x64xf32>
    %c7 = arith.constant 7 : index
    %27 = memref.load %arg0[%c7] : memref<16xi32, #tpu.memory_space<smem>>
    %28 = arith.index_cast %27 : i32 to index
    %c0_7 = arith.constant 0 : index
    %29 = vector.load %arg1[%28, %c0_7] : memref<1000x64xf32, #tpu.memory_space<vmem>>, vector<1x64xf32>
    %30 = arith.addf %26, %29 : vector<1x64xf32>
    %cst = arith.constant 1.250000e-01 : f32
    %31 = vector.broadcast %cst : f32 to vector<1x64xf32>
    %32 = arith.mulf %30, %31 : vector<1x64xf32>
    %c0_8 = arith.constant 0 : index
    %c0_9 = arith.constant 0 : index
    %33 = vector.load %arg17[%c0_8, %c0_9] : memref<2x64xf32, #tpu.memory_space<vmem>>, vector<1x64xf32>
    tpu.vector_store %arg17[%c0_8, %c0_9], %32 {strides = array<i32>} : memref<2x64xf32, #tpu.memory_space<vmem>>, vector<1x64xf32>,
    %c8 = arith.constant 8 : index
    %34 = memref.load %arg0[%c8] : memref<16xi32, #tpu.memory_space<smem>>
    %35 = arith.index_cast %34 : i32 to index
    %c0_10 = arith.constant 0 : index
    %36 = vector.load %arg1[%35, %c0_10] : memref<1000x64xf32, #tpu.memory_space<vmem>>, vector<1x64xf32>
    %c9 = arith.constant 9 : index
    %37 = memref.load %arg0[%c9] : memref<16xi32, #tpu.memory_space<smem>>
    %38 = arith.index_cast %37 : i32 to index
    %c0_11 = arith.constant 0 : index
    %39 = vector.load %arg1[%38, %c0_11] : memref<1000x64xf32, #tpu.memory_space<vmem>>, vector<1x64xf32>
    %40 = arith.addf %36, %39 : vector<1x64xf32>
    %c10 = arith.constant 10 : index
    %41 = memref.load %arg0[%c10] : memref<16xi32, #tpu.memory_space<smem>>
    %42 = arith.index_cast %41 : i32 to index
    %c0_12 = arith.constant 0 : index
    %43 = vector.load %arg1[%42, %c0_12] : memref<1000x64xf32, #tpu.memory_space<vmem>>, vector<1x64xf32>
    %44 = arith.addf %40, %43 : vector<1x64xf32>
    %c11 = arith.constant 11 : index
    %45 = memref.load %arg0[%c11] : memref<16xi32, #tpu.memory_space<smem>>
    %46 = arith.index_cast %45 : i32 to index
    %c0_13 = arith.constant 0 : index
    %47 = vector.load %arg1[%46, %c0_13] : memref<1000x64xf32, #tpu.memory_space<vmem>>, vector<1x64xf32>
    %48 = arith.addf %44, %47 : vector<1x64xf32>
    %c12 = arith.constant 12 : index
    %49 = memref.load %arg0[%c12] : memref<16xi32, #tpu.memory_space<smem>>
    %50 = arith.index_cast %49 : i32 to index
    %c0_14 = arith.constant 0 : index
    %51 = vector.load %arg1[%50, %c0_14] : memref<1000x64xf32, #tpu.memory_space<vmem>>, vector<1x64xf32>
    %52 = arith.addf %48, %51 : vector<1x64xf32>
    %c13 = arith.constant 13 : index
    %53 = memref.load %arg0[%c13] : memref<16xi32, #tpu.memory_space<smem>>
    %54 = arith.index_cast %53 : i32 to index
    %c0_15 = arith.constant 0 : index
    %55 = vector.load %arg1[%54, %c0_15] : memref<1000x64xf32, #tpu.memory_space<vmem>>, vector<1x64xf32>
    %56 = arith.addf %52, %55 : vector<1x64xf32>
    %c14 = arith.constant 14 : index
    %57 = memref.load %arg0[%c14] : memref<16xi32, #tpu.memory_space<smem>>
    %58 = arith.index_cast %57 : i32 to index
    %c0_16 = arith.constant 0 : index
    %59 = vector.load %arg1[%58, %c0_16] : memref<1000x64xf32, #tpu.memory_space<vmem>>, vector<1x64xf32>
    %60 = arith.addf %56, %59 : vector<1x64xf32>
    %c15 = arith.constant 15 : index
    %61 = memref.load %arg0[%c15] : memref<16xi32, #tpu.memory_space<smem>>
    %62 = arith.index_cast %61 : i32 to index
    %c0_17 = arith.constant 0 : index
    %63 = vector.load %arg1[%62, %c0_17] : memref<1000x64xf32, #tpu.memory_space<vmem>>, vector<1x64xf32>
    %64 = arith.addf %60, %63 : vector<1x64xf32>
    %cst_18 = arith.constant 1.250000e-01 : f32
    %65 = vector.broadcast %cst_18 : f32 to vector<1x64xf32>
    %66 = arith.mulf %64, %65 : vector<1x64xf32>
    %c1_19 = arith.constant 1 : index
    %c0_20 = arith.constant 0 : index
    %67 = vector.load %arg17[%c1_19, %c0_20] : memref<2x64xf32, #tpu.memory_space<vmem>>, vector<1x64xf32>
    tpu.vector_store %arg17[%c1_19, %c0_20], %66 {strides = array<i32>} : memref<2x64xf32, #tpu.memory_space<vmem>>, vector<1x64xf32>,
    %c0_21 = arith.constant 0 : index
    %c0_22 = arith.constant 0 : index
    %68 = vector.load %arg17[%c0_21, %c0_22] : memref<2x64xf32, #tpu.memory_space<vmem>>, vector<2x64xf32>
    %c0_23 = arith.constant 0 : index
    %c0_24 = arith.constant 0 : index
    %69 = vector.load %arg3[%c0_23, %c0_24] : memref<16x27xbf16, #tpu.memory_space<vmem>>, vector<16x27xbf16>
    %c0_25 = arith.constant 0 : index
    %c0_26 = arith.constant 0 : index
    %70 = vector.load %arg2[%c0_25, %c0_26] : memref<27x512xbf16, #tpu.memory_space<vmem>>, vector<27x512xbf16>
    %cst_27 = arith.constant dense<0.000000e+00> : vector<16x512xf32>
    %71 = tpu.matmul %69, %70, %cst_27 {dimension_numbers = #tpu.dot_dimension_numbers<[1], [0], [0], [1], [0, 0, 1, 1], [], []>} : vector<16x27xbf16>, vector<27x512xbf16>, vector<16x512xf32> -> vector<16x512xf32>
    %c0_28 = arith.constant 0 : index
    %c0_29 = arith.constant 0 : index
    %72 = vector.load %arg4[%c0_28, %c0_29] : memref<16x1xf32, #tpu.memory_space<vmem>>, vector<16x1xf32>
    %73 = vector.broadcast %72 : vector<16x1xf32> to vector<16x512xf32>
    %74 = arith.addf %71, %73 : vector<16x512xf32>
    %cst_30 = arith.constant 0.000000e+00 : f32
    %75 = vector.broadcast %cst_30 : f32 to vector<16x512xf32>
    %76 = arith.maximumf %74, %75 : vector<16x512xf32>
    %77 = vector.extract_strided_slice %76 {offsets = [0, 0], sizes = [1, 256], strides = [1, 1]} : vector<16x512xf32> to vector<1x256xf32>
    %c0_31 = arith.constant 0 : index
    %c0_32 = arith.constant 0 : index
    %78 = vector.load %arg18[%c0_31, %c0_32] : memref<2x4096xf32, #tpu.memory_space<vmem>>, vector<1x256xf32>
    tpu.vector_store %arg18[%c0_31, %c0_32], %77 {strides = array<i32>} : memref<2x4096xf32, #tpu.memory_space<vmem>>, vector<1x256xf32>,
    %79 = vector.extract_strided_slice %76 {offsets = [0, 256], sizes = [1, 256], strides = [1, 1]} : vector<16x512xf32> to vector<1x256xf32>
    %c1_33 = arith.constant 1 : index
    %c0_34 = arith.constant 0 : index
    %80 = vector.load %arg18[%c1_33, %c0_34] : memref<2x4096xf32, #tpu.memory_space<vmem>>, vector<1x256xf32>
    tpu.vector_store %arg18[%c1_33, %c0_34], %79 {strides = array<i32>} : memref<2x4096xf32, #tpu.memory_space<vmem>>, vector<1x256xf32>,
    %81 = vector.extract_strided_slice %76 {offsets = [1, 0], sizes = [1, 256], strides = [1, 1]} : vector<16x512xf32> to vector<1x256xf32>
    %c0_35 = arith.constant 0 : index
    %c256 = arith.constant 256 : index
    %82 = vector.load %arg18[%c0_35, %c256] : memref<2x4096xf32, #tpu.memory_space<vmem>>, vector<1x256xf32>
    tpu.vector_store %arg18[%c0_35, %c256], %81 {strides = array<i32>} : memref<2x4096xf32, #tpu.memory_space<vmem>>, vector<1x256xf32>,
    %83 = vector.extract_strided_slice %76 {offsets = [1, 256], sizes = [1, 256], strides = [1, 1]} : vector<16x512xf32> to vector<1x256xf32>
    %c1_36 = arith.constant 1 : index
    %c256_37 = arith.constant 256 : index
    %84 = vector.load %arg18[%c1_36, %c256_37] : memref<2x4096xf32, #tpu.memory_space<vmem>>, vector<1x256xf32>
    tpu.vector_store %arg18[%c1_36, %c256_37], %83 {strides = array<i32>} : memref<2x4096xf32, #tpu.memory_space<vmem>>, vector<1x256xf32>,
    %85 = vector.extract_strided_slice %76 {offsets = [2, 0], sizes = [1, 256], strides = [1, 1]} : vector<16x512xf32> to vector<1x256xf32>
    %c0_38 = arith.constant 0 : index
    %c512 = arith.constant 512 : index
    %86 = vector.load %arg18[%c0_38, %c512] : memref<2x4096xf32, #tpu.memory_space<vmem>>, vector<1x256xf32>
    tpu.vector_store %arg18[%c0_38, %c512], %85 {strides = array<i32>} : memref<2x4096xf32, #tpu.memory_space<vmem>>, vector<1x256xf32>,
    %87 = vector.extract_strided_slice %76 {offsets = [2, 256], sizes = [1, 256], strides = [1, 1]} : vector<16x512xf32> to vector<1x256xf32>
    %c1_39 = arith.constant 1 : index
    %c512_40 = arith.constant 512 : index
    %88 = vector.load %arg18[%c1_39, %c512_40] : memref<2x4096xf32, #tpu.memory_space<vmem>>, vector<1x256xf32>
    tpu.vector_store %arg18[%c1_39, %c512_40], %87 {strides = array<i32>} : memref<2x4096xf32, #tpu.memory_space<vmem>>, vector<1x256xf32>,
    %89 = vector.extract_strided_slice %76 {offsets = [3, 0], sizes = [1, 256], strides = [1, 1]} : vector<16x512xf32> to vector<1x256xf32>
    %c0_41 = arith.constant 0 : index
    %c768 = arith.constant 768 : index
    %90 = vector.load %arg18[%c0_41, %c768] : memref<2x4096xf32, #tpu.memory_space<vmem>>, vector<1x256xf32>
    tpu.vector_store %arg18[%c0_41, %c768], %89 {strides = array<i32>} : memref<2x4096xf32, #tpu.memory_space<vmem>>, vector<1x256xf32>,
    %91 = vector.extract_strided_slice %76 {offsets = [3, 256], sizes = [1, 256], strides = [1, 1]} : vector<16x512xf32> to vector<1x256xf32>
    %c1_42 = arith.constant 1 : index
    %c768_43 = arith.constant 768 : index
    %92 = vector.load %arg18[%c1_42, %c768_43] : memref<2x4096xf32, #tpu.memory_space<vmem>>, vector<1x256xf32>
    tpu.vector_store %arg18[%c1_42, %c768_43], %91 {strides = array<i32>} : memref<2x4096xf32, #tpu.memory_space<vmem>>, vector<1x256xf32>,
    %93 = vector.extract_strided_slice %76 {offsets = [4, 0], sizes = [1, 256], strides = [1, 1]} : vector<16x512xf32> to vector<1x256xf32>
    %c0_44 = arith.constant 0 : index
    %c1024 = arith.constant 1024 : index
    %94 = vector.load %arg18[%c0_44, %c1024] : memref<2x4096xf32, #tpu.memory_space<vmem>>, vector<1x256xf32>
    tpu.vector_store %arg18[%c0_44, %c1024], %93 {strides = array<i32>} : memref<2x4096xf32, #tpu.memory_space<vmem>>, vector<1x256xf32>,
    %95 = vector.extract_strided_slice %76 {offsets = [4, 256], sizes = [1, 256], strides = [1, 1]} : vector<16x512xf32> to vector<1x256xf32>
    %c1_45 = arith.constant 1 : index
    %c1024_46 = arith.constant 1024 : index
    %96 = vector.load %arg18[%c1_45, %c1024_46] : memref<2x4096xf32, #tpu.memory_space<vmem>>, vector<1x256xf32>
    tpu.vector_store %arg18[%c1_45, %c1024_46], %95 {strides = array<i32>} : memref<2x4096xf32, #tpu.memory_space<vmem>>, vector<1x256xf32>,
    %97 = vector.extract_strided_slice %76 {offsets = [5, 0], sizes = [1, 256], strides = [1, 1]} : vector<16x512xf32> to vector<1x256xf32>
    %c0_47 = arith.constant 0 : index
    %c1280 = arith.constant 1280 : index
    %98 = vector.load %arg18[%c0_47, %c1280] : memref<2x4096xf32, #tpu.memory_space<vmem>>, vector<1x256xf32>
    tpu.vector_store %arg18[%c0_47, %c1280], %97 {strides = array<i32>} : memref<2x4096xf32, #tpu.memory_space<vmem>>, vector<1x256xf32>,
    %99 = vector.extract_strided_slice %76 {offsets = [5, 256], sizes = [1, 256], strides = [1, 1]} : vector<16x512xf32> to vector<1x256xf32>
    %c1_48 = arith.constant 1 : index
    %c1280_49 = arith.constant 1280 : index
    %100 = vector.load %arg18[%c1_48, %c1280_49] : memref<2x4096xf32, #tpu.memory_space<vmem>>, vector<1x256xf32>
    tpu.vector_store %arg18[%c1_48, %c1280_49], %99 {strides = array<i32>} : memref<2x4096xf32, #tpu.memory_space<vmem>>, vector<1x256xf32>,
    %101 = vector.extract_strided_slice %76 {offsets = [6, 0], sizes = [1, 256], strides = [1, 1]} : vector<16x512xf32> to vector<1x256xf32>
    %c0_50 = arith.constant 0 : index
    %c1536 = arith.constant 1536 : index
    %102 = vector.load %arg18[%c0_50, %c1536] : memref<2x4096xf32, #tpu.memory_space<vmem>>, vector<1x256xf32>
    tpu.vector_store %arg18[%c0_50, %c1536], %101 {strides = array<i32>} : memref<2x4096xf32, #tpu.memory_space<vmem>>, vector<1x256xf32>,
    %103 = vector.extract_strided_slice %76 {offsets = [6, 256], sizes = [1, 256], strides = [1, 1]} : vector<16x512xf32> to vector<1x256xf32>
    %c1_51 = arith.constant 1 : index
    %c1536_52 = arith.constant 1536 : index
    %104 = vector.load %arg18[%c1_51, %c1536_52] : memref<2x4096xf32, #tpu.memory_space<vmem>>, vector<1x256xf32>
    tpu.vector_store %arg18[%c1_51, %c1536_52], %103 {strides = array<i32>} : memref<2x4096xf32, #tpu.memory_space<vmem>>, vector<1x256xf32>,
    %105 = vector.extract_strided_slice %76 {offsets = [7, 0], sizes = [1, 256], strides = [1, 1]} : vector<16x512xf32> to vector<1x256xf32>
    %c0_53 = arith.constant 0 : index
    %c1792 = arith.constant 1792 : index
    %106 = vector.load %arg18[%c0_53, %c1792] : memref<2x4096xf32, #tpu.memory_space<vmem>>, vector<1x256xf32>
    tpu.vector_store %arg18[%c0_53, %c1792], %105 {strides = array<i32>} : memref<2x4096xf32, #tpu.memory_space<vmem>>, vector<1x256xf32>,
    %107 = vector.extract_strided_slice %76 {offsets = [7, 256], sizes = [1, 256], strides = [1, 1]} : vector<16x512xf32> to vector<1x256xf32>
    %c1_54 = arith.constant 1 : index
    %c1792_55 = arith.constant 1792 : index
    %108 = vector.load %arg18[%c1_54, %c1792_55] : memref<2x4096xf32, #tpu.memory_space<vmem>>, vector<1x256xf32>
    tpu.vector_store %arg18[%c1_54, %c1792_55], %107 {strides = array<i32>} : memref<2x4096xf32, #tpu.memory_space<vmem>>, vector<1x256xf32>,
    %109 = vector.extract_strided_slice %76 {offsets = [8, 0], sizes = [1, 256], strides = [1, 1]} : vector<16x512xf32> to vector<1x256xf32>
    %c0_56 = arith.constant 0 : index
    %c2048 = arith.constant 2048 : index
    %110 = vector.load %arg18[%c0_56, %c2048] : memref<2x4096xf32, #tpu.memory_space<vmem>>, vector<1x256xf32>
    tpu.vector_store %arg18[%c0_56, %c2048], %109 {strides = array<i32>} : memref<2x4096xf32, #tpu.memory_space<vmem>>, vector<1x256xf32>,
    %111 = vector.extract_strided_slice %76 {offsets = [8, 256], sizes = [1, 256], strides = [1, 1]} : vector<16x512xf32> to vector<1x256xf32>
    %c1_57 = arith.constant 1 : index
    %c2048_58 = arith.constant 2048 : index
    %112 = vector.load %arg18[%c1_57, %c2048_58] : memref<2x4096xf32, #tpu.memory_space<vmem>>, vector<1x256xf32>
    tpu.vector_store %arg18[%c1_57, %c2048_58], %111 {strides = array<i32>} : memref<2x4096xf32, #tpu.memory_space<vmem>>, vector<1x256xf32>,
    %113 = vector.extract_strided_slice %76 {offsets = [9, 0], sizes = [1, 256], strides = [1, 1]} : vector<16x512xf32> to vector<1x256xf32>
    %c0_59 = arith.constant 0 : index
    %c2304 = arith.constant 2304 : index
    %114 = vector.load %arg18[%c0_59, %c2304] : memref<2x4096xf32, #tpu.memory_space<vmem>>, vector<1x256xf32>
    tpu.vector_store %arg18[%c0_59, %c2304], %113 {strides = array<i32>} : memref<2x4096xf32, #tpu.memory_space<vmem>>, vector<1x256xf32>,
    %115 = vector.extract_strided_slice %76 {offsets = [9, 256], sizes = [1, 256], strides = [1, 1]} : vector<16x512xf32> to vector<1x256xf32>
    %c1_60 = arith.constant 1 : index
    %c2304_61 = arith.constant 2304 : index
    %116 = vector.load %arg18[%c1_60, %c2304_61] : memref<2x4096xf32, #tpu.memory_space<vmem>>, vector<1x256xf32>
    tpu.vector_store %arg18[%c1_60, %c2304_61], %115 {strides = array<i32>} : memref<2x4096xf32, #tpu.memory_space<vmem>>, vector<1x256xf32>,
    %117 = vector.extract_strided_slice %76 {offsets = [10, 0], sizes = [1, 256], strides = [1, 1]} : vector<16x512xf32> to vector<1x256xf32>
    %c0_62 = arith.constant 0 : index
    %c2560 = arith.constant 2560 : index
    %118 = vector.load %arg18[%c0_62, %c2560] : memref<2x4096xf32, #tpu.memory_space<vmem>>, vector<1x256xf32>
    tpu.vector_store %arg18[%c0_62, %c2560], %117 {strides = array<i32>} : memref<2x4096xf32, #tpu.memory_space<vmem>>, vector<1x256xf32>,
    %119 = vector.extract_strided_slice %76 {offsets = [10, 256], sizes = [1, 256], strides = [1, 1]} : vector<16x512xf32> to vector<1x256xf32>
    %c1_63 = arith.constant 1 : index
    %c2560_64 = arith.constant 2560 : index
    %120 = vector.load %arg18[%c1_63, %c2560_64] : memref<2x4096xf32, #tpu.memory_space<vmem>>, vector<1x256xf32>
    tpu.vector_store %arg18[%c1_63, %c2560_64], %119 {strides = array<i32>} : memref<2x4096xf32, #tpu.memory_space<vmem>>, vector<1x256xf32>,
    %121 = vector.extract_strided_slice %76 {offsets = [11, 0], sizes = [1, 256], strides = [1, 1]} : vector<16x512xf32> to vector<1x256xf32>
    %c0_65 = arith.constant 0 : index
    %c2816 = arith.constant 2816 : index
    %122 = vector.load %arg18[%c0_65, %c2816] : memref<2x4096xf32, #tpu.memory_space<vmem>>, vector<1x256xf32>
    tpu.vector_store %arg18[%c0_65, %c2816], %121 {strides = array<i32>} : memref<2x4096xf32, #tpu.memory_space<vmem>>, vector<1x256xf32>,
    %123 = vector.extract_strided_slice %76 {offsets = [11, 256], sizes = [1, 256], strides = [1, 1]} : vector<16x512xf32> to vector<1x256xf32>
    %c1_66 = arith.constant 1 : index
    %c2816_67 = arith.constant 2816 : index
    %124 = vector.load %arg18[%c1_66, %c2816_67] : memref<2x4096xf32, #tpu.memory_space<vmem>>, vector<1x256xf32>
    tpu.vector_store %arg18[%c1_66, %c2816_67], %123 {strides = array<i32>} : memref<2x4096xf32, #tpu.memory_space<vmem>>, vector<1x256xf32>,
    %125 = vector.extract_strided_slice %76 {offsets = [12, 0], sizes = [1, 256], strides = [1, 1]} : vector<16x512xf32> to vector<1x256xf32>
    %c0_68 = arith.constant 0 : index
    %c3072 = arith.constant 3072 : index
    %126 = vector.load %arg18[%c0_68, %c3072] : memref<2x4096xf32, #tpu.memory_space<vmem>>, vector<1x256xf32>
    tpu.vector_store %arg18[%c0_68, %c3072], %125 {strides = array<i32>} : memref<2x4096xf32, #tpu.memory_space<vmem>>, vector<1x256xf32>,
    %127 = vector.extract_strided_slice %76 {offsets = [12, 256], sizes = [1, 256], strides = [1, 1]} : vector<16x512xf32> to vector<1x256xf32>
    %c1_69 = arith.constant 1 : index
    %c3072_70 = arith.constant 3072 : index
    %128 = vector.load %arg18[%c1_69, %c3072_70] : memref<2x4096xf32, #tpu.memory_space<vmem>>, vector<1x256xf32>
    tpu.vector_store %arg18[%c1_69, %c3072_70], %127 {strides = array<i32>} : memref<2x4096xf32, #tpu.memory_space<vmem>>, vector<1x256xf32>,
    %129 = vector.extract_strided_slice %76 {offsets = [13, 0], sizes = [1, 256], strides = [1, 1]} : vector<16x512xf32> to vector<1x256xf32>
    %c0_71 = arith.constant 0 : index
    %c3328 = arith.constant 3328 : index
    %130 = vector.load %arg18[%c0_71, %c3328] : memref<2x4096xf32, #tpu.memory_space<vmem>>, vector<1x256xf32>
    tpu.vector_store %arg18[%c0_71, %c3328], %129 {strides = array<i32>} : memref<2x4096xf32, #tpu.memory_space<vmem>>, vector<1x256xf32>,
    %131 = vector.extract_strided_slice %76 {offsets = [13, 256], sizes = [1, 256], strides = [1, 1]} : vector<16x512xf32> to vector<1x256xf32>
    %c1_72 = arith.constant 1 : index
    %c3328_73 = arith.constant 3328 : index
    %132 = vector.load %arg18[%c1_72, %c3328_73] : memref<2x4096xf32, #tpu.memory_space<vmem>>, vector<1x256xf32>
    tpu.vector_store %arg18[%c1_72, %c3328_73], %131 {strides = array<i32>} : memref<2x4096xf32, #tpu.memory_space<vmem>>, vector<1x256xf32>,
    %133 = vector.extract_strided_slice %76 {offsets = [14, 0], sizes = [1, 256], strides = [1, 1]} : vector<16x512xf32> to vector<1x256xf32>
    %c0_74 = arith.constant 0 : index
    %c3584 = arith.constant 3584 : index
    %134 = vector.load %arg18[%c0_74, %c3584] : memref<2x4096xf32, #tpu.memory_space<vmem>>, vector<1x256xf32>
    tpu.vector_store %arg18[%c0_74, %c3584], %133 {strides = array<i32>} : memref<2x4096xf32, #tpu.memory_space<vmem>>, vector<1x256xf32>,
    %135 = vector.extract_strided_slice %76 {offsets = [14, 256], sizes = [1, 256], strides = [1, 1]} : vector<16x512xf32> to vector<1x256xf32>
    %c1_75 = arith.constant 1 : index
    %c3584_76 = arith.constant 3584 : index
    %136 = vector.load %arg18[%c1_75, %c3584_76] : memref<2x4096xf32, #tpu.memory_space<vmem>>, vector<1x256xf32>
    tpu.vector_store %arg18[%c1_75, %c3584_76], %135 {strides = array<i32>} : memref<2x4096xf32, #tpu.memory_space<vmem>>, vector<1x256xf32>,
    %137 = vector.extract_strided_slice %76 {offsets = [15, 0], sizes = [1, 256], strides = [1, 1]} : vector<16x512xf32> to vector<1x256xf32>
    %c0_77 = arith.constant 0 : index
    %c3840 = arith.constant 3840 : index
    %138 = vector.load %arg18[%c0_77, %c3840] : memref<2x4096xf32, #tpu.memory_space<vmem>>, vector<1x256xf32>
    tpu.vector_store %arg18[%c0_77, %c3840], %137 {strides = array<i32>} : memref<2x4096xf32, #tpu.memory_space<vmem>>, vector<1x256xf32>,
    %139 = vector.extract_strided_slice %76 {offsets = [15, 256], sizes = [1, 256], strides = [1, 1]} : vector<16x512xf32> to vector<1x256xf32>
    %c1_78 = arith.constant 1 : index
    %c3840_79 = arith.constant 3840 : index
    %140 = vector.load %arg18[%c1_78, %c3840_79] : memref<2x4096xf32, #tpu.memory_space<vmem>>, vector<1x256xf32>
    tpu.vector_store %arg18[%c1_78, %c3840_79], %139 {strides = array<i32>} : memref<2x4096xf32, #tpu.memory_space<vmem>>, vector<1x256xf32>,
    %c0_80 = arith.constant 0 : index
    %c0_81 = arith.constant 0 : index
    %141 = vector.load %arg18[%c0_80, %c0_81] : memref<2x4096xf32, #tpu.memory_space<vmem>>, vector<2x4096xf32>
    %142 = arith.truncf %141 : vector<2x4096xf32> to vector<2x4096xbf16>
    %c0_82 = arith.constant 0 : index
    %c0_83 = arith.constant 0 : index
    %143 = vector.load %arg5[%c0_82, %c0_83] : memref<4096x64xbf16, #tpu.memory_space<vmem>>, vector<4096x64xbf16>
    %cst_84 = arith.constant dense<0.000000e+00> : vector<2x64xf32>
    %144 = tpu.matmul %142, %143, %cst_84 {dimension_numbers = #tpu.dot_dimension_numbers<[1], [0], [0], [1], [0, 0, 1, 1], [], []>} : vector<2x4096xbf16>, vector<4096x64xbf16>, vector<2x64xf32> -> vector<2x64xf32>
    %c0_85 = arith.constant 0 : index
    %c0_86 = arith.constant 0 : index
    %145 = vector.load %arg6[%c0_85, %c0_86] : memref<1x64xf32, #tpu.memory_space<vmem>>, vector<1x64xf32>
    %146 = vector.broadcast %145 : vector<1x64xf32> to vector<2x64xf32>
    %147 = arith.addf %144, %146 : vector<2x64xf32>
    %c0_87 = arith.constant 0 : index
    %c0_88 = arith.constant 0 : index
    %148 = vector.load %arg8[%c0_87, %c0_88] : memref<16x9xbf16, #tpu.memory_space<vmem>>, vector<16x9xbf16>
    %c0_89 = arith.constant 0 : index
    %c0_90 = arith.constant 0 : index
    %149 = vector.load %arg7[%c0_89, %c0_90] : memref<9x256xbf16, #tpu.memory_space<vmem>>, vector<9x256xbf16>
    %cst_91 = arith.constant dense<0.000000e+00> : vector<16x256xf32>
    %150 = tpu.matmul %148, %149, %cst_91 {dimension_numbers = #tpu.dot_dimension_numbers<[1], [0], [0], [1], [0, 0, 1, 1], [], []>} : vector<16x9xbf16>, vector<9x256xbf16>, vector<16x256xf32> -> vector<16x256xf32>
    %c0_92 = arith.constant 0 : index
    %c0_93 = arith.constant 0 : index
    %151 = vector.load %arg9[%c0_92, %c0_93] : memref<16x1xf32, #tpu.memory_space<vmem>>, vector<16x1xf32>
    %152 = vector.broadcast %151 : vector<16x1xf32> to vector<16x256xf32>
    %153 = arith.addf %150, %152 : vector<16x256xf32>
    %cst_94 = arith.constant 0.000000e+00 : f32
    %154 = vector.broadcast %cst_94 : f32 to vector<16x256xf32>
    %155 = arith.maximumf %153, %154 : vector<16x256xf32>
    %156 = vector.extract_strided_slice %155 {offsets = [0, 0], sizes = [1, 128], strides = [1, 1]} : vector<16x256xf32> to vector<1x128xf32>
    %c0_95 = arith.constant 0 : index
    %c0_96 = arith.constant 0 : index
    %157 = vector.load %arg19[%c0_95, %c0_96] : memref<2x2048xf32, #tpu.memory_space<vmem>>, vector<1x128xf32>
    tpu.vector_store %arg19[%c0_95, %c0_96], %156 {strides = array<i32>} : memref<2x2048xf32, #tpu.memory_space<vmem>>, vector<1x128xf32>,
    %158 = vector.extract_strided_slice %155 {offsets = [0, 128], sizes = [1, 128], strides = [1, 1]} : vector<16x256xf32> to vector<1x128xf32>
    %c1_97 = arith.constant 1 : index
    %c0_98 = arith.constant 0 : index
    %159 = vector.load %arg19[%c1_97, %c0_98] : memref<2x2048xf32, #tpu.memory_space<vmem>>, vector<1x128xf32>
    tpu.vector_store %arg19[%c1_97, %c0_98], %158 {strides = array<i32>} : memref<2x2048xf32, #tpu.memory_space<vmem>>, vector<1x128xf32>,
    %160 = vector.extract_strided_slice %155 {offsets = [1, 0], sizes = [1, 128], strides = [1, 1]} : vector<16x256xf32> to vector<1x128xf32>
    %c0_99 = arith.constant 0 : index
    %c128 = arith.constant 128 : index
    %161 = vector.load %arg19[%c0_99, %c128] : memref<2x2048xf32, #tpu.memory_space<vmem>>, vector<1x128xf32>
    tpu.vector_store %arg19[%c0_99, %c128], %160 {strides = array<i32>} : memref<2x2048xf32, #tpu.memory_space<vmem>>, vector<1x128xf32>,
    %162 = vector.extract_strided_slice %155 {offsets = [1, 128], sizes = [1, 128], strides = [1, 1]} : vector<16x256xf32> to vector<1x128xf32>
    %c1_100 = arith.constant 1 : index
    %c128_101 = arith.constant 128 : index
    %163 = vector.load %arg19[%c1_100, %c128_101] : memref<2x2048xf32, #tpu.memory_space<vmem>>, vector<1x128xf32>
    tpu.vector_store %arg19[%c1_100, %c128_101], %162 {strides = array<i32>} : memref<2x2048xf32, #tpu.memory_space<vmem>>, vector<1x128xf32>,
    %164 = vector.extract_strided_slice %155 {offsets = [2, 0], sizes = [1, 128], strides = [1, 1]} : vector<16x256xf32> to vector<1x128xf32>
    %c0_102 = arith.constant 0 : index
    %c256_103 = arith.constant 256 : index
    %165 = vector.load %arg19[%c0_102, %c256_103] : memref<2x2048xf32, #tpu.memory_space<vmem>>, vector<1x128xf32>
    tpu.vector_store %arg19[%c0_102, %c256_103], %164 {strides = array<i32>} : memref<2x2048xf32, #tpu.memory_space<vmem>>, vector<1x128xf32>,
    %166 = vector.extract_strided_slice %155 {offsets = [2, 128], sizes = [1, 128], strides = [1, 1]} : vector<16x256xf32> to vector<1x128xf32>
    %c1_104 = arith.constant 1 : index
    %c256_105 = arith.constant 256 : index
    %167 = vector.load %arg19[%c1_104, %c256_105] : memref<2x2048xf32, #tpu.memory_space<vmem>>, vector<1x128xf32>
    tpu.vector_store %arg19[%c1_104, %c256_105], %166 {strides = array<i32>} : memref<2x2048xf32, #tpu.memory_space<vmem>>, vector<1x128xf32>,
    %168 = vector.extract_strided_slice %155 {offsets = [3, 0], sizes = [1, 128], strides = [1, 1]} : vector<16x256xf32> to vector<1x128xf32>
    %c0_106 = arith.constant 0 : index
    %c384 = arith.constant 384 : index
    %169 = vector.load %arg19[%c0_106, %c384] : memref<2x2048xf32, #tpu.memory_space<vmem>>, vector<1x128xf32>
    tpu.vector_store %arg19[%c0_106, %c384], %168 {strides = array<i32>} : memref<2x2048xf32, #tpu.memory_space<vmem>>, vector<1x128xf32>,
    %170 = vector.extract_strided_slice %155 {offsets = [3, 128], sizes = [1, 128], strides = [1, 1]} : vector<16x256xf32> to vector<1x128xf32>
    %c1_107 = arith.constant 1 : index
    %c384_108 = arith.constant 384 : index
    %171 = vector.load %arg19[%c1_107, %c384_108] : memref<2x2048xf32, #tpu.memory_space<vmem>>, vector<1x128xf32>
    tpu.vector_store %arg19[%c1_107, %c384_108], %170 {strides = array<i32>} : memref<2x2048xf32, #tpu.memory_space<vmem>>, vector<1x128xf32>,
    %172 = vector.extract_strided_slice %155 {offsets = [4, 0], sizes = [1, 128], strides = [1, 1]} : vector<16x256xf32> to vector<1x128xf32>
    %c0_109 = arith.constant 0 : index
    %c512_110 = arith.constant 512 : index
    %173 = vector.load %arg19[%c0_109, %c512_110] : memref<2x2048xf32, #tpu.memory_space<vmem>>, vector<1x128xf32>
    tpu.vector_store %arg19[%c0_109, %c512_110], %172 {strides = array<i32>} : memref<2x2048xf32, #tpu.memory_space<vmem>>, vector<1x128xf32>,
    %174 = vector.extract_strided_slice %155 {offsets = [4, 128], sizes = [1, 128], strides = [1, 1]} : vector<16x256xf32> to vector<1x128xf32>
    %c1_111 = arith.constant 1 : index
    %c512_112 = arith.constant 512 : index
    %175 = vector.load %arg19[%c1_111, %c512_112] : memref<2x2048xf32, #tpu.memory_space<vmem>>, vector<1x128xf32>
    tpu.vector_store %arg19[%c1_111, %c512_112], %174 {strides = array<i32>} : memref<2x2048xf32, #tpu.memory_space<vmem>>, vector<1x128xf32>,
    %176 = vector.extract_strided_slice %155 {offsets = [5, 0], sizes = [1, 128], strides = [1, 1]} : vector<16x256xf32> to vector<1x128xf32>
    %c0_113 = arith.constant 0 : index
    %c640 = arith.constant 640 : index
    %177 = vector.load %arg19[%c0_113, %c640] : memref<2x2048xf32, #tpu.memory_space<vmem>>, vector<1x128xf32>
    tpu.vector_store %arg19[%c0_113, %c640], %176 {strides = array<i32>} : memref<2x2048xf32, #tpu.memory_space<vmem>>, vector<1x128xf32>,
    %178 = vector.extract_strided_slice %155 {offsets = [5, 128], sizes = [1, 128], strides = [1, 1]} : vector<16x256xf32> to vector<1x128xf32>
    %c1_114 = arith.constant 1 : index
    %c640_115 = arith.constant 640 : index
    %179 = vector.load %arg19[%c1_114, %c640_115] : memref<2x2048xf32, #tpu.memory_space<vmem>>, vector<1x128xf32>
    tpu.vector_store %arg19[%c1_114, %c640_115], %178 {strides = array<i32>} : memref<2x2048xf32, #tpu.memory_space<vmem>>, vector<1x128xf32>,
    %180 = vector.extract_strided_slice %155 {offsets = [6, 0], sizes = [1, 128], strides = [1, 1]} : vector<16x256xf32> to vector<1x128xf32>
    %c0_116 = arith.constant 0 : index
    %c768_117 = arith.constant 768 : index
    %181 = vector.load %arg19[%c0_116, %c768_117] : memref<2x2048xf32, #tpu.memory_space<vmem>>, vector<1x128xf32>
    tpu.vector_store %arg19[%c0_116, %c768_117], %180 {strides = array<i32>} : memref<2x2048xf32, #tpu.memory_space<vmem>>, vector<1x128xf32>,
    %182 = vector.extract_strided_slice %155 {offsets = [6, 128], sizes = [1, 128], strides = [1, 1]} : vector<16x256xf32> to vector<1x128xf32>
    %c1_118 = arith.constant 1 : index
    %c768_119 = arith.constant 768 : index
    %183 = vector.load %arg19[%c1_118, %c768_119] : memref<2x2048xf32, #tpu.memory_space<vmem>>, vector<1x128xf32>
    tpu.vector_store %arg19[%c1_118, %c768_119], %182 {strides = array<i32>} : memref<2x2048xf32, #tpu.memory_space<vmem>>, vector<1x128xf32>,
    %184 = vector.extract_strided_slice %155 {offsets = [7, 0], sizes = [1, 128], strides = [1, 1]} : vector<16x256xf32> to vector<1x128xf32>
    %c0_120 = arith.constant 0 : index
    %c896 = arith.constant 896 : index
    %185 = vector.load %arg19[%c0_120, %c896] : memref<2x2048xf32, #tpu.memory_space<vmem>>, vector<1x128xf32>
    tpu.vector_store %arg19[%c0_120, %c896], %184 {strides = array<i32>} : memref<2x2048xf32, #tpu.memory_space<vmem>>, vector<1x128xf32>,
    %186 = vector.extract_strided_slice %155 {offsets = [7, 128], sizes = [1, 128], strides = [1, 1]} : vector<16x256xf32> to vector<1x128xf32>
    %c1_121 = arith.constant 1 : index
    %c896_122 = arith.constant 896 : index
    %187 = vector.load %arg19[%c1_121, %c896_122] : memref<2x2048xf32, #tpu.memory_space<vmem>>, vector<1x128xf32>
    tpu.vector_store %arg19[%c1_121, %c896_122], %186 {strides = array<i32>} : memref<2x2048xf32, #tpu.memory_space<vmem>>, vector<1x128xf32>,
    %188 = vector.extract_strided_slice %155 {offsets = [8, 0], sizes = [1, 128], strides = [1, 1]} : vector<16x256xf32> to vector<1x128xf32>
    %c0_123 = arith.constant 0 : index
    %c1024_124 = arith.constant 1024 : index
    %189 = vector.load %arg19[%c0_123, %c1024_124] : memref<2x2048xf32, #tpu.memory_space<vmem>>, vector<1x128xf32>
    tpu.vector_store %arg19[%c0_123, %c1024_124], %188 {strides = array<i32>} : memref<2x2048xf32, #tpu.memory_space<vmem>>, vector<1x128xf32>,
    %190 = vector.extract_strided_slice %155 {offsets = [8, 128], sizes = [1, 128], strides = [1, 1]} : vector<16x256xf32> to vector<1x128xf32>
    %c1_125 = arith.constant 1 : index
    %c1024_126 = arith.constant 1024 : index
    %191 = vector.load %arg19[%c1_125, %c1024_126] : memref<2x2048xf32, #tpu.memory_space<vmem>>, vector<1x128xf32>
    tpu.vector_store %arg19[%c1_125, %c1024_126], %190 {strides = array<i32>} : memref<2x2048xf32, #tpu.memory_space<vmem>>, vector<1x128xf32>,
    %192 = vector.extract_strided_slice %155 {offsets = [9, 0], sizes = [1, 128], strides = [1, 1]} : vector<16x256xf32> to vector<1x128xf32>
    %c0_127 = arith.constant 0 : index
    %c1152 = arith.constant 1152 : index
    %193 = vector.load %arg19[%c0_127, %c1152] : memref<2x2048xf32, #tpu.memory_space<vmem>>, vector<1x128xf32>
    tpu.vector_store %arg19[%c0_127, %c1152], %192 {strides = array<i32>} : memref<2x2048xf32, #tpu.memory_space<vmem>>, vector<1x128xf32>,
    %194 = vector.extract_strided_slice %155 {offsets = [9, 128], sizes = [1, 128], strides = [1, 1]} : vector<16x256xf32> to vector<1x128xf32>
    %c1_128 = arith.constant 1 : index
    %c1152_129 = arith.constant 1152 : index
    %195 = vector.load %arg19[%c1_128, %c1152_129] : memref<2x2048xf32, #tpu.memory_space<vmem>>, vector<1x128xf32>
    tpu.vector_store %arg19[%c1_128, %c1152_129], %194 {strides = array<i32>} : memref<2x2048xf32, #tpu.memory_space<vmem>>, vector<1x128xf32>,
    %196 = vector.extract_strided_slice %155 {offsets = [10, 0], sizes = [1, 128], strides = [1, 1]} : vector<16x256xf32> to vector<1x128xf32>
    %c0_130 = arith.constant 0 : index
    %c1280_131 = arith.constant 1280 : index
    %197 = vector.load %arg19[%c0_130, %c1280_131] : memref<2x2048xf32, #tpu.memory_space<vmem>>, vector<1x128xf32>
    tpu.vector_store %arg19[%c0_130, %c1280_131], %196 {strides = array<i32>} : memref<2x2048xf32, #tpu.memory_space<vmem>>, vector<1x128xf32>,
    %198 = vector.extract_strided_slice %155 {offsets = [10, 128], sizes = [1, 128], strides = [1, 1]} : vector<16x256xf32> to vector<1x128xf32>
    %c1_132 = arith.constant 1 : index
    %c1280_133 = arith.constant 1280 : index
    %199 = vector.load %arg19[%c1_132, %c1280_133] : memref<2x2048xf32, #tpu.memory_space<vmem>>, vector<1x128xf32>
    tpu.vector_store %arg19[%c1_132, %c1280_133], %198 {strides = array<i32>} : memref<2x2048xf32, #tpu.memory_space<vmem>>, vector<1x128xf32>,
    %200 = vector.extract_strided_slice %155 {offsets = [11, 0], sizes = [1, 128], strides = [1, 1]} : vector<16x256xf32> to vector<1x128xf32>
    %c0_134 = arith.constant 0 : index
    %c1408 = arith.constant 1408 : index
    %201 = vector.load %arg19[%c0_134, %c1408] : memref<2x2048xf32, #tpu.memory_space<vmem>>, vector<1x128xf32>
    tpu.vector_store %arg19[%c0_134, %c1408], %200 {strides = array<i32>} : memref<2x2048xf32, #tpu.memory_space<vmem>>, vector<1x128xf32>,
    %202 = vector.extract_strided_slice %155 {offsets = [11, 128], sizes = [1, 128], strides = [1, 1]} : vector<16x256xf32> to vector<1x128xf32>
    %c1_135 = arith.constant 1 : index
    %c1408_136 = arith.constant 1408 : index
    %203 = vector.load %arg19[%c1_135, %c1408_136] : memref<2x2048xf32, #tpu.memory_space<vmem>>, vector<1x128xf32>
    tpu.vector_store %arg19[%c1_135, %c1408_136], %202 {strides = array<i32>} : memref<2x2048xf32, #tpu.memory_space<vmem>>, vector<1x128xf32>,
    %204 = vector.extract_strided_slice %155 {offsets = [12, 0], sizes = [1, 128], strides = [1, 1]} : vector<16x256xf32> to vector<1x128xf32>
    %c0_137 = arith.constant 0 : index
    %c1536_138 = arith.constant 1536 : index
    %205 = vector.load %arg19[%c0_137, %c1536_138] : memref<2x2048xf32, #tpu.memory_space<vmem>>, vector<1x128xf32>
    tpu.vector_store %arg19[%c0_137, %c1536_138], %204 {strides = array<i32>} : memref<2x2048xf32, #tpu.memory_space<vmem>>, vector<1x128xf32>,
    %206 = vector.extract_strided_slice %155 {offsets = [12, 128], sizes = [1, 128], strides = [1, 1]} : vector<16x256xf32> to vector<1x128xf32>
    %c1_139 = arith.constant 1 : index
    %c1536_140 = arith.constant 1536 : index
    %207 = vector.load %arg19[%c1_139, %c1536_140] : memref<2x2048xf32, #tpu.memory_space<vmem>>, vector<1x128xf32>
    tpu.vector_store %arg19[%c1_139, %c1536_140], %206 {strides = array<i32>} : memref<2x2048xf32, #tpu.memory_space<vmem>>, vector<1x128xf32>,
    %208 = vector.extract_strided_slice %155 {offsets = [13, 0], sizes = [1, 128], strides = [1, 1]} : vector<16x256xf32> to vector<1x128xf32>
    %c0_141 = arith.constant 0 : index
    %c1664 = arith.constant 1664 : index
    %209 = vector.load %arg19[%c0_141, %c1664] : memref<2x2048xf32, #tpu.memory_space<vmem>>, vector<1x128xf32>
    tpu.vector_store %arg19[%c0_141, %c1664], %208 {strides = array<i32>} : memref<2x2048xf32, #tpu.memory_space<vmem>>, vector<1x128xf32>,
    %210 = vector.extract_strided_slice %155 {offsets = [13, 128], sizes = [1, 128], strides = [1, 1]} : vector<16x256xf32> to vector<1x128xf32>
    %c1_142 = arith.constant 1 : index
    %c1664_143 = arith.constant 1664 : index
    %211 = vector.load %arg19[%c1_142, %c1664_143] : memref<2x2048xf32, #tpu.memory_space<vmem>>, vector<1x128xf32>
    tpu.vector_store %arg19[%c1_142, %c1664_143], %210 {strides = array<i32>} : memref<2x2048xf32, #tpu.memory_space<vmem>>, vector<1x128xf32>,
    %212 = vector.extract_strided_slice %155 {offsets = [14, 0], sizes = [1, 128], strides = [1, 1]} : vector<16x256xf32> to vector<1x128xf32>
    %c0_144 = arith.constant 0 : index
    %c1792_145 = arith.constant 1792 : index
    %213 = vector.load %arg19[%c0_144, %c1792_145] : memref<2x2048xf32, #tpu.memory_space<vmem>>, vector<1x128xf32>
    tpu.vector_store %arg19[%c0_144, %c1792_145], %212 {strides = array<i32>} : memref<2x2048xf32, #tpu.memory_space<vmem>>, vector<1x128xf32>,
    %214 = vector.extract_strided_slice %155 {offsets = [14, 128], sizes = [1, 128], strides = [1, 1]} : vector<16x256xf32> to vector<1x128xf32>
    %c1_146 = arith.constant 1 : index
    %c1792_147 = arith.constant 1792 : index
    %215 = vector.load %arg19[%c1_146, %c1792_147] : memref<2x2048xf32, #tpu.memory_space<vmem>>, vector<1x128xf32>
    tpu.vector_store %arg19[%c1_146, %c1792_147], %214 {strides = array<i32>} : memref<2x2048xf32, #tpu.memory_space<vmem>>, vector<1x128xf32>,
    %216 = vector.extract_strided_slice %155 {offsets = [15, 0], sizes = [1, 128], strides = [1, 1]} : vector<16x256xf32> to vector<1x128xf32>
    %c0_148 = arith.constant 0 : index
    %c1920 = arith.constant 1920 : index
    %217 = vector.load %arg19[%c0_148, %c1920] : memref<2x2048xf32, #tpu.memory_space<vmem>>, vector<1x128xf32>
    tpu.vector_store %arg19[%c0_148, %c1920], %216 {strides = array<i32>} : memref<2x2048xf32, #tpu.memory_space<vmem>>, vector<1x128xf32>,
    %218 = vector.extract_strided_slice %155 {offsets = [15, 128], sizes = [1, 128], strides = [1, 1]} : vector<16x256xf32> to vector<1x128xf32>
    %c1_149 = arith.constant 1 : index
    %c1920_150 = arith.constant 1920 : index
    %219 = vector.load %arg19[%c1_149, %c1920_150] : memref<2x2048xf32, #tpu.memory_space<vmem>>, vector<1x128xf32>
    tpu.vector_store %arg19[%c1_149, %c1920_150], %218 {strides = array<i32>} : memref<2x2048xf32, #tpu.memory_space<vmem>>, vector<1x128xf32>,
    %c0_151 = arith.constant 0 : index
    %c0_152 = arith.constant 0 : index
    %220 = vector.load %arg19[%c0_151, %c0_152] : memref<2x2048xf32, #tpu.memory_space<vmem>>, vector<2x2048xf32>
    %221 = arith.truncf %220 : vector<2x2048xf32> to vector<2x2048xbf16>
    %c0_153 = arith.constant 0 : index
    %c0_154 = arith.constant 0 : index
    %222 = vector.load %arg10[%c0_153, %c0_154] : memref<2048x64xbf16, #tpu.memory_space<vmem>>, vector<2048x64xbf16>
    %cst_155 = arith.constant dense<0.000000e+00> : vector<2x64xf32>
    %223 = tpu.matmul %221, %222, %cst_155 {dimension_numbers = #tpu.dot_dimension_numbers<[1], [0], [0], [1], [0, 0, 1, 1], [], []>} : vector<2x2048xbf16>, vector<2048x64xbf16>, vector<2x64xf32> -> vector<2x64xf32>
    %c0_156 = arith.constant 0 : index
    %c0_157 = arith.constant 0 : index
    %224 = vector.load %arg11[%c0_156, %c0_157] : memref<1x64xf32, #tpu.memory_space<vmem>>, vector<1x64xf32>
    %225 = vector.broadcast %224 : vector<1x64xf32> to vector<2x64xf32>
    %226 = arith.addf %223, %225 : vector<2x64xf32>
    %c0_158 = arith.constant 0 : index
    %c0_159 = arith.constant 0 : index
    %227 = vector.load %arg12[%c0_158, %c0_159] : memref<1x64xf32, #tpu.memory_space<vmem>>, vector<1x64xf32>
    %228 = vector.broadcast %227 : vector<1x64xf32> to vector<2x64xf32>
    %229 = arith.mulf %68, %228 : vector<2x64xf32>
    %cst_160 = arith.constant dense<0.000000e+00> : vector<2xf32>
    %230 = vector.multi_reduction <add>, %229, %cst_160 [1] : vector<2x64xf32> to vector<2xf32>
    %231 = vector.shape_cast %230 : vector<2xf32> to vector<2x1xf32>
    %c0_161 = arith.constant 0 : index
    %c0_162 = arith.constant 0 : index
    %232 = vector.load %arg13[%c0_161, %c0_162] : memref<1x64xf32, #tpu.memory_space<vmem>>, vector<1x64xf32>
    %233 = vector.broadcast %232 : vector<1x64xf32> to vector<2x64xf32>
    %234 = arith.mulf %147, %233 : vector<2x64xf32>
    %cst_163 = arith.constant dense<0.000000e+00> : vector<2xf32>
    %235 = vector.multi_reduction <add>, %234, %cst_163 [1] : vector<2x64xf32> to vector<2xf32>
    %236 = vector.shape_cast %235 : vector<2xf32> to vector<2x1xf32>
    %237 = arith.addf %231, %236 : vector<2x1xf32>
    %c0_164 = arith.constant 0 : index
    %c0_165 = arith.constant 0 : index
    %238 = vector.load %arg14[%c0_164, %c0_165] : memref<1x64xf32, #tpu.memory_space<vmem>>, vector<1x64xf32>
    %239 = vector.broadcast %238 : vector<1x64xf32> to vector<2x64xf32>
    %240 = arith.mulf %226, %239 : vector<2x64xf32>
    %cst_166 = arith.constant dense<0.000000e+00> : vector<2xf32>
    %241 = vector.multi_reduction <add>, %240, %cst_166 [1] : vector<2x64xf32> to vector<2xf32>
    %242 = vector.shape_cast %241 : vector<2xf32> to vector<2x1xf32>
    %243 = arith.addf %237, %242 : vector<2x1xf32>
    %c0_167 = arith.constant 0 : index
    %244 = memref.load %arg15[%c0_167] : memref<1xf32, #tpu.memory_space<smem>>
    %245 = vector.broadcast %244 : f32 to vector<2x1xf32>
    %246 = arith.addf %243, %245 : vector<2x1xf32>
    %c0_168 = arith.constant 0 : index
    %c0_169 = arith.constant 0 : index
    %247 = vector.load %arg16[%c0_168, %c0_169] : memref<2x1xf32, #tpu.memory_space<vmem>>, vector<2x1xf32>
    tpu.vector_store %arg16[%c0_168, %c0_169], %246 {strides = array<i32>} : memref<2x1xf32, #tpu.memory_space<vmem>>, vector<2x1xf32>,
    return
  }
}

</mosaic_0001>

<bundles_post_ra>
// kernel: multimodal_forward.1
= control target key start
LH: loop header
LB: loop body
LE: loop exit
PB: predicated region body
PF: predicated region fallthrough
CT: control target
= control target key end

     0   :  { %s8358_s0 = inlined_call_operand.vmem [shape: s32[16], index: 0, kind: input, shape index: {}]   ;;  %s8359_s1 = inlined_call_operand.vmem [shape: f32[1000,64], index: 1, kind: input, shape index: {}]   ;;  %s8360_s2 = inlined_call_operand.vmem [shape: bf16[27,512], index: 2, kind: input, shape index: {}]   ;;  %s8361_s3 = inlined_call_operand.vmem [shape: bf16[16,27], index: 3, kind: input, shape index: {}]   ;;  %s8362_s4 = inlined_call_operand.vmem [shape: f32[16,1], index: 4, kind: input, shape index: {}]   ;;  %s8363_s5 = inlined_call_operand.vmem [shape: bf16[4096,64], index: 5, kind: input, shape index: {}]   ;;  %s8364_s6 = inlined_call_operand.vmem [shape: f32[1,64], index: 6, kind: input, shape index: {}]   ;;  %s8365_s7 = inlined_call_operand.vmem [shape: bf16[9,256], index: 7, kind: input, shape index: {}]   ;;  %s8366_s8 = inlined_call_operand.vmem [shape: bf16[16,9], index: 8, kind: input, shape index: {}]   ;;  %s8367_s9 = inlined_call_operand.vmem [shape: f32[16,1], index: 9, kind: input, shape index: {}]   ;;  %s8368_s10 = inlined_call_operand.vmem [shape: bf16[2048,64], index: 10, kind: input, shape index: {}]   ;;  %s8369_s11 = inlined_call_operand.vmem [shape: f32[1,64], index: 11, kind: input, shape index: {}]   ;;  %s8370_s12 = inlined_call_operand.vmem [shape: f32[1,64], index: 12, kind: input, shape index: {}]   ;;  %s8371_s13 = inlined_call_operand.vmem [shape: f32[1,64], index: 13, kind: input, shape index: {}]   ;;  %s8372_s14 = inlined_call_operand.vmem [shape: f32[1,64], index: 14, kind: input, shape index: {}]   ;;  %s8373_s15 = inlined_call_operand.<no memory space> [shape: f32[1], index: 15, kind: input, shape index: {}]   ;;  %s8374_s16 = inlined_call_operand.vmem [shape: f32[2,1], index: 16, kind: output, shape index: {}]  }
   0x1   :  { %8375 = sst [smem:[#allocation9_spill]] %s8358_s0 }
   0x2   :  { %22 = vsyncpa [#allocation7], 0  ;;  %s8376_s23 = sld [smem:[#allocation9_spill]] }
   0x8   :  { %s29_s24 = sshll.u32 %s8376_s23, 4  ;;  %s30_s24 = int_to_ptr.vmem [resolvable:$true] %s29_s24 }
   0x9   :  { %s6692_s25 = scalar_lea.vmem %s30_s24, 16  ;;  %p6697_p1 = scmp.lt.s32.totalorder %s30_s24, %s30_s24 }
   0xa   :  { %p6693_p0 = scmp.ne.s32.totalorder %s30_s24, %s6692_s25  ;;  %p6698_p2 = scmp.lt.s32.totalorder %s6692_s25, %s6692_s25 }
   0xc   :  { %p6699_p3 = por %p6698_p2, %p6697_p1 }
   0xe   :  { %p6700_p4 = pnand %p6699_p3, %p6693_p0 }
  0x10   :  { %6703 = shalt.err (!%p6700_p4)
}
  0x11   :  { %s6706_s26 = smov [#allocation6]  }
  0x12   :  { %32 = dma.vmem_to_smem %s30_s24, 16, %s6706_s26, [#allocation7]  }
  0x13   :  { %6704 = dma.done.wait [#allocation7], 16  }
  0x14   :  { %6705 = vsyncadd [#allocation7], 4294967280 }
  0x15   :  { %66 = sfence }
  0x16   :  { %v6279_v0 = vld [vmem:[%s8360_s2 + $0x4] ss:$16 sps:$4 sm:$0xff]   ;;  %vm203_vm0 = vcmask 1044480   ;;  %vm204_vm1 = vcmask 1045504   ;;  %v6281_v1 = vld [vmem:[%s8360_s2 + $0xc] ss:$16 sps:$4 sm:$0xff]   ;;  %v319_v56 = vlaneseq }
  0x17   :  { %219 = vmatprep.subr.bf16.mxu0 %v6279_v0  ;;  %v6283_v2 = vld [vmem:[%s8360_s2] ss:$16 sps:$4 sm:$0xff]   ;;  %v6284_v3 = vld [vmem:[%s8360_s2 + $0x8] ss:$16 sps:$4 sm:$0xff]   ;;  %v6707_v4 = vmov 65535   ;;  %v6708_v6 = vmov 0   ;;  %262 = vmatprep.subr.bf16.mxu1 %v6281_v1 }
  0x18   :  { %v205_v5 = vsel %vm203_vm0, 4294967295, %v6707_v4  ;;  %251 = vmatprep.mubr.bf16.mxu0 %v6708_v6  ;;  %v6285_v7 = vld [vmem:[%s8360_s2 + $0x24] ss:$16 sps:$4 sm:$0x3f]   ;;  %294 = vmatprep.mubr.bf16.mxu1 %v6708_v6  ;;  %v147_v18 = vld [vmem:[%s8362_s4 + $0x8] sm:$0xff]  ;;  %vm199_vm2 = vcmask 220160  }
  0x19   :  { %v206_v8 = vsel %vm204_vm1, %v205_v5, 0  ;;  %220 = vmatpush1.bf16.msra.mxu0 %v6283_v2  ;;  %263 = vmatpush1.bf16.msra.mxu1 %v6284_v3  ;;  %v6287_v9 = vld [vmem:[%s8360_s2 + $0x2c] ss:$16 sps:$4 sm:$0x3f]   ;;  %v6291_v16 = vld [vmem:[%s8361_s3] sm:$0xff]   ;;  %v6300_v27 = vld [vmem:[%s8363_s5 + $0x50] sm:$0xff]  }
  0x1a   :  { %v211_v10 = vand.u32 %v6285_v7, %v206_v8  ;;  %v6289_v11 = vld [vmem:[%s8360_s2 + $0x20] ss:$16 sps:$4 sm:$0x3f]   ;;  %v6290_v12 = vld [vmem:[%s8360_s2 + $0x28] ss:$16 sps:$4 sm:$0x3f]   ;;  %6277 = vset.pattern.permute.xlu0 %v6708_v6  ;;  %6278 = vset.pattern.permute.xlu1 %v6708_v6  ;;  %v217_v13 = vand.u32 %v6287_v9, %v206_v8 }
  0x1b   :  { %v208_v14 = vand.u32 %v6289_v11, %v206_v8  ;;  %v214_v15 = vand.u32 %v6290_v12, %v206_v8  ;;  %v146_v17 = vld [vmem:[%s8362_s4] sm:$0xff]  ;;  %v6296_v23 = vld [vmem:[%s8363_s5 + $0x48] sm:$0xff]   ;;  %v6301_v28 = vld [vmem:[%s8363_s5 + $0x10] sm:$0xff]   ;;  %v6709_v54 = vmov 1966171168   ;;  %v320_v58 = vshrl.u32 %v319_v56, 7 }
  0x1c   :  { %221 = vmatprep.subr.bf16.mxu0 %v211_v10  ;;  %264 = vmatprep.subr.bf16.mxu1 %v217_v13  ;;  %v6292_v19 = vld [vmem:[%s8363_s5 + $0x40] sm:$0xff]   ;;  %v6297_v24 = vld [vmem:[%s8363_s5 + $0x8] sm:$0xff]   ;;  %v6302_v29 = vld [vmem:[%s8363_s5 + $0xd0] sm:$0xff]   ;;  %v317_v55 = vunpack.c.l.s4 %v6709_v54  ;;  %v6710_v59 = vmov 1983009808   ;;  %vm6942_vm3 = vcmp.lt.s32.totalorder %v319_v56, 256 }
  0x1d   :  { %150 = vperm.xlu0 %6277, %v146_v17   ;;  %222 = vmatpush1.bf16.msra.mxu0 %v208_v14  ;;  %v6293_v20 = vld [vmem:[%s8363_s5] sm:$0xff]   ;;  %v6298_v25 = vld [vmem:[%s8363_s5 + $0xc8] sm:$0xff]   ;;  %v6303_v30 = vld [vmem:[%s8363_s5 + $0x90] sm:$0xff]   ;;  %v638_v60 = vunpack.c.l.s4 %v6710_v59  ;;  %vm3564_vm4 = vcmask 1043456   ;;  %vm3560_vm5 = vcmask 72704   ;;  %s5312_s30 = sld [smem:[#allocation6 + $0x8]] }
  0x1e   :  { %265 = vmatpush1.bf16.msra.mxu1 %v214_v15  ;;  %5744 = vmatprep.subr.bf16.mxu0 %v6292_v19  ;;  %v6294_v21 = vld [vmem:[%s8363_s5 + $0xc0] sm:$0xff]   ;;  %v6299_v26 = vld [vmem:[%s8363_s5 + $0x88] sm:$0xff]   ;;  %v6304_v31 = vld [vmem:[%s8363_s5 + $0x58] sm:$0xff]   ;;  %v318_v57 = vunpack.c.0.s8 %v317_v55  ;;  %s5313_s0 = sld [smem:[#allocation6 + $0x9]]  ;;  %s5306_s17 = sld [smem:[#allocation6 + $0x2]]  ;;  %vm100_vm6 = vcmask 516096  }
  0x1f   :  { %v6295_v22 = vld [vmem:[%s8363_s5 + $0x80] sm:$0xff]   ;;  %5766 = vmatprep.subr.bf16.mxu1 %v6294_v21  ;;  %v6305_v32 = vld [vmem:[%s8363_s5 + $0x18] sm:$0xff]   ;;  %v6312_v39 = vld [vmem:[%s8363_s5 + $0x68] sm:$0xff]   ;;  %v639_v8 = vunpack.c.0.s8 %v638_v60  ;;  %s5314_s2 = sld [smem:[#allocation6 + $0xa]]  ;;  %s5307_s18 = sld [smem:[#allocation6 + $0x3]]  ;;  %vm5251_vm7 = vcmask 517120  }
  0x20   :  { %5329 = vmatmul.mubr.msk.bf16.vlgmr.msra.gmra.mrb[0].mxu0 %vm199_vm2, %v6291_v16  ;;  %v6306_v33 = vld [vmem:[%s8363_s5 + $0xd8] sm:$0xff]   ;;  %v6308_v35 = vld [vmem:[%s8363_s5 + $0x60] sm:$0xff]   ;;  %v6313_v40 = vld [vmem:[%s8363_s5 + $0x28] sm:$0xff]   ;;  %v6940_v7 = vsub.s32 %v318_v57, %v320_v58  ;;  %s7831_s24 = sld [smem:[#allocation6 + $0x4]]  ;;  %s7864_s27 = sld [smem:[#allocation6 + $0xd]]  ;;  %vm5282_vm8 = vcmask 1024  }
  0x21   :  { %5330 = vmatmul.mubr.msk.bf16.vlgmr.msra.gmra.mrb[0].mxu1 %vm199_vm2, %v6291_v16  ;;  %155 = vperm.xlu0 %6277, %v147_v18   ;;  %v6307_v34 = vld [vmem:[%s8363_s5 + $0x98] sm:$0xff]   ;;  %v6309_v36 = vld [vmem:[%s8363_s5 + $0x20] sm:$0xff]   ;;  %v6314_v41 = vld [vmem:[%s8363_s5 + $0xe8] sm:$0xff]   ;;  %s7856_s25 = sld [smem:[#allocation6 + $0xc]] }
  0x22   :  { %5745 = vmatpush3.bf16.msra.mxu0 %v6293_v20  ;;  %5767 = vmatpush3.bf16.msra.mxu1 %v6295_v22  ;;  %v6310_v37 = vld [vmem:[%s8363_s5 + $0xe0] sm:$0xff]   ;;  %v6315_v42 = vld [vmem:[%s8363_s5 + $0xa8] sm:$0xff]   ;;  %v6316_v43 = vld [vmem:[%s8363_s5 + $0x70] sm:$0xff]  }
  0x23   :  { %5746 = vmatprep.subr.bf16.mxu0 %v6296_v23  ;;  %5768 = vmatprep.subr.bf16.mxu1 %v6298_v25  ;;  %v6311_v38 = vld [vmem:[%s8363_s5 + $0xa0] sm:$0xff]   ;;  %v6317_v44 = vld [vmem:[%s8363_s5 + $0x30] sm:$0xff]   ;;  %v6320_v47 = vld [vmem:[%s8363_s5 + $0x78] sm:$0xff]  }
  0x24   :  { %v6318_v45 = vld [vmem:[%s8363_s5 + $0xf0] sm:$0xff]   ;;  %v6321_v48 = vld [vmem:[%s8363_s5 + $0x38] sm:$0xff]   ;;  %v6324_v51 = vld [vmem:[%s8363_s5 + $0x140] sm:$0xff]   ;;  %s76_s28 = scalar_lea.vmem %s8359_s1, %s5306_s17 }
  0x25   :  { %v6319_v46 = vld [vmem:[%s8363_s5 + $0xb0] sm:$0xff]   ;;  %v6322_v49 = vld [vmem:[%s8363_s5 + $0xf8] sm:$0xff]   ;;  %v6327_v52 = vld [vmem:[%s8363_s5 + $0x1c0] sm:$0xff]   ;;  %s80_s22 = scalar_lea.vmem %s8359_s1, %s5307_s18 }
  0x26   :  { %5747 = vmatpush3.bf16.msra.mxu0 %v6297_v24  ;;  %5769 = vmatpush3.bf16.msra.mxu1 %v6299_v26  ;;  %v6323_v50 = vld [vmem:[%s8363_s5 + $0xb8] sm:$0xff]   ;;  %s84_s26 = scalar_lea.vmem %s8359_s1, %s7831_s24  ;;  %s7872_s24 = sld [smem:[#allocation6 + $0xf]] }
  0x27   :  { %5748 = vmatprep.subr.bf16.mxu0 %v6300_v27  ;;  %5770 = vmatprep.subr.bf16.mxu1 %v6302_v29  ;;  %v6946_v29 = vsub.s32 %v639_v8, %v320_v58  ;;  %s122_s20 = scalar_lea.vmem %s8359_s1, %s7864_s27 }
  0x2a   :  { %5749 = vmatpush3.bf16.msra.mxu0 %v6301_v28  ;;  %5771 = vmatpush3.bf16.msra.mxu1 %v6303_v30 }
  0x2b   :  { %5750 = vmatprep.subr.bf16.mxu0 %v6304_v31  ;;  %5772 = vmatprep.subr.bf16.mxu1 %v6306_v33 }
  0x2c   :  { %s130_s27 = scalar_lea.vmem %s8359_s1, %s7872_s24 }
  0x2e   :  { %5751 = vmatpush3.bf16.msra.mxu0 %v6305_v32  ;;  %5773 = vmatpush3.bf16.msra.mxu1 %v6307_v34 }
  0x2f   :  { %5752 = vmatprep.subr.bf16.mxu0 %v6308_v35  ;;  %5774 = vmatprep.subr.bf16.mxu1 %v6310_v37 }
  0x32   :  { %5753 = vmatpush3.bf16.msra.mxu0 %v6309_v36  ;;  %5775 = vmatpush3.bf16.msra.mxu1 %v6311_v38 }
  0x33   :  { %5754 = vmatprep.subr.bf16.mxu0 %v6312_v39  ;;  %5776 = vmatprep.subr.bf16.mxu1 %v6314_v41 }
  0x36   :  { %5755 = vmatpush3.bf16.msra.mxu0 %v6313_v40  ;;  %5777 = vmatpush3.bf16.msra.mxu1 %v6315_v42 }
  0x37   :  { %5756 = vmatprep.subr.bf16.mxu0 %v6316_v43  ;;  %5778 = vmatprep.subr.bf16.mxu1 %v6318_v45 }
  0x3a   :  { %5757 = vmatpush3.bf16.msra.mxu0 %v6317_v44  ;;  %5779 = vmatpush3.bf16.msra.mxu1 %v6319_v46 }
  0x3b   :  { %5758 = vmatprep.subr.bf16.mxu0 %v6320_v47  ;;  %5780 = vmatprep.subr.bf16.mxu1 %v6322_v49 }
  0x3e   :  { %5759 = vmatpush3.bf16.msra.mxu0 %v6321_v48  ;;  %5781 = vmatpush3.bf16.msra.mxu1 %v6323_v50 }
  0x3f   :  { %5788 = vmatprep.subr.bf16.mxu0 %v6324_v51  ;;  %5810 = vmatprep.subr.bf16.mxu1 %v6327_v52 }
  0x9c   :  { %v151_v53 = vpop.permute.xlu0 %150 }
  0xa0   :  { %v156_v61 = vpop.permute.xlu0 %155 }
  0xf3   :  { %v253_v62 = vpop.f32.mrb[0].mxu0 }
  0xf4   :  { %v296_v63 = vpop.f32.mrb[0].mxu1  ;;  %v254_v0 = vadd.f32 %v253_v62, %v151_v53  ;;  %v255_v2 = vpop.f32.mrb[1].mxu0 }
  0xf5   :  { %v297_v1 = vadd.f32 %v296_v63, %v151_v53  ;;  %v298_v3 = vpop.f32.mrb[1].mxu1  ;;  %v256_v5 = vadd.f32 %v255_v2, %v151_v53  ;;  %v257_v10 = vpop.f32.mrb[2].mxu0 }
  0xf6   :  { %v299_v9 = vadd.f32 %v298_v3, %v151_v53  ;;  %v300_v11 = vpop.f32.mrb[2].mxu1  ;;  %v305_v12 = vmax.f32 %v254_v0, 0.0  ;;  %v258_v14 = vadd.f32 %v257_v10, %v156_v61  ;;  %v259_v16 = vpop.f32.mrb[3].mxu0 }
  0xf7   :  { %v307_v13 = vmax.f32 %v297_v1, 0.0  ;;  %v301_v15 = vadd.f32 %v300_v11, %v156_v61  ;;  %v302_v17 = vpop.f32.mrb[3].mxu1  ;;  %v306_v18 = vmax.f32 %v256_v5, 0.0  ;;  %v260_v20 = vadd.f32 %v259_v16, %v156_v61 }
  0xf8   :  { %v308_v19 = vmax.f32 %v299_v9, 0.0  ;;  %v303_v21 = vadd.f32 %v302_v17, %v156_v61  ;;  %v309_v22 = vmax.f32 %v258_v14, 0.0 }
  0xf9   :  { %v311_v23 = vmax.f32 %v301_v15, 0.0  ;;  %v315_v24 = vcombine.low %v305_v12, %v306_v18  ;;  %v394_v25 = vcombine.high %v305_v12, %v306_v18  ;;  %v310_v30 = vmax.f32 %v260_v20, 0.0 }
  0xfa   :  { %v338_v26 = vcombine.low %v307_v13, %v308_v19  ;;  %v412_v27 = vcombine.high %v307_v13, %v308_v19  ;;  %v312_v31 = vmax.f32 %v303_v21, 0.0 }
  0xfb   :  { %v322_v32 = vrot.slane %v315_v24, %v6940_v7  ;;  %v401_v33 = vrot.slane %v394_v25, %v6940_v7  ;;  %v470_v36 = vcombine.low %v309_v22, %v310_v30  ;;  %v546_v37 = vcombine.high %v309_v22, %v310_v30 }
  0xfc   :  { %v345_v34 = vrot.slane %v338_v26, %v6940_v7  ;;  %v419_v35 = vrot.slane %v412_v27, %v6940_v7  ;;  %v490_v38 = vcombine.low %v311_v23, %v312_v31  ;;  %v564_v39 = vcombine.high %v311_v23, %v312_v31 }
  0xfd   :  { %v329_v40 = vrot.slane %v322_v32, %v6940_v7  ;;  %v356_v41 = vcombine.high %v322_v32, %v322_v32  ;;  %v408_v42 = vrot.slane %v401_v33, %v6940_v7  ;;  %v430_v43 = vcombine.high %v401_v33, %v401_v33  ;;  %v6325_v33 = vld [vmem:[%s8363_s5 + $0x100] sm:$0xff]  }
  0xfe   :  { %v352_v44 = vrot.slane %v345_v34, %v6940_v7  ;;  %v367_v45 = vcombine.high %v345_v34, %v345_v34  ;;  %v426_v46 = vrot.slane %v419_v35, %v6940_v7  ;;  %v441_v47 = vcombine.high %v419_v35, %v419_v35 }
  0xff   :  { %335 = vst.msk [vmem:[#allocation3] ss:$2 sm:$0x3] %vm6942_vm3, %v329_v40  ;;  %v363_v48 = vrot.slane %v356_v41, %v6940_v7  ;;  %v378_v49 = vcombine.high %v329_v40, %v329_v40  ;;  %411 = vst.msk [vmem:[#allocation3 + $0x10] ss:$2 sm:$0x3] %vm6942_vm3, %v408_v42  ;;  %v437_v50 = vrot.slane %v430_v43, %v6940_v7 }
 0x100   :  { %v452_v51 = vcombine.high %v408_v42, %v408_v42  ;;  %355 = vst.msk [vmem:[#allocation3 + $0x1] ss:$2 sm:$0x3] %vm6942_vm3, %v352_v44  ;;  %v374_v52 = vrot.slane %v367_v45, %v6940_v7  ;;  %v382_v53 = vcombine.high %v352_v44, %v352_v44  ;;  %429 = vst.msk [vmem:[#allocation3 + $0x11] ss:$2 sm:$0x3] %vm6942_vm3, %v426_v46 }
 0x101   :  { %v448_v54 = vrot.slane %v441_v47, %v6940_v7  ;;  %v456_v55 = vcombine.high %v426_v46, %v426_v46  ;;  %366 = vst.msk [vmem:[#allocation3 + $0x4] ss:$2 sm:$0x3] %vm6942_vm3, %v363_v48  ;;  %381 = vst.msk [vmem:[#allocation3 + $0x8] ss:$2 sm:$0x3] %vm6942_vm3, %v378_v49  ;;  %v386_v56 = vcombine.high %v363_v48, %v363_v48 }
 0x102   :  { %440 = vst.msk [vmem:[#allocation3 + $0x14] ss:$2 sm:$0x3] %vm6942_vm3, %v437_v50  ;;  %455 = vst.msk [vmem:[#allocation3 + $0x18] ss:$2 sm:$0x3] %vm6942_vm3, %v452_v51  ;;  %v460_v57 = vcombine.high %v437_v50, %v437_v50  ;;  %v477_v58 = vrot.slane %v470_v36, %v6940_v7  ;;  %v553_v59 = vrot.slane %v546_v37, %v6940_v7 }
 0x103   :  { %377 = vst.msk [vmem:[#allocation3 + $0x5] ss:$2 sm:$0x3] %vm6942_vm3, %v374_v52  ;;  %385 = vst.msk [vmem:[#allocation3 + $0x9] ss:$2 sm:$0x3] %vm6942_vm3, %v382_v53  ;;  %v390_v60 = vcombine.high %v374_v52, %v374_v52  ;;  %v464_v61 = vcombine.high %v448_v54, %v448_v54  ;;  %v497_v62 = vrot.slane %v490_v38, %v6940_v7 }
 0x104   :  { %451 = vst.msk [vmem:[#allocation3 + $0x15] ss:$2 sm:$0x3] %vm6942_vm3, %v448_v54  ;;  %459 = vst.msk [vmem:[#allocation3 + $0x19] ss:$2 sm:$0x3] %vm6942_vm3, %v456_v55  ;;  %v571_v63 = vrot.slane %v564_v39, %v6940_v7  ;;  %v484_v0 = vrot.slane %v477_v58, %v6940_v7  ;;  %v508_v1 = vcombine.high %v477_v58, %v477_v58 }
 0x105   :  { %389 = vst.msk [vmem:[#allocation3 + $0xc] ss:$2 sm:$0x3] %vm6942_vm3, %v386_v56  ;;  %463 = vst.msk [vmem:[#allocation3 + $0x1c] ss:$2 sm:$0x3] %vm6942_vm3, %v460_v57  ;;  %v560_v2 = vrot.slane %v553_v59, %v6940_v7  ;;  %v582_v3 = vcombine.high %v553_v59, %v553_v59  ;;  %v504_v5 = vrot.slane %v497_v62, %v6940_v7 }
 0x106   :  { %393 = vst.msk [vmem:[#allocation3 + $0xd] ss:$2 sm:$0x3] %vm6942_vm3, %v390_v60  ;;  %467 = vst.msk [vmem:[#allocation3 + $0x1d] ss:$2 sm:$0x3] %vm6942_vm3, %v464_v61  ;;  %v519_v8 = vcombine.high %v497_v62, %v497_v62  ;;  %v578_v9 = vrot.slane %v571_v63, %v6940_v7  ;;  %v593_v10 = vcombine.high %v571_v63, %v571_v63 }
 0x107   :  { %487 = vst.msk [vmem:[#allocation3 + $0x20] ss:$2 sm:$0x3] %vm6942_vm3, %v484_v0  ;;  %v515_v11 = vrot.slane %v508_v1, %v6940_v7  ;;  %v530_v12 = vcombine.high %v484_v0, %v484_v0  ;;  %563 = vst.msk [vmem:[#allocation3 + $0x30] ss:$2 sm:$0x3] %vm6942_vm3, %v560_v2  ;;  %v589_v13 = vrot.slane %v582_v3, %v6940_v7 }
 0x108   :  { %v604_v14 = vcombine.high %v560_v2, %v560_v2  ;;  %507 = vst.msk [vmem:[#allocation3 + $0x21] ss:$2 sm:$0x3] %vm6942_vm3, %v504_v5  ;;  %v526_v15 = vrot.slane %v519_v8, %v6940_v7  ;;  %v534_v16 = vcombine.high %v504_v5, %v504_v5  ;;  %581 = vst.msk [vmem:[#allocation3 + $0x31] ss:$2 sm:$0x3] %vm6942_vm3, %v578_v9 }
 0x109   :  { %v600_v17 = vrot.slane %v593_v10, %v6940_v7  ;;  %v608_v18 = vcombine.high %v578_v9, %v578_v9  ;;  %518 = vst.msk [vmem:[#allocation3 + $0x24] ss:$2 sm:$0x3] %vm6942_vm3, %v515_v11  ;;  %533 = vst.msk [vmem:[#allocation3 + $0x28] ss:$2 sm:$0x3] %vm6942_vm3, %v530_v12  ;;  %v538_v19 = vcombine.high %v515_v11, %v515_v11 }
 0x10a   :  { %592 = vst.msk [vmem:[#allocation3 + $0x34] ss:$2 sm:$0x3] %vm6942_vm3, %v589_v13  ;;  %607 = vst.msk [vmem:[#allocation3 + $0x38] ss:$2 sm:$0x3] %vm6942_vm3, %v604_v14  ;;  %v612_v20 = vcombine.high %v589_v13, %v589_v13  ;;  %v542_v7 = vcombine.high %v526_v15, %v526_v15 }
 0x10b   :  { %529 = vst.msk [vmem:[#allocation3 + $0x25] ss:$2 sm:$0x3] %vm6942_vm3, %v526_v15  ;;  %537 = vst.msk [vmem:[#allocation3 + $0x29] ss:$2 sm:$0x3] %vm6942_vm3, %v534_v16  ;;  %v616_v21 = vcombine.high %v600_v17, %v600_v17 }
 0x10c   :  { %603 = vst.msk [vmem:[#allocation3 + $0x35] ss:$2 sm:$0x3] %vm6942_vm3, %v600_v17  ;;  %611 = vst.msk [vmem:[#allocation3 + $0x39] ss:$2 sm:$0x3] %vm6942_vm3, %v608_v18 }
 0x10d   :  { %541 = vst.msk [vmem:[#allocation3 + $0x2c] ss:$2 sm:$0x3] %vm6942_vm3, %v538_v19  ;;  %615 = vst.msk [vmem:[#allocation3 + $0x3c] ss:$2 sm:$0x3] %vm6942_vm3, %v612_v20 }
 0x10e   :  { %v620_v22 = vld [vmem:[#allocation3] sm:$0xff]  ;;  %545 = vst.msk [vmem:[#allocation3 + $0x2d] ss:$2 sm:$0x3] %vm6942_vm3, %v542_v7  ;;  %v621_v25 = vld [vmem:[#allocation3 + $0x8] sm:$0xff]  ;;  %v6338_v51 = vld [vmem:[%s8363_s5 + $0x158] sm:$0xff]  }
 0x10f   :  { %619 = vst.msk [vmem:[#allocation3 + $0x3d] ss:$2 sm:$0x3] %vm6942_vm3, %v616_v21  ;;  %v643_v23 = vrot.slane %v620_v22, %v6946_v29  ;;  %v636_v24 = vcombine.high %v620_v22, %v620_v22  ;;  %v7039_v30 = vrot.slane %v621_v25, %v6946_v29  ;;  %v653_v31 = vcombine.high %v621_v25, %v621_v25  ;;  %v6328_v36 = vld [vmem:[%s8363_s5 + $0x180] sm:$0xff]   ;;  %v6329_v37 = vld [vmem:[%s8363_s5 + $0x148] sm:$0xff]   ;;  %v6334_v47 = vld [vmem:[%s8363_s5 + $0x150] sm:$0xff]  }
 0x110   :  { %v6332_v43 = vld [vmem:[%s8363_s5 + $0x1c8] sm:$0xff]   ;;  %v6335_v48 = vld [vmem:[%s8363_s5 + $0x110] sm:$0xff]   ;;  %v6339_v52 = vld [vmem:[%s8363_s5 + $0x118] sm:$0xff]  }
 0x111   :  { %v651_v26 = vcombine.high %v643_v23, %v643_v23  ;;  %v650_v27 = vrot.slane %v636_v24, %v6946_v29  ;;  %v668_v28 = vcombine.high %v7039_v30, %v7039_v30  ;;  %v804_v35 = vpack.c.bf16 %v643_v23, %v643_v23  ;;  %v6331_v44 = vld [vmem:[%s8363_s5 + $0x108] sm:$0xff]   ;;  %v6336_v49 = vld [vmem:[%s8363_s5 + $0x1d0] sm:$0xff]   ;;  %v6340_v53 = vld [vmem:[%s8363_s5 + $0x1d8] sm:$0xff]  }
 0x112   :  { %v7053_v38 = vrot.slane %v653_v31, %v6946_v29  ;;  %v6333_v46 = vld [vmem:[%s8363_s5 + $0x188] sm:$0xff]   ;;  %v6337_v50 = vld [vmem:[%s8363_s5 + $0x190] sm:$0xff]   ;;  %v6341_v54 = vld [vmem:[%s8363_s5 + $0x198] sm:$0xff]   ;;  %v808_v7 = vpack.c.bf16 %v7039_v30, %v7039_v30 }
 0x113   :  { %v805_v32 = vpack.c.bf16 %v651_v26, %v651_v26  ;;  %v652_v34 = vcombine.high %v650_v27, %v650_v27  ;;  %v809_v40 = vpack.c.bf16 %v668_v28, %v668_v28  ;;  %v806_v41 = vpack.c.bf16 %v650_v27, %v650_v27  ;;  %v6342_v55 = vld [vmem:[%s8363_s5 + $0x160] sm:$0xff]   ;;  %v6346_v59 = vld [vmem:[%s8363_s5 + $0x168] sm:$0xff]   ;;  %v6350_v63 = vld [vmem:[%s8363_s5 + $0x170] sm:$0xff]  }
 0x114   :  { %v669_v42 = vcombine.high %v7053_v38, %v7053_v38  ;;  %v6343_v56 = vld [vmem:[%s8363_s5 + $0x120] sm:$0xff]   ;;  %v6347_v60 = vld [vmem:[%s8363_s5 + $0x128] sm:$0xff]   ;;  %v622_v0 = vld [vmem:[#allocation3 + $0x10] sm:$0xff]  ;;  %v810_v22 = vpack.c.bf16 %v7053_v38, %v7053_v38 }
 0x115   :  { %2923 = vmatprep.mubr.bf16.mxu0 %v805_v32  ;;  %v807_v39 = vpack.c.bf16 %v652_v34, %v652_v34  ;;  %v6344_v57 = vld [vmem:[%s8363_s5 + $0x1e0] sm:$0xff]   ;;  %v6348_v61 = vld [vmem:[%s8363_s5 + $0x1e8] sm:$0xff]   ;;  %v6351_v1 = vld [vmem:[%s8363_s5 + $0x130] sm:$0xff]   ;;  %v670_v8 = vcombine.high %v622_v0, %v622_v0  ;;  %v7136_v11 = vrot.slane %v622_v0, %v6946_v29 }
 0x116   :  { %2924 = vmatmul.mubr.bf16.vlgmr.msra.gmra.mrb[4].mxu0 %v804_v35  ;;  %v811_v45 = vpack.c.bf16 %v669_v42, %v669_v42  ;;  %v6345_v58 = vld [vmem:[%s8363_s5 + $0x1a0] sm:$0xff]   ;;  %v6349_v62 = vld [vmem:[%s8363_s5 + $0x1a8] sm:$0xff]   ;;  %v6352_v2 = vld [vmem:[%s8363_s5 + $0x1f0] sm:$0xff]  }
 0x117   :  { %5789 = vmatpush3.bf16.msra.mxu0 %v6325_v33  ;;  %2963 = vmatprep.mubr.bf16.mxu1 %v807_v39  ;;  %v6353_v3 = vld [vmem:[%s8363_s5 + $0x1b0] sm:$0xff]   ;;  %v6354_v5 = vld [vmem:[%s8363_s5 + $0x178] sm:$0xff]   ;;  %v6358_v13 = vld [vmem:[%s8363_s5 + $0x240] sm:$0xff]   ;;  %v7145_v14 = vrot.slane %v670_v8, %v6946_v29  ;;  %v685_v16 = vcombine.high %v7136_v11, %v7136_v11 }
 0x118   :  { %3003 = vmatprep.mubr.bf16.mxu0 %v809_v40  ;;  %2964 = vmatmul.mubr.bf16.vlgmr.msra.gmra.mrb[4].mxu1 %v806_v41  ;;  %v6355_v9 = vld [vmem:[%s8363_s5 + $0x138] sm:$0xff]   ;;  %v6359_v15 = vld [vmem:[%s8363_s5 + $0x200] sm:$0xff]   ;;  %v6363_v20 = vld [vmem:[%s8363_s5 + $0x248] sm:$0xff]  }
 0x119   :  { %5811 = vmatpush3.bf16.msra.mxu1 %v6328_v36  ;;  %5790 = vmatprep.subr.bf16.mxu0 %v6329_v37  ;;  %v6356_v10 = vld [vmem:[%s8363_s5 + $0x1f8] sm:$0xff]   ;;  %v6360_v17 = vld [vmem:[%s8363_s5 + $0x2c0] sm:$0xff]   ;;  %v686_v19 = vcombine.high %v7145_v14, %v7145_v14  ;;  %v813_v21 = vpack.c.bf16 %v685_v16, %v685_v16  ;;  %v6364_v23 = vld [vmem:[%s8363_s5 + $0x208] sm:$0xff]  }
 0x11a   :  { %3043 = vmatprep.mubr.bf16.mxu1 %v811_v45  ;;  %5812 = vmatprep.subr.bf16.mxu1 %v6332_v43  ;;  %v6357_v12 = vld [vmem:[%s8363_s5 + $0x1b8] sm:$0xff]   ;;  %v6361_v18 = vld [vmem:[%s8363_s5 + $0x280] sm:$0xff]   ;;  %v6365_v24 = vld [vmem:[%s8363_s5 + $0x2c8] sm:$0xff]  }
 0x11b   :  { %5791 = vmatpush3.bf16.msra.mxu0 %v6331_v44  ;;  %v815_v25 = vpack.c.bf16 %v686_v19, %v686_v19  ;;  %v6366_v26 = vld [vmem:[%s8363_s5 + $0x288] sm:$0xff]   ;;  %v6367_v27 = vld [vmem:[%s8363_s5 + $0x250] sm:$0xff]   ;;  %v6371_v33 = vld [vmem:[%s8363_s5 + $0x258] sm:$0xff]  }
 0x11c   :  { %5792 = vmatprep.subr.bf16.mxu0 %v6334_v47  ;;  %v6368_v30 = vld [vmem:[%s8363_s5 + $0x210] sm:$0xff]   ;;  %v6372_v34 = vld [vmem:[%s8363_s5 + $0x218] sm:$0xff]   ;;  %v6375_v36 = vld [vmem:[%s8363_s5 + $0x260] sm:$0xff]  }
 0x11d   :  { %5813 = vmatpush3.bf16.msra.mxu1 %v6333_v46  ;;  %v6369_v31 = vld [vmem:[%s8363_s5 + $0x2d0] sm:$0xff]   ;;  %v6373_v28 = vld [vmem:[%s8363_s5 + $0x2d8] sm:$0xff]   ;;  %v6376_v37 = vld [vmem:[%s8363_s5 + $0x220] sm:$0xff]  }
 0x11e   :  { %5814 = vmatprep.subr.bf16.mxu1 %v6336_v49  ;;  %v6370_v32 = vld [vmem:[%s8363_s5 + $0x290] sm:$0xff]   ;;  %v6374_v35 = vld [vmem:[%s8363_s5 + $0x298] sm:$0xff]   ;;  %v6377_v38 = vld [vmem:[%s8363_s5 + $0x2e0] sm:$0xff]  }
 0x11f   :  { %5793 = vmatpush3.bf16.msra.mxu0 %v6335_v48  ;;  %v6378_v39 = vld [vmem:[%s8363_s5 + $0x2a0] sm:$0xff]   ;;  %v6379_v40 = vld [vmem:[%s8363_s5 + $0x268] sm:$0xff]   ;;  %v6383_v44 = vld [vmem:[%s8363_s5 + $0x270] sm:$0xff]  }
 0x120   :  { %5794 = vmatprep.subr.bf16.mxu0 %v6338_v51  ;;  %v6380_v41 = vld [vmem:[%s8363_s5 + $0x228] sm:$0xff]   ;;  %v623_v45 = vld [vmem:[#allocation3 + $0x18] sm:$0xff]  ;;  %v6384_v46 = vld [vmem:[%s8363_s5 + $0x230] sm:$0xff]  }
 0x121   :  { %5815 = vmatpush3.bf16.msra.mxu1 %v6337_v50  ;;  %v6381_v42 = vld [vmem:[%s8363_s5 + $0x2e8] sm:$0xff]   ;;  %v6385_v47 = vld [vmem:[%s8363_s5 + $0x2f0] sm:$0xff]   ;;  %v6387_v49 = vld [vmem:[%s8363_s5 + $0x278] sm:$0xff]   ;;  %v687_v50 = vcombine.high %v623_v45, %v623_v45 }
 0x122   :  { %5816 = vmatprep.subr.bf16.mxu1 %v6340_v53  ;;  %v6382_v43 = vld [vmem:[%s8363_s5 + $0x2a8] sm:$0xff]   ;;  %v6386_v48 = vld [vmem:[%s8363_s5 + $0x2b0] sm:$0xff]   ;;  %v6388_v51 = vld [vmem:[%s8363_s5 + $0x238] sm:$0xff]   ;;  %v7246_v53 = vrot.slane %v623_v45, %v6946_v29 }
 0x123   :  { %5795 = vmatpush3.bf16.msra.mxu0 %v6339_v52  ;;  %v6389_v52 = vld [vmem:[%s8363_s5 + $0x2f8] sm:$0xff]   ;;  %v6399_v8 = vld [vmem:[%s8363_s5 + $0x388] sm:$0xff]   ;;  %v6410_v19 = vld [vmem:[%s8363_s5 + $0x3e0] sm:$0xff]  }
 0x124   :  { %5796 = vmatprep.subr.bf16.mxu0 %v6342_v55  ;;  %v6391_v55 = vld [vmem:[%s8363_s5 + $0x340] sm:$0xff]   ;;  %v6407_v16 = vld [vmem:[%s8363_s5 + $0x398] sm:$0xff]  }
 0x125   :  { %5817 = vmatpush3.bf16.msra.mxu1 %v6341_v54  ;;  %v6390_v54 = vld [vmem:[%s8363_s5 + $0x2b8] sm:$0xff]  }
 0x126   :  { %5818 = vmatprep.subr.bf16.mxu1 %v6344_v57  ;;  %v6392_v57 = vld [vmem:[%s8363_s5 + $0x300] sm:$0xff]  }
 0x127   :  { %5797 = vmatpush3.bf16.msra.mxu0 %v6343_v56  ;;  %v7255_v56 = vrot.slane %v687_v50, %v6946_v29  ;;  %v6432_v50 = vld [vmem:[%s8363_s5 + $0x488] sm:$0xff]  }
 0x128   :  { %5798 = vmatprep.subr.bf16.mxu0 %v6346_v59  ;;  %v6393_v59 = vld [vmem:[%s8363_s5 + $0x3c0] sm:$0xff]  }
 0x129   :  { %5819 = vmatpush3.bf16.msra.mxu1 %v6345_v58  ;;  %v702_v58 = vcombine.high %v7246_v53, %v7246_v53 }
 0x12a   :  { %5820 = vmatprep.subr.bf16.mxu1 %v6348_v61  ;;  %v703_v61 = vcombine.high %v7255_v56, %v7255_v56 }
 0x12b   :  { %5799 = vmatpush3.bf16.msra.mxu0 %v6347_v60  ;;  %v6394_v60 = vld [vmem:[%s8363_s5 + $0x380] sm:$0xff]   ;;  %v817_v0 = vpack.c.bf16 %v702_v58, %v702_v58 }
 0x12c   :  { %5800 = vmatprep.subr.bf16.mxu0 %v6350_v63  ;;  %v812_v63 = vpack.c.bf16 %v7136_v11, %v7136_v11  ;;  %v6402_v11 = vld [vmem:[%s8363_s5 + $0x3d0] sm:$0xff]   ;;  %v6441_v58 = vld [vmem:[%s8363_s5 + $0x460] sm:$0xff]  }
 0x12d   :  { %5821 = vmatpush3.bf16.msra.mxu1 %v6349_v62  ;;  %v6396_v62 = vld [vmem:[%s8363_s5 + $0x348] sm:$0xff]  }
 0x12e   :  { %5822 = vmatprep.subr.bf16.mxu1 %v6352_v2  ;;  %v6397_v2 = vld [vmem:[%s8363_s5 + $0x308] sm:$0xff]  }
 0x12f   :  { %5801 = vmatpush3.bf16.msra.mxu0 %v6351_v1  ;;  %v814_v1 = vpack.c.bf16 %v7145_v14, %v7145_v14  ;;  %v6405_v14 = vld [vmem:[%s8363_s5 + $0x318] sm:$0xff]  }
 0x130   :  { %5802 = vmatprep.subr.bf16.mxu0 %v6354_v5  ;;  %v819_v5 = vpack.c.bf16 %v703_v61, %v703_v61  ;;  %v6442_v61 = vld [vmem:[%s8363_s5 + $0x420] sm:$0xff]  }
 0x131   :  { %5823 = vmatpush3.bf16.msra.mxu1 %v6353_v3  ;;  %v6398_v3 = vld [vmem:[%s8363_s5 + $0x3c8] sm:$0xff]  }
 0x132   :  { %5824 = vmatprep.subr.bf16.mxu1 %v6356_v10  ;;  %v6401_v10 = vld [vmem:[%s8363_s5 + $0x310] sm:$0xff]  }
 0x133   :  { %5803 = vmatpush3.bf16.msra.mxu0 %v6355_v9  ;;  %v6400_v9 = vld [vmem:[%s8363_s5 + $0x350] sm:$0xff]  }
 0x134   :  { %5832 = vmatprep.subr.bf16.mxu0 %v6358_v13  ;;  %v6404_v13 = vld [vmem:[%s8363_s5 + $0x358] sm:$0xff]  }
 0x135   :  { %5825 = vmatpush3.bf16.msra.mxu1 %v6357_v12  ;;  %v6403_v12 = vld [vmem:[%s8363_s5 + $0x390] sm:$0xff]  }
 0x136   :  { %3004 = vmatmul.mubr.bf16.vlgmr.msra.gmra.mrb[8].mxu0 %v808_v7  ;;  %5854 = vmatprep.subr.bf16.mxu1 %v6360_v17  ;;  %v6408_v17 = vld [vmem:[%s8363_s5 + $0x360] sm:$0xff]   ;;  %v6412_v7 = vld [vmem:[%s8363_s5 + $0x368] sm:$0xff]  }
 0x137   :  { %5833 = vmatpush3.bf16.msra.mxu0 %v6359_v15  ;;  %3083 = vmatprep.mubr.bf16.mxu0 %v813_v21  ;;  %v6406_v15 = vld [vmem:[%s8363_s5 + $0x3d8] sm:$0xff]   ;;  %v6413_v21 = vld [vmem:[%s8363_s5 + $0x328] sm:$0xff]  }
 0x138   :  { %3044 = vmatmul.mubr.bf16.vlgmr.msra.gmra.mrb[8].mxu1 %v810_v22  ;;  %5834 = vmatprep.subr.bf16.mxu0 %v6363_v20  ;;  %v6411_v20 = vld [vmem:[%s8363_s5 + $0x3a0] sm:$0xff]   ;;  %v6414_v22 = vld [vmem:[%s8363_s5 + $0x3e8] sm:$0xff]  }
 0x139   :  { %5855 = vmatpush3.bf16.msra.mxu1 %v6361_v18  ;;  %3123 = vmatprep.mubr.bf16.mxu1 %v815_v25  ;;  %v6409_v18 = vld [vmem:[%s8363_s5 + $0x320] sm:$0xff]  }
 0x13a   :  { %5856 = vmatprep.subr.bf16.mxu1 %v6365_v24  ;;  %v6416_v24 = vld [vmem:[%s8363_s5 + $0x370] sm:$0xff]   ;;  %v624_v25 = vld [vmem:[#allocation3 + $0x20] sm:$0xff] }
 0x13b   :  { %5835 = vmatpush3.bf16.msra.mxu0 %v6364_v23  ;;  %v6415_v23 = vld [vmem:[%s8363_s5 + $0x3a8] sm:$0xff]  }
 0x13c   :  { %5836 = vmatprep.subr.bf16.mxu0 %v6367_v27  ;;  %v6418_v27 = vld [vmem:[%s8363_s5 + $0x3f0] sm:$0xff]  }
 0x13d   :  { %5857 = vmatpush3.bf16.msra.mxu1 %v6366_v26  ;;  %v6417_v26 = vld [vmem:[%s8363_s5 + $0x330] sm:$0xff]  }
 0x13e   :  { %5858 = vmatprep.subr.bf16.mxu1 %v6369_v31  ;;  %v704_v31 = vcombine.high %v624_v25, %v624_v25 }
 0x13f   :  { %5837 = vmatpush3.bf16.msra.mxu0 %v6368_v30  ;;  %v6420_v30 = vld [vmem:[%s8363_s5 + $0x378] sm:$0xff]  }
 0x140   :  { %5838 = vmatprep.subr.bf16.mxu0 %v6371_v33  ;;  %v6422_v33 = vld [vmem:[%s8363_s5 + $0x3f8] sm:$0xff]  }
 0x141   :  { %5859 = vmatpush3.bf16.msra.mxu1 %v6370_v32  ;;  %v6419_v32 = vld [vmem:[%s8363_s5 + $0x3b0] sm:$0xff]  }
 0x142   :  { %5860 = vmatprep.subr.bf16.mxu1 %v6373_v28  ;;  %v6421_v28 = vld [vmem:[%s8363_s5 + $0x338] sm:$0xff]  }
 0x143   :  { %5839 = vmatpush3.bf16.msra.mxu0 %v6372_v34  ;;  %v7353_v34 = vrot.slane %v624_v25, %v6946_v29  ;;  %v6460_v25 = vld [vmem:[%s8363_s5 + $0x580] sm:$0xff]  }
 0x144   :  { %5840 = vmatprep.subr.bf16.mxu0 %v6375_v36  ;;  %v6423_v36 = vld [vmem:[%s8363_s5 + $0x3b8] sm:$0xff]  }
 0x145   :  { %5861 = vmatpush3.bf16.msra.mxu1 %v6374_v35  ;;  %v7359_v35 = vrot.slane %v704_v31, %v6946_v29  ;;  %v6463_v31 = vld [vmem:[%s8363_s5 + $0x508] sm:$0xff]  }
 0x146   :  { %5862 = vmatprep.subr.bf16.mxu1 %v6377_v38  ;;  %v6425_v38 = vld [vmem:[%s8363_s5 + $0x400] sm:$0xff]  }
 0x147   :  { %5841 = vmatpush3.bf16.msra.mxu0 %v6376_v37  ;;  %v6424_v37 = vld [vmem:[%s8363_s5 + $0x440] sm:$0xff]  }
 0x148   :  { %5842 = vmatprep.subr.bf16.mxu0 %v6379_v40  ;;  %v6426_v40 = vld [vmem:[%s8363_s5 + $0x4c0] sm:$0xff]  }
 0x149   :  { %5863 = vmatpush3.bf16.msra.mxu1 %v6378_v39  ;;  %v719_v39 = vcombine.high %v7353_v34, %v7353_v34 }
 0x14a   :  { %5864 = vmatprep.subr.bf16.mxu1 %v6381_v42  ;;  %v720_v42 = vcombine.high %v7359_v35, %v7359_v35 }
 0x14b   :  { %5843 = vmatpush3.bf16.msra.mxu0 %v6380_v41  ;;  %v6427_v41 = vld [vmem:[%s8363_s5 + $0x480] sm:$0xff]   ;;  %v821_v45 = vpack.c.bf16 %v719_v39, %v719_v39 }
 0x14c   :  { %5844 = vmatprep.subr.bf16.mxu0 %v6383_v44  ;;  %v816_v44 = vpack.c.bf16 %v7246_v53, %v7246_v53  ;;  %v6435_v53 = vld [vmem:[%s8363_s5 + $0x4d0] sm:$0xff]   ;;  %v6474_v39 = vld [vmem:[%s8363_s5 + $0x560] sm:$0xff]  }
 0x14d   :  { %5865 = vmatpush3.bf16.msra.mxu1 %v6382_v43  ;;  %v6429_v43 = vld [vmem:[%s8363_s5 + $0x448] sm:$0xff]  }
 0x14e   :  { %5866 = vmatprep.subr.bf16.mxu1 %v6385_v47  ;;  %v6431_v47 = vld [vmem:[%s8363_s5 + $0x4c8] sm:$0xff]  }
 0x14f   :  { %5845 = vmatpush3.bf16.msra.mxu0 %v6384_v46  ;;  %v818_v46 = vpack.c.bf16 %v7255_v56, %v7255_v56  ;;  %v6439_v56 = vld [vmem:[%s8363_s5 + $0x4d8] sm:$0xff]  }
 0x150   :  { %5846 = vmatprep.subr.bf16.mxu0 %v6387_v49  ;;  %v6430_v49 = vld [vmem:[%s8363_s5 + $0x408] sm:$0xff]  }
 0x151   :  { %5867 = vmatpush3.bf16.msra.mxu1 %v6386_v48  ;;  %v823_v48 = vpack.c.bf16 %v720_v42, %v720_v42  ;;  %v6475_v42 = vld [vmem:[%s8363_s5 + $0x520] sm:$0xff]  }
 0x152   :  { %5868 = vmatprep.subr.bf16.mxu1 %v6389_v52  ;;  %v6434_v52 = vld [vmem:[%s8363_s5 + $0x410] sm:$0xff]  }
 0x153   :  { %5847 = vmatpush3.bf16.msra.mxu0 %v6388_v51  ;;  %v6433_v51 = vld [vmem:[%s8363_s5 + $0x450] sm:$0xff]  }
 0x154   :  { %5876 = vmatprep.subr.bf16.mxu0 %v6391_v55  ;;  %v6436_v55 = vld [vmem:[%s8363_s5 + $0x490] sm:$0xff]  }
 0x155   :  { %5869 = vmatpush3.bf16.msra.mxu1 %v6390_v54  ;;  %v6437_v54 = vld [vmem:[%s8363_s5 + $0x458] sm:$0xff]  }
 0x156   :  { %3084 = vmatmul.mubr.bf16.vlgmr.msra.gmra.mrb[12].mxu0 %v812_v63  ;;  %5898 = vmatprep.subr.bf16.mxu1 %v6393_v59  ;;  %v6440_v59 = vld [vmem:[%s8363_s5 + $0x498] sm:$0xff]   ;;  %v6444_v63 = vld [vmem:[%s8363_s5 + $0x4a0] sm:$0xff]  }
 0x157   :  { %5877 = vmatpush3.bf16.msra.mxu0 %v6392_v57  ;;  %3163 = vmatprep.mubr.bf16.mxu0 %v817_v0  ;;  %v6438_v57 = vld [vmem:[%s8363_s5 + $0x418] sm:$0xff]   ;;  %v6447_v0 = vld [vmem:[%s8363_s5 + $0x4e8] sm:$0xff]  }
 0x158   :  { %3124 = vmatmul.mubr.bf16.vlgmr.msra.gmra.mrb[12].mxu1 %v814_v1  ;;  %5878 = vmatprep.subr.bf16.mxu0 %v6396_v62  ;;  %v6445_v62 = vld [vmem:[%s8363_s5 + $0x468] sm:$0xff]  }
 0x159   :  { %5899 = vmatpush3.bf16.msra.mxu1 %v6394_v60  ;;  %3203 = vmatprep.mubr.bf16.mxu1 %v819_v5  ;;  %v6443_v60 = vld [vmem:[%s8363_s5 + $0x4e0] sm:$0xff]   ;;  %v6446_v1 = vld [vmem:[%s8363_s5 + $0x428] sm:$0xff]  }
 0x15a   :  { %5900 = vmatprep.subr.bf16.mxu1 %v6398_v3  ;;  %v625_v3 = vld [vmem:[#allocation3 + $0x28] sm:$0xff] }
 0x15b   :  { %5879 = vmatpush3.bf16.msra.mxu0 %v6397_v2  ;;  %v6449_v2 = vld [vmem:[%s8363_s5 + $0x470] sm:$0xff]   ;;  %v6448_v5 = vld [vmem:[%s8363_s5 + $0x4a8] sm:$0xff]  }
 0x15c   :  { %5880 = vmatprep.subr.bf16.mxu0 %v6400_v9  ;;  %v6450_v9 = vld [vmem:[%s8363_s5 + $0x430] sm:$0xff]  }
 0x15d   :  { %5901 = vmatpush3.bf16.msra.mxu1 %v6399_v8  ;;  %v6451_v8 = vld [vmem:[%s8363_s5 + $0x4f0] sm:$0xff]  }
 0x15e   :  { %5902 = vmatprep.subr.bf16.mxu1 %v6402_v11  ;;  %v6453_v11 = vld [vmem:[%s8363_s5 + $0x478] sm:$0xff]  }
 0x15f   :  { %5881 = vmatpush3.bf16.msra.mxu0 %v6401_v10  ;;  %v721_v10 = vcombine.high %v625_v3, %v625_v3 }
 0x160   :  { %5882 = vmatprep.subr.bf16.mxu0 %v6404_v13  ;;  %v7460_v13 = vrot.slane %v625_v3, %v6946_v29 }
 0x161   :  { %5903 = vmatpush3.bf16.msra.mxu1 %v6403_v12  ;;  %v6452_v12 = vld [vmem:[%s8363_s5 + $0x4b0] sm:$0xff]  }
 0x162   :  { %5904 = vmatprep.subr.bf16.mxu1 %v6406_v15  ;;  %v6454_v15 = vld [vmem:[%s8363_s5 + $0x438] sm:$0xff]  }
 0x163   :  { %5883 = vmatpush3.bf16.msra.mxu0 %v6405_v14  ;;  %v6455_v14 = vld [vmem:[%s8363_s5 + $0x4f8] sm:$0xff]  }
 0x164   :  { %5884 = vmatprep.subr.bf16.mxu0 %v6408_v17  ;;  %v6457_v17 = vld [vmem:[%s8363_s5 + $0x540] sm:$0xff]  }
 0x165   :  { %5905 = vmatpush3.bf16.msra.mxu1 %v6407_v16  ;;  %v7469_v16 = vrot.slane %v721_v10, %v6946_v29 }
 0x166   :  { %5906 = vmatprep.subr.bf16.mxu1 %v6410_v19  ;;  %v736_v19 = vcombine.high %v7460_v13, %v7460_v13 }
 0x167   :  { %5885 = vmatpush3.bf16.msra.mxu0 %v6409_v18  ;;  %v6456_v18 = vld [vmem:[%s8363_s5 + $0x4b8] sm:$0xff]  }
 0x168   :  { %5886 = vmatprep.subr.bf16.mxu0 %v6412_v7  ;;  %v6458_v7 = vld [vmem:[%s8363_s5 + $0x500] sm:$0xff]  }
 0x169   :  { %5907 = vmatpush3.bf16.msra.mxu1 %v6411_v20  ;;  %v6459_v20 = vld [vmem:[%s8363_s5 + $0x5c0] sm:$0xff]  }
 0x16a   :  { %5908 = vmatprep.subr.bf16.mxu1 %v6414_v22  ;;  %v820_v22 = vpack.c.bf16 %v7353_v34, %v7353_v34  ;;  %v6468_v34 = vld [vmem:[%s8363_s5 + $0x5d0] sm:$0xff]  }
 0x16b   :  { %5887 = vmatpush3.bf16.msra.mxu0 %v6413_v21  ;;  %v737_v21 = vcombine.high %v7469_v16, %v7469_v16 }
 0x16c   :  { %5888 = vmatprep.subr.bf16.mxu0 %v6416_v24  ;;  %v825_v24 = vpack.c.bf16 %v736_v19, %v736_v19  ;;  %v6504_v19 = vld [vmem:[%s8363_s5 + $0x618] sm:$0xff]  }
 0x16d   :  { %5909 = vmatpush3.bf16.msra.mxu1 %v6415_v23  ;;  %v6462_v23 = vld [vmem:[%s8363_s5 + $0x548] sm:$0xff]  }
 0x16e   :  { %5910 = vmatprep.subr.bf16.mxu1 %v6418_v27  ;;  %v6464_v27 = vld [vmem:[%s8363_s5 + $0x5c8] sm:$0xff]  }
 0x16f   :  { %5889 = vmatpush3.bf16.msra.mxu0 %v6417_v26  ;;  %v822_v26 = vpack.c.bf16 %v7359_v35, %v7359_v35  ;;  %v6470_v35 = vld [vmem:[%s8363_s5 + $0x558] sm:$0xff]  }
 0x170   :  { %5890 = vmatprep.subr.bf16.mxu0 %v6420_v30  ;;  %v827_v30 = vpack.c.bf16 %v737_v21, %v737_v21  ;;  %v6509_v21 = vld [vmem:[%s8363_s5 + $0x6e0] sm:$0xff]  }
 0x171   :  { %5911 = vmatpush3.bf16.msra.mxu1 %v6419_v32  ;;  %v6466_v32 = vld [vmem:[%s8363_s5 + $0x550] sm:$0xff]  }
 0x172   :  { %5912 = vmatprep.subr.bf16.mxu1 %v6422_v33  ;;  %v6465_v33 = vld [vmem:[%s8363_s5 + $0x588] sm:$0xff]  }
 0x173   :  { %5891 = vmatpush3.bf16.msra.mxu0 %v6421_v28  ;;  %v6467_v28 = vld [vmem:[%s8363_s5 + $0x510] sm:$0xff]  }
 0x174   :  { %5920 = vmatprep.subr.bf16.mxu0 %v6424_v37  ;;  %v6472_v37 = vld [vmem:[%s8363_s5 + $0x5d8] sm:$0xff]  }
 0x175   :  { %5913 = vmatpush3.bf16.msra.mxu1 %v6423_v36  ;;  %v6469_v36 = vld [vmem:[%s8363_s5 + $0x590] sm:$0xff]  }
 0x176   :  { %3164 = vmatmul.mubr.bf16.vlgmr.msra.gmra.mrb[16].mxu0 %v816_v44  ;;  %5942 = vmatprep.subr.bf16.mxu1 %v6426_v40  ;;  %v6473_v40 = vld [vmem:[%s8363_s5 + $0x598] sm:$0xff]   ;;  %v6477_v44 = vld [vmem:[%s8363_s5 + $0x5a0] sm:$0xff]  }
 0x177   :  { %5921 = vmatpush3.bf16.msra.mxu0 %v6425_v38  ;;  %3243 = vmatprep.mubr.bf16.mxu0 %v821_v45  ;;  %v6471_v38 = vld [vmem:[%s8363_s5 + $0x518] sm:$0xff]   ;;  %v6480_v45 = vld [vmem:[%s8363_s5 + $0x5e8] sm:$0xff]  }
 0x178   :  { %3204 = vmatmul.mubr.bf16.vlgmr.msra.gmra.mrb[16].mxu1 %v818_v46  ;;  %5922 = vmatprep.subr.bf16.mxu0 %v6429_v43  ;;  %v6478_v43 = vld [vmem:[%s8363_s5 + $0x568] sm:$0xff]  }
 0x179   :  { %5943 = vmatpush3.bf16.msra.mxu1 %v6427_v41  ;;  %3283 = vmatprep.mubr.bf16.mxu1 %v823_v48  ;;  %v6476_v41 = vld [vmem:[%s8363_s5 + $0x5e0] sm:$0xff]   ;;  %v6479_v46 = vld [vmem:[%s8363_s5 + $0x528] sm:$0xff]   ;;  %v626_v48 = vld [vmem:[#allocation3 + $0x30] sm:$0xff] }
 0x17a   :  { %5944 = vmatprep.subr.bf16.mxu1 %v6431_v47  ;;  %v6482_v47 = vld [vmem:[%s8363_s5 + $0x570] sm:$0xff]  }
 0x17b   :  { %5923 = vmatpush3.bf16.msra.mxu0 %v6430_v49  ;;  %v6481_v49 = vld [vmem:[%s8363_s5 + $0x5a8] sm:$0xff]  }
 0x17c   :  { %5924 = vmatprep.subr.bf16.mxu0 %v6433_v51  ;;  %v6483_v51 = vld [vmem:[%s8363_s5 + $0x530] sm:$0xff]  }
 0x17d   :  { %5945 = vmatpush3.bf16.msra.mxu1 %v6432_v50  ;;  %v6484_v50 = vld [vmem:[%s8363_s5 + $0x5f0] sm:$0xff]  }
 0x17e   :  { %5946 = vmatprep.subr.bf16.mxu1 %v6435_v53  ;;  %v6486_v53 = vld [vmem:[%s8363_s5 + $0x578] sm:$0xff]  }
 0x17f   :  { %5925 = vmatpush3.bf16.msra.mxu0 %v6434_v52  ;;  %v738_v52 = vcombine.high %v626_v48, %v626_v48 }
 0x180   :  { %5926 = vmatprep.subr.bf16.mxu0 %v6437_v54  ;;  %v6485_v54 = vld [vmem:[%s8363_s5 + $0x5b0] sm:$0xff]  }
 0x181   :  { %5947 = vmatpush3.bf16.msra.mxu1 %v6436_v55  ;;  %v7570_v55 = vrot.slane %v626_v48, %v6946_v29 }
 0x182   :  { %5948 = vmatprep.subr.bf16.mxu1 %v6439_v56  ;;  %v6488_v56 = vld [vmem:[%s8363_s5 + $0x5f8] sm:$0xff]  }
 0x183   :  { %5927 = vmatpush3.bf16.msra.mxu0 %v6438_v57  ;;  %v6487_v57 = vld [vmem:[%s8363_s5 + $0x538] sm:$0xff]   ;;  %v828_v48 = vpack.c.bf16 %v7570_v55, %v7570_v55 }
 0x184   :  { %5928 = vmatprep.subr.bf16.mxu0 %v6441_v58  ;;  %v7579_v58 = vrot.slane %v738_v52, %v6946_v29 }
 0x185   :  { %5949 = vmatpush3.bf16.msra.mxu1 %v6440_v59  ;;  %v6490_v59 = vld [vmem:[%s8363_s5 + $0x640] sm:$0xff]  }
 0x186   :  { %5950 = vmatprep.subr.bf16.mxu1 %v6443_v60  ;;  %v6489_v60 = vld [vmem:[%s8363_s5 + $0x5b8] sm:$0xff]   ;;  %v830_v52 = vpack.c.bf16 %v7579_v58, %v7579_v58 }
 0x187   :  { %5929 = vmatpush3.bf16.msra.mxu0 %v6442_v61  ;;  %v753_v61 = vcombine.high %v7570_v55, %v7570_v55  ;;  %v6529_v55 = vld [vmem:[%s8363_s5 + $0x708] sm:$0xff]  }
 0x188   :  { %5930 = vmatprep.subr.bf16.mxu0 %v6445_v62  ;;  %v6492_v62 = vld [vmem:[%s8363_s5 + $0x6c0] sm:$0xff]  }
 0x189   :  { %5951 = vmatpush3.bf16.msra.mxu1 %v6444_v63  ;;  %v6491_v63 = vld [vmem:[%s8363_s5 + $0x600] sm:$0xff]   ;;  %v829_v3 = vpack.c.bf16 %v753_v61, %v753_v61  ;;  %v6535_v61 = vld [vmem:[%s8363_s5 + $0x790] sm:$0xff]  }
 0x18a   :  { %5952 = vmatprep.subr.bf16.mxu1 %v6447_v0  ;;  %v754_v0 = vcombine.high %v7579_v58, %v7579_v58  ;;  %v6534_v58 = vld [vmem:[%s8363_s5 + $0x7d0] sm:$0xff]  }
 0x18b   :  { %5931 = vmatpush3.bf16.msra.mxu0 %v6446_v1  ;;  %v824_v1 = vpack.c.bf16 %v7460_v13, %v7460_v13  ;;  %v6498_v13 = vld [vmem:[%s8363_s5 + $0x688] sm:$0xff]  }
 0x18c   :  { %5932 = vmatprep.subr.bf16.mxu0 %v6449_v2  ;;  %v6495_v2 = vld [vmem:[%s8363_s5 + $0x648] sm:$0xff]   ;;  %v831_v10 = vpack.c.bf16 %v754_v0, %v754_v0  ;;  %v6540_v0 = vld [vmem:[%s8363_s5 + $0x760] sm:$0xff]  }
 0x18d   :  { %5953 = vmatpush3.bf16.msra.mxu1 %v6448_v5  ;;  %v6493_v5 = vld [vmem:[%s8363_s5 + $0x680] sm:$0xff]  }
 0x18e   :  { %5954 = vmatprep.subr.bf16.mxu1 %v6451_v8  ;;  %v826_v8 = vpack.c.bf16 %v7469_v16, %v7469_v16  ;;  %v6503_v16 = vld [vmem:[%s8363_s5 + $0x658] sm:$0xff]  }
 0x18f   :  { %5933 = vmatpush3.bf16.msra.mxu0 %v6450_v9  ;;  %v6497_v9 = vld [vmem:[%s8363_s5 + $0x6c8] sm:$0xff]  }
 0x190   :  { %5934 = vmatprep.subr.bf16.mxu0 %v6453_v11  ;;  %v6496_v11 = vld [vmem:[%s8363_s5 + $0x608] sm:$0xff]  }
 0x191   :  { %5955 = vmatpush3.bf16.msra.mxu1 %v6452_v12  ;;  %v6499_v12 = vld [vmem:[%s8363_s5 + $0x650] sm:$0xff]  }
 0x192   :  { %5956 = vmatprep.subr.bf16.mxu1 %v6455_v14  ;;  %v6501_v14 = vld [vmem:[%s8363_s5 + $0x6d0] sm:$0xff]  }
 0x193   :  { %5935 = vmatpush3.bf16.msra.mxu0 %v6454_v15  ;;  %v6500_v15 = vld [vmem:[%s8363_s5 + $0x610] sm:$0xff]  }
 0x194   :  { %5964 = vmatprep.subr.bf16.mxu0 %v6457_v17  ;;  %v6502_v17 = vld [vmem:[%s8363_s5 + $0x690] sm:$0xff]  }
 0x195   :  { %5957 = vmatpush3.bf16.msra.mxu1 %v6456_v18  ;;  %v6505_v18 = vld [vmem:[%s8363_s5 + $0x6d8] sm:$0xff]  }
 0x196   :  { %3244 = vmatmul.mubr.bf16.vlgmr.msra.gmra.mrb[20].mxu0 %v820_v22  ;;  %5986 = vmatprep.subr.bf16.mxu1 %v6459_v20  ;;  %v6507_v20 = vld [vmem:[%s8363_s5 + $0x660] sm:$0xff]  }
 0x197   :  { %5965 = vmatpush3.bf16.msra.mxu0 %v6458_v7  ;;  %3323 = vmatprep.mubr.bf16.mxu0 %v825_v24  ;;  %v6506_v7 = vld [vmem:[%s8363_s5 + $0x698] sm:$0xff]   ;;  %v6508_v22 = vld [vmem:[%s8363_s5 + $0x620] sm:$0xff]  }
 0x198   :  { %3284 = vmatmul.mubr.bf16.vlgmr.msra.gmra.mrb[20].mxu1 %v822_v26  ;;  %5966 = vmatprep.subr.bf16.mxu0 %v6462_v23  ;;  %v6511_v23 = vld [vmem:[%s8363_s5 + $0x668] sm:$0xff]   ;;  %v6510_v24 = vld [vmem:[%s8363_s5 + $0x6a0] sm:$0xff]  }
 0x199   :  { %5987 = vmatpush3.bf16.msra.mxu1 %v6460_v25  ;;  %3363 = vmatprep.mubr.bf16.mxu1 %v827_v30  ;;  %v6513_v25 = vld [vmem:[%s8363_s5 + $0x6e8] sm:$0xff]   ;;  %v627_v30 = vld [vmem:[#allocation3 + $0x38] sm:$0xff] }
 0x19a   :  { %5988 = vmatprep.subr.bf16.mxu1 %v6464_v27  ;;  %v6512_v26 = vld [vmem:[%s8363_s5 + $0x628] sm:$0xff]   ;;  %v6515_v27 = vld [vmem:[%s8363_s5 + $0x670] sm:$0xff]  }
 0x19b   :  { %5967 = vmatpush3.bf16.msra.mxu0 %v6463_v31  ;;  %v6514_v31 = vld [vmem:[%s8363_s5 + $0x6a8] sm:$0xff]  }
 0x19c   :  { %5968 = vmatprep.subr.bf16.mxu0 %v6466_v32  ;;  %v6517_v32 = vld [vmem:[%s8363_s5 + $0x6f0] sm:$0xff]  }
 0x19d   :  { %5989 = vmatpush3.bf16.msra.mxu1 %v6465_v33  ;;  %v6516_v33 = vld [vmem:[%s8363_s5 + $0x630] sm:$0xff]  }
 0x19e   :  { %5990 = vmatprep.subr.bf16.mxu1 %v6468_v34  ;;  %v755_v34 = vcombine.high %v627_v30, %v627_v30 }
 0x19f   :  { %5969 = vmatpush3.bf16.msra.mxu0 %v6467_v28  ;;  %v6519_v28 = vld [vmem:[%s8363_s5 + $0x678] sm:$0xff]  }
 0x1a0   :  { %5970 = vmatprep.subr.bf16.mxu0 %v6470_v35  ;;  %v6518_v35 = vld [vmem:[%s8363_s5 + $0x6b0] sm:$0xff]  }
 0x1a1   :  { %5991 = vmatpush3.bf16.msra.mxu1 %v6469_v36  ;;  %v7680_v36 = vrot.slane %v627_v30, %v6946_v29 }
 0x1a2   :  { %5992 = vmatprep.subr.bf16.mxu1 %v6472_v37  ;;  %v6521_v37 = vld [vmem:[%s8363_s5 + $0x6f8] sm:$0xff]  }
 0x1a3   :  { %5971 = vmatpush3.bf16.msra.mxu0 %v6471_v38  ;;  %v6520_v38 = vld [vmem:[%s8363_s5 + $0x638] sm:$0xff]  }
 0x1a4   :  { %5972 = vmatprep.subr.bf16.mxu0 %v6474_v39  ;;  %v7689_v39 = vrot.slane %v755_v34, %v6946_v29  ;;  %v6553_v34 = vld [vmem:[%s8363_s5 + $0x738] sm:$0xff]  }
 0x1a5   :  { %5993 = vmatpush3.bf16.msra.mxu1 %v6473_v40  ;;  %v3535_v40 = vld [vmem:[%s8367_s9] sm:$0xff] }
 0x1a6   :  { %5994 = vmatprep.subr.bf16.mxu1 %v6476_v41  ;;  %v6523_v41 = vld [vmem:[%s8363_s5 + $0x740] sm:$0xff]   ;;  %3539 = vperm.xlu1 %6278, %v3535_v40   ;;  %v832_v40 = vpack.c.bf16 %v7680_v36, %v7680_v36 }
 0x1a7   :  { %5973 = vmatpush3.bf16.msra.mxu0 %v6475_v42  ;;  %v6522_v42 = vld [vmem:[%s8363_s5 + $0x6b8] sm:$0xff]  }
 0x1a8   :  { %5974 = vmatprep.subr.bf16.mxu0 %v6478_v43  ;;  %v770_v43 = vcombine.high %v7680_v36, %v7680_v36 }
 0x1a9   :  { %5995 = vmatpush3.bf16.msra.mxu1 %v6477_v44  ;;  %v3536_v44 = vld [vmem:[%s8367_s9 + $0x8] sm:$0xff]  ;;  %s103_s9 = scalar_lea.vmem %s8359_s1, %s5312_s30 }
 0x1aa   :  { %5996 = vmatprep.subr.bf16.mxu1 %v6480_v45  ;;  %v6525_v45 = vld [vmem:[%s8363_s5 + $0x7c0] sm:$0xff]   ;;  %3544 = vperm.xlu1 %6278, %v3536_v44  }
 0x1ab   :  { %5975 = vmatpush3.bf16.msra.mxu0 %v6479_v46  ;;  %v6524_v46 = vld [vmem:[%s8363_s5 + $0x700] sm:$0xff]  }
 0x1ac   :  { %5976 = vmatprep.subr.bf16.mxu0 %v6482_v47  ;;  %v771_v47 = vcombine.high %v7689_v39, %v7689_v39 }
 0x1ad   :  { %5997 = vmatpush3.bf16.msra.mxu1 %v6481_v49  ;;  %v6528_v49 = vld [vmem:[%s8363_s5 + $0x748] sm:$0xff]  }
 0x1ae   :  { %5998 = vmatprep.subr.bf16.mxu1 %v6484_v50  ;;  %v833_v50 = vpack.c.bf16 %v770_v43, %v770_v43 }
 0x1af   :  { %5977 = vmatpush3.bf16.msra.mxu0 %v6483_v51  ;;  %v6526_v51 = vld [vmem:[%s8363_s5 + $0x780] sm:$0xff]  }
 0x1b0   :  { %5978 = vmatprep.subr.bf16.mxu0 %v6486_v53  ;;  %v6530_v53 = vld [vmem:[%s8363_s5 + $0x7c8] sm:$0xff]  }
 0x1b1   :  { %5999 = vmatpush3.bf16.msra.mxu1 %v6485_v54  ;;  %v835_v54 = vpack.c.bf16 %v771_v47, %v771_v47 }
 0x1b2   :  { %6000 = vmatprep.subr.bf16.mxu1 %v6488_v56  ;;  %v6532_v56 = vld [vmem:[%s8363_s5 + $0x750] sm:$0xff]  }
 0x1b3   :  { %5979 = vmatpush3.bf16.msra.mxu0 %v6487_v57  ;;  %v6531_v57 = vld [vmem:[%s8363_s5 + $0x788] sm:$0xff]  }
 0x1b4   :  { %6008 = vmatprep.subr.bf16.mxu0 %v6490_v59  ;;  %v6533_v59 = vld [vmem:[%s8363_s5 + $0x710] sm:$0xff]  }
 0x1b5   :  { %6001 = vmatpush3.bf16.msra.mxu1 %v6489_v60  ;;  %v6536_v60 = vld [vmem:[%s8363_s5 + $0x758] sm:$0xff]  }
 0x1b6   :  { %3324 = vmatmul.mubr.bf16.vlgmr.msra.gmra.mrb[24].mxu0 %v824_v1  ;;  %6030 = vmatprep.subr.bf16.mxu1 %v6492_v62  ;;  %v6538_v62 = vld [vmem:[%s8363_s5 + $0x7d8] sm:$0xff]  }
 0x1b7   :  { %6009 = vmatpush3.bf16.msra.mxu0 %v6491_v63  ;;  %3403 = vmatprep.mubr.bf16.mxu0 %v829_v3  ;;  %v6537_v63 = vld [vmem:[%s8363_s5 + $0x718] sm:$0xff]   ;;  %v6541_v3 = vld [vmem:[%s8363_s5 + $0x720] sm:$0xff]  }
 0x1b8   :  { %3364 = vmatmul.mubr.bf16.vlgmr.msra.gmra.mrb[24].mxu1 %v826_v8  ;;  %6010 = vmatprep.subr.bf16.mxu0 %v6495_v2  ;;  %v6539_v1 = vld [vmem:[%s8363_s5 + $0x798] sm:$0xff]   ;;  %v6542_v2 = vld [vmem:[%s8363_s5 + $0x7e0] sm:$0xff]  }
 0x1b9   :  { %6031 = vmatpush3.bf16.msra.mxu1 %v6493_v5  ;;  %3443 = vmatprep.mubr.bf16.mxu1 %v831_v10  ;;  %v6544_v5 = vld [vmem:[%s8363_s5 + $0x768] sm:$0xff]   ;;  %v6543_v8 = vld [vmem:[%s8363_s5 + $0x7a0] sm:$0xff]  }
 0x1ba   :  { %6032 = vmatprep.subr.bf16.mxu1 %v6497_v9  ;;  %v6546_v9 = vld [vmem:[%s8363_s5 + $0x7e8] sm:$0xff]  }
 0x1bb   :  { %6011 = vmatpush3.bf16.msra.mxu0 %v6496_v11  ;;  %v6545_v10 = vld [vmem:[%s8363_s5 + $0x728] sm:$0xff]   ;;  %v6548_v11 = vld [vmem:[%s8363_s5 + $0x770] sm:$0xff]  }
 0x1bc   :  { %6012 = vmatprep.subr.bf16.mxu0 %v6499_v12 }
 0x1bd   :  { %6033 = vmatpush3.bf16.msra.mxu1 %v6498_v13  ;;  %v6547_v13 = vld [vmem:[%s8363_s5 + $0x7a8] sm:$0xff]  }
 0x1be   :  { %6034 = vmatprep.subr.bf16.mxu1 %v6501_v14  ;;  %v5331_v14 = vld [vmem:[%s8364_s6] ss:$0 sm:$0xff]  ;;  %s7823_s6 = sld [smem:[#allocation6 + $0xb]] }
 0x1bf   :  { %6013 = vmatpush3.bf16.msra.mxu0 %v6500_v15 }
 0x1c0   :  { %6014 = vmatprep.subr.bf16.mxu0 %v6503_v16  ;;  %v6550_v16 = vld [vmem:[%s8363_s5 + $0x7f0] sm:$0xff]  }
 0x1c1   :  { %6035 = vmatpush3.bf16.msra.mxu1 %v6502_v17  ;;  %v3565_v17 = vsel %vm3564_vm4, 4294967295, %v6707_v4 }
 0x1c2   :  { %6036 = vmatprep.subr.bf16.mxu1 %v6505_v18  ;;  %v3566_v30 = vsel %vm203_vm0, %v3565_v17, 0 }
 0x1c3   :  { %6015 = vmatpush3.bf16.msra.mxu0 %v6504_v19 }
 0x1c4   :  { %6016 = vmatprep.subr.bf16.mxu0 %v6507_v20 }
 0x1c5   :  { %6037 = vmatpush3.bf16.msra.mxu1 %v6506_v7  ;;  %v6549_v7 = vld [vmem:[%s8363_s5 + $0x730] sm:$0xff]  }
 0x1c6   :  { %6038 = vmatprep.subr.bf16.mxu1 %v6509_v21 }
 0x1c7   :  { %6017 = vmatpush3.bf16.msra.mxu0 %v6508_v22 }
 0x1c8   :  { %6018 = vmatprep.subr.bf16.mxu0 %v6511_v23  ;;  %v6552_v23 = vld [vmem:[%s8363_s5 + $0x778] sm:$0xff]  }
 0x1c9   :  { %6039 = vmatpush3.bf16.msra.mxu1 %v6510_v24  ;;  %v6558_v24 = vld [vmem:[%s8365_s7 + $0x4] ss:$8 sps:$4 sm:$0x1f]  }
 0x1ca   :  { %6040 = vmatprep.subr.bf16.mxu1 %v6513_v25 }
 0x1cb   :  { %6019 = vmatpush3.bf16.msra.mxu0 %v6512_v26 }
 0x1cc   :  { %6020 = vmatprep.subr.bf16.mxu0 %v6515_v27  ;;  %v6551_v27 = vld [vmem:[%s8363_s5 + $0x7b0] sm:$0xff]  }
 0x1cd   :  { %6041 = vmatpush3.bf16.msra.mxu1 %v6514_v31 }
 0x1ce   :  { %6042 = vmatprep.subr.bf16.mxu1 %v6517_v32  ;;  %v6554_v32 = vld [vmem:[%s8363_s5 + $0x7f8] sm:$0xff]  }
 0x1cf   :  { %6021 = vmatpush3.bf16.msra.mxu0 %v6516_v33 }
 0x1d0   :  { %6022 = vmatprep.subr.bf16.mxu0 %v6519_v28  ;;  %v6556_v28 = vld [vmem:[%s8365_s7] ss:$8 sps:$4 sm:$0x1f]   ;;  %s7839_s7 = sld [smem:[#allocation6 + $0x5]] }
 0x1d1   :  { %6043 = vmatpush3.bf16.msra.mxu1 %v6518_v35  ;;  %v3571_v35 = vand.u32 %v6558_v24, %v3566_v30 }
 0x1d2   :  { %6044 = vmatprep.subr.bf16.mxu1 %v6521_v37  ;;  %v6555_v37 = vld [vmem:[%s8363_s5 + $0x7b8] sm:$0xff]   ;;  %s68_s5 = sld [smem:[#allocation6]] }
 0x1d3   :  { %6023 = vmatpush3.bf16.msra.mxu0 %v6520_v38  ;;  %v3568_v38 = vand.u32 %v6556_v28, %v3566_v30  ;;  %v6561_v28 = vld [vmem:[%s8368_s10] sm:$0xff]  }
 0x1d4   :  { %6052 = vmatprep.subr.bf16.mxu0 %v6523_v41  ;;  %v834_v41 = vpack.c.bf16 %v7689_v39, %v7689_v39 }
 0x1d5   :  { %6045 = vmatpush3.bf16.msra.mxu1 %v6522_v42  ;;  %v6559_v42 = vld [vmem:[%s8366_s8] sm:$0xff]   ;;  %s5305_s8 = sld [smem:[#allocation6 + $0x1]] }
 0x1d6   :  { %3404 = vmatmul.mubr.bf16.vlgmr.msra.gmra.mrb[28].mxu0 %v828_v48  ;;  %6074 = vmatprep.subr.bf16.mxu1 %v6525_v45  ;;  %s88_s29 = scalar_lea.vmem %s8359_s1, %s7839_s7 }
 0x1d7   :  { %6053 = vmatpush3.bf16.msra.mxu0 %v6524_v46  ;;  %3483 = vmatprep.mubr.bf16.mxu0 %v833_v50  ;;  %v89_v24 = vld [vmem:[%s88_s29] sm:$0x1] }
 0x1d8   :  { %3444 = vmatmul.mubr.bf16.vlgmr.msra.gmra.mrb[28].mxu1 %v830_v52  ;;  %6054 = vmatprep.subr.bf16.mxu0 %v6528_v49  ;;  %s69_s21 = scalar_lea.vmem %s8359_s1, %s68_s5  ;;  %s7870_s5 = sld [smem:[#allocation6 + $0xe]] }
 0x1d9   :  { %6075 = vmatpush3.bf16.msra.mxu1 %v6526_v51  ;;  %3523 = vmatprep.mubr.bf16.mxu1 %v835_v54 }
 0x1da   :  { %6076 = vmatprep.subr.bf16.mxu1 %v6530_v53 }
 0x1db   :  { %6055 = vmatpush3.bf16.msra.mxu0 %v6529_v55  ;;  %s72_s23 = scalar_lea.vmem %s8359_s1, %s5305_s8  ;;  %s106_s8 = scalar_lea.vmem %s8359_s1, %s5313_s0 }
 0x1dc   :  { %6056 = vmatprep.subr.bf16.mxu0 %v6532_v56  ;;  %s114_s0 = scalar_lea.vmem %s8359_s1, %s7823_s6 }
 0x1dd   :  { %6077 = vmatpush3.bf16.msra.mxu1 %v6531_v57  ;;  %v115_v17 = vld [vmem:[%s114_s0] sm:$0x1] }
 0x1de   :  { %6078 = vmatprep.subr.bf16.mxu1 %v6534_v58  ;;  %s126_s3 = scalar_lea.vmem %s8359_s1, %s7870_s5 }
 0x1df   :  { %6057 = vmatpush3.bf16.msra.mxu0 %v6533_v59 }
 0x1e0   :  { %6058 = vmatprep.subr.bf16.mxu0 %v6536_v60 }
 0x1e1   :  { %6079 = vmatpush3.bf16.msra.mxu1 %v6535_v61 }
 0x1e2   :  { %6080 = vmatprep.subr.bf16.mxu1 %v6538_v62 }
 0x1e3   :  { %6059 = vmatpush3.bf16.msra.mxu0 %v6537_v63 }
 0x1e4   :  { %6060 = vmatprep.subr.bf16.mxu0 %v6540_v0  ;;  %v70_v0 = vld [vmem:[%s69_s21] sm:$0x1]  ;;  %s110_s21 = scalar_lea.vmem %s8359_s1, %s5314_s2  ;;  %s7858_s2 = sld [smem:[#allocation6 + $0x7]] }
 0x1e5   :  { %6081 = vmatpush3.bf16.msra.mxu1 %v6539_v1  ;;  %v73_v1 = vld [vmem:[%s72_s23] sm:$0x1]  ;;  %s7850_s23 = sld [smem:[#allocation6 + $0x6]] }
 0x1e6   :  { %6082 = vmatprep.subr.bf16.mxu1 %v6542_v2  ;;  %v74_v2 = vadd.f32 %v73_v1, %v70_v0  ;;  %v6576_v0 = vld [vmem:[%s8368_s10 + $0x60] sm:$0xff]  }
 0x1e7   :  { %6061 = vmatpush3.bf16.msra.mxu0 %v6541_v3  ;;  %v104_v3 = vld [vmem:[%s103_s9] sm:$0x1] }
 0x1e8   :  { %6062 = vmatprep.subr.bf16.mxu0 %v6544_v5  ;;  %v77_v5 = vld [vmem:[%s76_s28] sm:$0x1] }
 0x1e9   :  { %6083 = vmatpush3.bf16.msra.mxu1 %v6543_v8  ;;  %v5760_v12 = vpop.f32.mrb[4].mxu0  ;;  %v78_v8 = vadd.f32 %v77_v5, %v74_v2  ;;  %v6577_v1 = vld [vmem:[%s8368_s10 + $0x20] sm:$0xff]  }
 0x1ea   :  { %v5761_v15 = vpop.f32.mrb[5].mxu0  ;;  %6084 = vmatprep.subr.bf16.mxu1 %v6546_v9  ;;  %v107_v9 = vld [vmem:[%s106_s8] sm:$0x1] }
 0x1eb   :  { %v5762_v18 = vadd.f32 %v5761_v15, %v5760_v12  ;;  %6063 = vmatpush3.bf16.msra.mxu0 %v6545_v10  ;;  %v5763_v19 = vpop.f32.mrb[6].mxu0  ;;  %v5782_v20 = vpop.f32.mrb[4].mxu1  ;;  %v111_v10 = vld [vmem:[%s110_s21] sm:$0x1]  ;;  %v108_v12 = vadd.f32 %v107_v9, %v104_v3  ;;  %s92_s7 = scalar_lea.vmem %s8359_s1, %s7850_s23  ;;  %v6582_v9 = vld [vmem:[%s8368_s10 + $0xe8] sm:$0xff]  }
 0x1ec   :  { %v5764_v21 = vpop.f32.mrb[7].mxu0  ;;  %v5783_v22 = vpop.f32.mrb[5].mxu1  ;;  %6064 = vmatprep.subr.bf16.mxu0 %v6548_v11  ;;  %v81_v11 = vld [vmem:[%s80_s22] sm:$0x1]  ;;  %s118_s22 = scalar_lea.vmem %s8359_s1, %s7856_s25  ;;  %s96_s25 = scalar_lea.vmem %s8359_s1, %s7858_s2 }
 0x1ed   :  { %v2926_v4 = vadd.f32 %v5762_v18, %v5331_v14  ;;  %v5784_v25 = vadd.f32 %v5783_v22, %v5782_v20  ;;  %6085 = vmatpush3.bf16.msra.mxu1 %v6547_v13  ;;  %v5785_v26 = vpop.f32.mrb[6].mxu1  ;;  %v82_v14 = vadd.f32 %v81_v11, %v78_v8  ;;  %v6578_v2 = vld [vmem:[%s8368_s10 + $0xe0] sm:$0xff]   ;;  %v6580_v8 = vld [vmem:[%s8368_s10 + $0x68] sm:$0xff]  }
 0x1ee   :  { %v5786_v31 = vpop.f32.mrb[7].mxu1  ;;  %6086 = vmatprep.subr.bf16.mxu1 %v6550_v16  ;;  %v112_v16 = vadd.f32 %v111_v10, %v108_v12  ;;  %v6579_v5 = vld [vmem:[%s8368_s10 + $0xa0] sm:$0xff]   ;;  %v6581_v10 = vld [vmem:[%s8368_s10 + $0x28] sm:$0xff]   ;;  %v6584_v12 = vld [vmem:[%s8368_s10 + $0x70] sm:$0xff]  }
 0x1ef   :  { %v2966_v33 = vadd.f32 %v5784_v25, %v2926_v4  ;;  %6065 = vmatpush3.bf16.msra.mxu0 %v6549_v7  ;;  %v85_v7 = vld [vmem:[%s84_s26] sm:$0x1] }
 0x1f0   :  { %6066 = vmatprep.subr.bf16.mxu0 %v6552_v23  ;;  %v86_v23 = vadd.f32 %v85_v7, %v82_v14  ;;  %v6583_v14 = vld [vmem:[%s8368_s10 + $0xa8] sm:$0xff]   ;;  %v6585_v7 = vld [vmem:[%s8368_s10 + $0x30] sm:$0xff]  }
 0x1f1   :  { %6087 = vmatpush3.bf16.msra.mxu1 %v6551_v27  ;;  %v6560_v27 = vld [vmem:[%s8368_s10 + $0x40] sm:$0xff]  }
 0x1f2   :  { %6088 = vmatprep.subr.bf16.mxu1 %v6554_v32  ;;  %v90_v31 = vadd.f32 %v89_v24, %v86_v23  ;;  %v93_v32 = vld [vmem:[%s92_s7] sm:$0x1]  ;;  %v6588_v24 = vld [vmem:[%s8368_s10 + $0x78] sm:$0xff]  }
 0x1f3   :  { %6067 = vmatpush3.bf16.msra.mxu0 %v6553_v34 }
 0x1f4   :  { %3573 = vmatprep.subr.bf16.mxu0 %v3571_v35  ;;  %v6562_v35 = vld [vmem:[%s8368_s10 + $0xc0] sm:$0xff]  }
 0x1f5   :  { %6089 = vmatpush3.bf16.msra.mxu1 %v6555_v37  ;;  %v6563_v37 = vld [vmem:[%s8368_s10 + $0x80] sm:$0xff]  }
 0x1f6   :  { %3484 = vmatmul.mubr.bf16.vlgmr.msra.gmra.mrb[32].mxu0 %v832_v40  ;;  %6096 = vmatprep.subr.bf16.mxu1 %v6560_v27  ;;  %v94_v40 = vadd.f32 %v93_v32, %v90_v31  ;;  %v6590_v27 = vld [vmem:[%s8368_s10 + $0xf8] sm:$0xff]   ;;  %v6592_v31 = vld [vmem:[%s8368_s10 + $0x140] sm:$0xff]  }
 0x1f7   :  { %3574 = vmatpush1.bf16.msra.mxu0 %v3568_v38  ;;  %3605 = vmatprep.mubr.bf16.mxu0 %v6708_v6  ;;  %v6564_v38 = vld [vmem:[%s8368_s10 + $0x48] sm:$0xff]   ;;  %v6591_v32 = vld [vmem:[%s8368_s10 + $0xb8] sm:$0xff]  }
 0x1f8   :  { %3524 = vmatmul.mubr.bf16.vlgmr.msra.gmra.mrb[32].mxu1 %v834_v41  ;;  %v97_v41 = vld [vmem:[%s96_s25] sm:$0x1]  ;;  %6118 = vmatprep.subr.bf16.mxu0 %v6562_v35 }
 0x1f9   :  { %6097 = vmatpush3.bf16.msra.mxu1 %v6561_v28 }
 0x1fa   :  { %6098 = vmatprep.subr.bf16.mxu1 %v6564_v38 }
 0x1fe   :  { %5591 = vmatmul.mubr.msk.bf16.vlgmr.msra.gmra.mrb[36].mxu0 %vm3560_vm5, %v6559_v42  ;;  %v6565_v42 = vld [vmem:[%s8368_s10 + $0x8] sm:$0xff]  }
 0x1ff   :  { %6119 = vmatpush3.bf16.msra.mxu0 %v6563_v37  ;;  %6099 = vmatpush3.bf16.msra.mxu1 %v6565_v42 }
 0x209   :  { %v5804_v43 = vpop.f32.mrb[8].mxu0 }
 0x20a   :  { %v5805_v44 = vpop.f32.mrb[9].mxu0 }
 0x20b   :  { %v5806_v45 = vadd.f32 %v5805_v44, %v5804_v43  ;;  %v5807_v36 = vpop.f32.mrb[10].mxu0  ;;  %v5826_v46 = vpop.f32.mrb[8].mxu1  ;;  %v119_v43 = vld [vmem:[%s118_s22] sm:$0x1] }
 0x20c   :  { %v5808_v47 = vpop.f32.mrb[11].mxu0  ;;  %v5827_v48 = vpop.f32.mrb[9].mxu1  ;;  %v123_v44 = vld [vmem:[%s122_s20] sm:$0x1] }
 0x20d   :  { %v3006_v49 = vadd.f32 %v5806_v45, %v2966_v33  ;;  %v5828_v50 = vadd.f32 %v5827_v48, %v5826_v46  ;;  %v5829_v39 = vpop.f32.mrb[10].mxu1  ;;  %v116_v33 = vadd.f32 %v115_v17, %v112_v16  ;;  %v98_v45 = vadd.f32 %v97_v41, %v94_v40  ;;  %v127_v46 = vld [vmem:[%s126_s3] sm:$0x1] }
 0x20e   :  { %v5830_v51 = vpop.f32.mrb[11].mxu1 }
 0x20f   :  { %v3046_v52 = vadd.f32 %v5828_v50, %v3006_v49  ;;  %v120_v36 = vadd.f32 %v119_v43, %v116_v33  ;;  %v99_v47 = vmul.f32 0.125, %v98_v45  ;;  %v131_v49 = vld [vmem:[%s130_s27] sm:$0x1] }
 0x210   :  { %v6595_v33 = vld [vmem:[%s8368_s10 + $0x1c0] sm:$0xff]  }
 0x211   :  { %v124_v48 = vadd.f32 %v123_v44, %v120_v36  ;;  %101 = vst.msk [vmem:[#allocation2] sm:$0x1] %vm100_vm6, %v99_v47 }
 0x213   :  { %v128_v50 = vadd.f32 %v127_v46, %v124_v48 }
 0x215   :  { %v132_v39 = vadd.f32 %v131_v49, %v128_v50 }
 0x217   :  { %v133_v51 = vmul.f32 0.125, %v132_v39 }
 0x219   :  { %134 = vst.msk [vmem:[#allocation2 + $0x1] sm:$0x1] %vm100_vm6, %v133_v51 }
 0x229   :  { %v5848_v6 = vpop.f32.mrb[12].mxu0 }
 0x22a   :  { %v5849_v53 = vpop.f32.mrb[13].mxu0 }
 0x22b   :  { %v5850_v54 = vadd.f32 %v5849_v53, %v5848_v6  ;;  %v5851_v55 = vpop.f32.mrb[14].mxu0  ;;  %v5870_v56 = vpop.f32.mrb[12].mxu1  ;;  %v6567_v6 = vld [vmem:[%s8368_s10 + $0x88] sm:$0xff]   ;;  %v6568_v53 = vld [vmem:[%s8368_s10 + $0x50] sm:$0xff]  }
 0x22c   :  { %v5852_v57 = vpop.f32.mrb[15].mxu0  ;;  %v5871_v58 = vpop.f32.mrb[13].mxu1  ;;  %6100 = vmatprep.subr.bf16.mxu1 %v6568_v53  ;;  %v6570_v55 = vld [vmem:[%s8368_s10 + $0xd0] sm:$0xff]  }
 0x22d   :  { %v3086_v59 = vadd.f32 %v5850_v54, %v3046_v52  ;;  %v5872_v60 = vadd.f32 %v5871_v58, %v5870_v56  ;;  %v5873_v61 = vpop.f32.mrb[14].mxu1  ;;  %v6566_v52 = vld [vmem:[%s8368_s10 + $0xc8] sm:$0xff]   ;;  %v6569_v54 = vld [vmem:[%s8368_s10 + $0x10] sm:$0xff]   ;;  %v5741_v57 = vld [vmem:[%s8370_s12] ss:$0 sm:$0xff] }
 0x22e   :  { %v5874_v62 = vpop.f32.mrb[15].mxu1  ;;  %6120 = vmatprep.subr.bf16.mxu0 %v6566_v52  ;;  %6101 = vmatpush3.bf16.msra.mxu1 %v6569_v54  ;;  %v6571_v56 = vld [vmem:[%s8368_s10 + $0x90] sm:$0xff]   ;;  %v6572_v58 = vld [vmem:[%s8368_s10 + $0x58] sm:$0xff]  }
 0x22f   :  { %v3126_v63 = vadd.f32 %v5872_v60, %v3086_v59  ;;  %6121 = vmatpush3.bf16.msra.mxu0 %v6567_v6  ;;  %v6573_v59 = vld [vmem:[%s8368_s10 + $0x18] sm:$0xff]   ;;  %v135_v60 = vld [vmem:[#allocation2] sm:$0x3]  ;;  %6102 = vmatprep.subr.bf16.mxu1 %v6572_v58  ;;  %v3540_v58 = vpop.permute.xlu1 %3539 }
 0x230   :  { %6122 = vmatprep.subr.bf16.mxu0 %v6570_v55  ;;  %v6574_v61 = vld [vmem:[%s8368_s10 + $0xd8] sm:$0xff]   ;;  %v5250_v62 = vmul.f32 %v5741_v57, %v135_v60 }
 0x232   :  { %6103 = vmatpush3.bf16.msra.mxu1 %v6573_v59  ;;  %v5252_v3 = vsel %vm5251_vm7, %v5250_v62, 0.0 }
 0x233   :  { %6123 = vmatpush3.bf16.msra.mxu0 %v6571_v56  ;;  %5253 = vadd.xlane.f32.xlu0 %v5252_v3 }
 0x234   :  { %6124 = vmatprep.subr.bf16.mxu0 %v6574_v61  ;;  %6104 = vmatprep.subr.bf16.mxu1 %v6576_v0 }
 0x236   :  { %6105 = vmatpush3.bf16.msra.mxu1 %v6577_v1 }
 0x237   :  { %6106 = vmatprep.subr.bf16.mxu1 %v6580_v8 }
 0x23a   :  { %6107 = vmatpush3.bf16.msra.mxu1 %v6581_v10  ;;  %v3545_v10 = vpop.permute.xlu1 %3544 }
 0x23b   :  { %6108 = vmatprep.subr.bf16.mxu1 %v6584_v12 }
 0x23e   :  { %6109 = vmatpush3.bf16.msra.mxu1 %v6585_v7 }
 0x23f   :  { %6110 = vmatprep.subr.bf16.mxu1 %v6588_v24 }
 0x249   :  { %v5892_v13 = vpop.f32.mrb[16].mxu0 }
 0x24a   :  { %v5893_v15 = vpop.f32.mrb[17].mxu0 }
 0x24b   :  { %v5894_v18 = vadd.f32 %v5893_v15, %v5892_v13  ;;  %v5895_v19 = vpop.f32.mrb[18].mxu0  ;;  %v5914_v20 = vpop.f32.mrb[16].mxu1 }
 0x24c   :  { %v5896_v21 = vpop.f32.mrb[19].mxu0  ;;  %v5915_v22 = vpop.f32.mrb[17].mxu1 }
 0x24d   :  { %v3166_v4 = vadd.f32 %v5894_v18, %v3126_v63  ;;  %v5916_v25 = vadd.f32 %v5915_v22, %v5914_v20  ;;  %v5917_v26 = vpop.f32.mrb[18].mxu1  ;;  %v6575_v63 = vld [vmem:[%s8368_s10 + $0x98] sm:$0xff]   ;;  %v6586_v18 = vld [vmem:[%s8368_s10 + $0xf0] sm:$0xff]  }
 0x24e   :  { %v5918_v30 = vpop.f32.mrb[19].mxu1  ;;  %6125 = vmatpush3.bf16.msra.mxu0 %v6575_v63 }
 0x24f   :  { %v7885_v34 = vadd.f32 %v5916_v25, %v3166_v4  ;;  %6126 = vmatprep.subr.bf16.mxu0 %v6578_v2  ;;  %v6587_v25 = vld [vmem:[%s8368_s10 + $0xb0] sm:$0xff]   ;;  %v6589_v30 = vld [vmem:[%s8368_s10 + $0x38] sm:$0xff]  }
 0x250   :  { %6111 = vmatpush3.bf16.msra.mxu1 %v6589_v30 }
 0x251   :  { %6140 = vmatprep.subr.bf16.mxu1 %v6592_v31 }
 0x252   :  { %6127 = vmatpush3.bf16.msra.mxu0 %v6579_v5  ;;  %v5742_v5 = vld [vmem:[%s8371_s13] ss:$0 sm:$0xff] }
 0x253   :  { %6128 = vmatprep.subr.bf16.mxu0 %v6582_v9 }
 0x256   :  { %6129 = vmatpush3.bf16.msra.mxu0 %v6583_v14 }
 0x257   :  { %6130 = vmatprep.subr.bf16.mxu0 %v6586_v18 }
 0x25a   :  { %6131 = vmatpush3.bf16.msra.mxu0 %v6587_v25 }
 0x25b   :  { %6132 = vmatprep.subr.bf16.mxu0 %v6590_v27 }
 0x25e   :  { %6133 = vmatpush3.bf16.msra.mxu0 %v6591_v32 }
 0x25f   :  { %6162 = vmatprep.subr.bf16.mxu0 %v6595_v33 }
 0x269   :  { %v5936_v11 = vpop.f32.mrb[20].mxu0 }
 0x26a   :  { %v5937_v13 = vpop.f32.mrb[21].mxu0 }
 0x26b   :  { %v5938_v15 = vadd.f32 %v5937_v13, %v5936_v11  ;;  %v5939_v16 = vpop.f32.mrb[22].mxu0  ;;  %v5958_v17 = vpop.f32.mrb[20].mxu1 }
 0x26c   :  { %v5940_v19 = vpop.f32.mrb[23].mxu0  ;;  %v5959_v20 = vpop.f32.mrb[21].mxu1 }
 0x26d   :  { %v3246_v21 = vadd.f32 %v5938_v15, %v7885_v34  ;;  %v5960_v22 = vadd.f32 %v5959_v20, %v5958_v17  ;;  %v5961_v23 = vpop.f32.mrb[22].mxu1 }
 0x26e   :  { %v5962_v4 = vpop.f32.mrb[23].mxu1 }
 0x26f   :  { %v3286_v26 = vadd.f32 %v5960_v22, %v3246_v21 }
 0x289   :  { %v5980_v34 = vpop.f32.mrb[24].mxu0 }
 0x28a   :  { %v5981_v28 = vpop.f32.mrb[25].mxu0 }
 0x28b   :  { %v5982_v35 = vadd.f32 %v5981_v28, %v5980_v34  ;;  %v5983_v37 = vpop.f32.mrb[26].mxu0  ;;  %v6002_v38 = vpop.f32.mrb[24].mxu1 }
 0x28c   :  { %v5984_v40 = vpop.f32.mrb[27].mxu0  ;;  %v6003_v41 = vpop.f32.mrb[25].mxu1 }
 0x28d   :  { %v3326_v42 = vadd.f32 %v5982_v35, %v3286_v26  ;;  %v6004_v43 = vadd.f32 %v6003_v41, %v6002_v38  ;;  %v6005_v44 = vpop.f32.mrb[26].mxu1 }
 0x28e   :  { %v6006_v45 = vpop.f32.mrb[27].mxu1 }
 0x28f   :  { %v3366_v36 = vadd.f32 %v6004_v43, %v3326_v42 }
 0x2a9   :  { %v6024_v46 = vpop.f32.mrb[28].mxu0 }
 0x2aa   :  { %v6025_v47 = vpop.f32.mrb[29].mxu0 }
 0x2ab   :  { %v6026_v48 = vadd.f32 %v6025_v47, %v6024_v46  ;;  %v6027_v49 = vpop.f32.mrb[30].mxu0  ;;  %v6046_v50 = vpop.f32.mrb[28].mxu1 }
 0x2ac   :  { %v6028_v39 = vpop.f32.mrb[31].mxu0  ;;  %v6047_v51 = vpop.f32.mrb[29].mxu1 }
 0x2ad   :  { %v3406_v52 = vadd.f32 %v6026_v48, %v3366_v36  ;;  %v6048_v6 = vadd.f32 %v6047_v51, %v6046_v50  ;;  %v6049_v53 = vpop.f32.mrb[30].mxu1 }
 0x2ae   :  { %v6050_v54 = vpop.f32.mrb[31].mxu1 }
 0x2af   :  { %v3446_v55 = vadd.f32 %v6048_v6, %v3406_v52 }
 0x2c9   :  { %v6068_v56 = vpop.f32.mrb[32].mxu0 }
 0x2ca   :  { %v6069_v57 = vpop.f32.mrb[33].mxu0 }
 0x2cb   :  { %v6070_v59 = vadd.f32 %v6069_v57, %v6068_v56  ;;  %v6071_v60 = vpop.f32.mrb[34].mxu0  ;;  %v6090_v61 = vpop.f32.mrb[32].mxu1 }
 0x2cc   :  { %v6072_v62 = vpop.f32.mrb[35].mxu0  ;;  %v6091_v63 = vpop.f32.mrb[33].mxu1 }
 0x2cd   :  { %v3486_v0 = vadd.f32 %v6070_v59, %v3446_v55  ;;  %v6092_v1 = vadd.f32 %v6091_v63, %v6090_v61  ;;  %v6093_v2 = vpop.f32.mrb[34].mxu1 }
 0x2ce   :  { %v6094_v3 = vpop.f32.mrb[35].mxu1 }
 0x2cf   :  { %v3526_v8 = vadd.f32 %v6092_v1, %v3486_v0  ;;  %v6593_v3 = vld [vmem:[%s8368_s10 + $0x100] sm:$0xff]  }
 0x2d1   :  { %v3607_v9 = vpop.f32.mrb[36].mxu0  ;;  %v5262_v11 = vmul.f32 %v5742_v5, %v3526_v8 }
 0x2d2   :  { %v3608_v12 = vadd.f32 %v3607_v9, %v3540_v58  ;;  %v3609_v13 = vpop.f32.mrb[37].mxu0 }
 0x2d3   :  { %v3610_v14 = vadd.f32 %v3609_v13, %v3540_v58  ;;  %v3611_v15 = vpop.f32.mrb[38].mxu0  ;;  %v5263_v16 = vsel %vm5251_vm7, %v5262_v11, 0.0  ;;  %v6596_v13 = vld [vmem:[%s8368_s10 + $0x180] sm:$0xff]  }
 0x2d4   :  { %v3616_v17 = vmax.f32 %v3608_v12, 0.0  ;;  %v3612_v18 = vadd.f32 %v3611_v15, %v3545_v10  ;;  %v3613_v19 = vpop.f32.mrb[39].mxu0  ;;  %5264 = vadd.xlane.f32.xlu1 %v5263_v16 }
 0x2d5   :  { %v3617_v20 = vmax.f32 %v3610_v14, 0.0  ;;  %v3614_v7 = vadd.f32 %v3613_v19, %v3545_v10  ;;  %v6597_v14 = vld [vmem:[%s8368_s10 + $0x148] sm:$0xff]  }
 0x2d6   :  { %3620 = vst [vmem:[#allocation4] sm:$0x1] %v3616_v17  ;;  %v3629_v21 = vrot.slane %v3616_v17, %v6946_v29  ;;  %v3660_v22 = vcombine.high %v3616_v17, %v3616_v17  ;;  %v3618_v23 = vmax.f32 %v3612_v18, 0.0  ;;  %v6600_v17 = vld [vmem:[%s8368_s10 + $0x1c8] sm:$0xff]  }
 0x2d7   :  { %3621 = vst [vmem:[#allocation4 + $0x1] sm:$0x1] %v3617_v20  ;;  %v3641_v24 = vrot.slane %v3617_v20, %v6946_v29  ;;  %v3670_v4 = vcombine.high %v3617_v20, %v3617_v20  ;;  %v3619_v25 = vmax.f32 %v3614_v7, 0.0  ;;  %v6599_v18 = vld [vmem:[%s8368_s10 + $0x108] sm:$0xff]   ;;  %v6602_v20 = vld [vmem:[%s8368_s10 + $0x150] sm:$0xff]  }
 0x2d8   :  { %v5592_v26 = vrot.slane %v3629_v21, 9  ;;  %v3646_v27 = vcombine.high %v3629_v21, %v3629_v21  ;;  %v3667_v30 = vrot.slane %v3660_v22, %v6946_v29  ;;  %5596 = vst.sshfl [vmem:[#allocation4 + $0x8] sm:$0x1 pattern:$0x76325410] %v3660_v22  ;;  %v3711_v31 = vrot.slane %v3618_v23, %v6946_v29  ;;  %v6601_v7 = vld [vmem:[%s8368_s10 + $0x188] sm:$0xff]  }
 0x2d9   :  { %3702 = vst [vmem:[#allocation4 + $0x10] sm:$0x1] %v3618_v23  ;;  %v5593_v32 = vrot.slane %v3641_v24, 9  ;;  %v3649_v33 = vcombine.high %v3641_v24, %v3641_v24  ;;  %v3677_v34 = vrot.slane %v3670_v4, %v6946_v29  ;;  %v3742_v28 = vcombine.high %v3618_v23, %v3618_v23  ;;  %3703 = vst [vmem:[#allocation4 + $0x11] sm:$0x1] %v3619_v25  ;;  %v6604_v21 = vld [vmem:[%s8368_s10 + $0x1d0] sm:$0xff]  }
 0x2da   :  { %5597 = vst.sshfl [vmem:[#allocation4 + $0x9] sm:$0x1 pattern:$0x76325410] %v3670_v4  ;;  %3633 = vst [vmem:[#allocation4 + $0x2] sm:$0x1] %v5592_v26  ;;  %v3688_v38 = vcombine.high %v3667_v30, %v3667_v30  ;;  %v3728_v44 = vcombine.high %v3711_v31, %v3711_v31  ;;  %v3723_v46 = vrot.slane %v3619_v25, %v6946_v29 }
 0x2db   :  { %3648 = vst [vmem:[#allocation4 + $0x4] sm:$0x1] %v3646_v27  ;;  %v5594_v35 = vrot.slane %v3646_v27, 9  ;;  %v5598_v37 = vrot.slane %v3667_v30, 9  ;;  %v5602_v40 = vrot.slane %v3711_v31, 9  ;;  %v5595_v41 = vrot.slane %v3649_v33, 9 }
 0x2dc   :  { %3645 = vst [vmem:[#allocation4 + $0x3] sm:$0x1] %v5593_v32  ;;  %3651 = vst [vmem:[#allocation4 + $0x5] sm:$0x1] %v3649_v33  ;;  %v5599_v42 = vrot.slane %v3677_v34, 9  ;;  %v3691_v43 = vcombine.high %v3677_v34, %v3677_v34  ;;  %v5600_v45 = vrot.slane %v3688_v38, 9  ;;  %v3749_v36 = vrot.slane %v3742_v28, %v6946_v29 }
 0x2dd   :  { %5606 = vst.sshfl [vmem:[#allocation4 + $0x18] sm:$0x1 pattern:$0x76325410] %v3742_v28  ;;  %3655 = vst [vmem:[#allocation4 + $0x6] sm:$0x1] %v5594_v35  ;;  %v3752_v47 = vcombine.high %v3619_v25, %v3619_v25  ;;  %v3731_v52 = vcombine.high %v3723_v46, %v3723_v46 }
 0x2de   :  { %3683 = vst [vmem:[#allocation4 + $0xa] sm:$0x1] %v5598_v37  ;;  %3690 = vst [vmem:[#allocation4 + $0xc] sm:$0x1] %v3688_v38  ;;  %v5601_v48 = vrot.slane %v3691_v43, 9  ;;  %v5604_v49 = vrot.slane %v3728_v44, 9  ;;  %v3770_v39 = vcombine.high %v3749_v36, %v3749_v36 }
 0x2df   :  { %3715 = vst [vmem:[#allocation4 + $0x12] sm:$0x1] %v5602_v40  ;;  %3659 = vst [vmem:[#allocation4 + $0x7] sm:$0x1] %v5595_v41  ;;  %v5608_v50 = vrot.slane %v3749_v36, 9  ;;  %v5603_v51 = vrot.slane %v3723_v46, 9  ;;  %v3759_v6 = vrot.slane %v3752_v47, %v6946_v29 }
 0x2e0   :  { %3687 = vst [vmem:[#allocation4 + $0xb] sm:$0x1] %v5599_v42  ;;  %3693 = vst [vmem:[#allocation4 + $0xd] sm:$0x1] %v3691_v43  ;;  %v5610_v53 = vrot.slane %v3770_v39, 9  ;;  %v5605_v54 = vrot.slane %v3731_v52, 9 }
 0x2e1   :  { %3730 = vst [vmem:[#allocation4 + $0x14] sm:$0x1] %v3728_v44  ;;  %3697 = vst [vmem:[#allocation4 + $0xe] sm:$0x1] %v5600_v45  ;;  %v5609_v55 = vrot.slane %v3759_v6, 9  ;;  %v3773_v56 = vcombine.high %v3759_v6, %v3759_v6  ;;  %v6603_v22 = vld [vmem:[%s8368_s10 + $0x110] sm:$0xff]  }
 0x2e2   :  { %5607 = vst.sshfl [vmem:[#allocation4 + $0x19] sm:$0x1 pattern:$0x76325410] %v3752_v47  ;;  %3701 = vst [vmem:[#allocation4 + $0xf] sm:$0x1] %v5601_v48 }
 0x2e3   :  { %3737 = vst [vmem:[#allocation4 + $0x16] sm:$0x1] %v5604_v49  ;;  %3765 = vst [vmem:[#allocation4 + $0x1a] sm:$0x1] %v5608_v50  ;;  %v5611_v57 = vrot.slane %v3773_v56, 9  ;;  %v6606_v23 = vld [vmem:[%s8368_s10 + $0x158] sm:$0xff]  }
 0x2e4   :  { %3772 = vst [vmem:[#allocation4 + $0x1c] sm:$0x1] %v3770_v39  ;;  %3727 = vst [vmem:[#allocation4 + $0x13] sm:$0x1] %v5603_v51  ;;  %v6605_v24 = vld [vmem:[%s8368_s10 + $0x190] sm:$0xff]   ;;  %v6608_v4 = vld [vmem:[%s8368_s10 + $0x1d8] sm:$0xff]  }
 0x2e5   :  { %3733 = vst [vmem:[#allocation4 + $0x15] sm:$0x1] %v3731_v52  ;;  %3779 = vst [vmem:[#allocation4 + $0x1e] sm:$0x1] %v5610_v53  ;;  %v6607_v25 = vld [vmem:[%s8368_s10 + $0x118] sm:$0xff]   ;;  %v6610_v26 = vld [vmem:[%s8368_s10 + $0x160] sm:$0xff]  }
 0x2e6   :  { %3741 = vst [vmem:[#allocation4 + $0x17] sm:$0x1] %v5605_v54  ;;  %3769 = vst [vmem:[#allocation4 + $0x1b] sm:$0x1] %v5609_v55  ;;  %v3784_v58 = vld [vmem:[#allocation4] sm:$0xff]  ;;  %v6609_v27 = vld [vmem:[%s8368_s10 + $0x198] sm:$0xff]  }
 0x2e7   :  { %3775 = vst [vmem:[#allocation4 + $0x1d] sm:$0x1] %v3773_v56  ;;  %3783 = vst [vmem:[#allocation4 + $0x1f] sm:$0x1] %v5611_v57  ;;  %v3799_v59 = vrot.slane %v3784_v58, %v6946_v29  ;;  %v3792_v60 = vcombine.high %v3784_v58, %v3784_v58  ;;  %v6612_v30 = vld [vmem:[%s8368_s10 + $0x1e0] sm:$0xff]   ;;  %v6614_v32 = vld [vmem:[%s8368_s10 + $0x168] sm:$0xff]  }
 0x2e8   :  { %v6611_v31 = vld [vmem:[%s8368_s10 + $0x120] sm:$0xff]   ;;  %v6616_v34 = vld [vmem:[%s8368_s10 + $0x1e8] sm:$0xff]   ;;  %v6618_v35 = vld [vmem:[%s8368_s10 + $0x170] sm:$0xff]  }
 0x2e9   :  { %v3785_v61 = vld [vmem:[#allocation4 + $0x8] sm:$0xff]  ;;  %v3807_v62 = vcombine.high %v3799_v59, %v3799_v59  ;;  %v3806_v63 = vrot.slane %v3792_v60, %v6946_v29  ;;  %v3876_v9 = vpack.c.bf16 %v3799_v59, %v3799_v59  ;;  %v6613_v33 = vld [vmem:[%s8368_s10 + $0x1a0] sm:$0xff]   ;;  %v6622_v43 = vld [vmem:[%s8368_s10 + $0x178] sm:$0xff]  }
 0x2ea   :  { %v8022_v0 = vrot.slane %v3785_v61, %v6946_v29  ;;  %v3809_v1 = vcombine.high %v3785_v61, %v3785_v61  ;;  %v6615_v28 = vld [vmem:[%s8368_s10 + $0x128] sm:$0xff]   ;;  %v6620_v40 = vld [vmem:[%s8368_s10 + $0x1f0] sm:$0xff]   ;;  %v6624_v36 = vld [vmem:[%s8368_s10 + $0x1f8] sm:$0xff]  }
 0x2eb   :  { %v3877_v2 = vpack.c.bf16 %v3807_v62, %v3807_v62  ;;  %v3808_v5 = vcombine.high %v3806_v63, %v3806_v63  ;;  %v3878_v15 = vpack.c.bf16 %v3806_v63, %v3806_v63  ;;  %v6617_v38 = vld [vmem:[%s8368_s10 + $0x1a8] sm:$0xff]   ;;  %v6619_v41 = vld [vmem:[%s8368_s10 + $0x130] sm:$0xff]   ;;  %v6623_v46 = vld [vmem:[%s8368_s10 + $0x138] sm:$0xff]  }
 0x2ec   :  { %v3824_v8 = vcombine.high %v8022_v0, %v8022_v0  ;;  %v8030_v10 = vrot.slane %v3809_v1, %v6946_v29  ;;  %v6621_v44 = vld [vmem:[%s8368_s10 + $0x1b0] sm:$0xff]   ;;  %v6626_v48 = vld [vmem:[%s8368_s10 + $0x240] sm:$0xff]   ;;  %v6625_v49 = vld [vmem:[%s8368_s10 + $0x1b8] sm:$0xff]   ;;  %v3880_v6 = vpack.c.bf16 %v8022_v0, %v8022_v0 }
 0x2ed   :  { %4955 = vmatprep.mubr.bf16.mxu1 %v3877_v2  ;;  %v3879_v11 = vpack.c.bf16 %v3808_v5, %v3808_v5  ;;  %v3786_v37 = vld [vmem:[#allocation4 + $0x10] sm:$0xff]  ;;  %v6628_v39 = vld [vmem:[%s8368_s10 + $0x2c0] sm:$0xff]   ;;  %v6631_v53 = vld [vmem:[%s8368_s10 + $0x248] sm:$0xff]  }
 0x2ee   :  { %v3881_v12 = vpack.c.bf16 %v3824_v8, %v3824_v8  ;;  %4956 = vmatmul.mubr.bf16.vlgmr.msra.gmra.mrb[36].mxu1 %v3876_v9  ;;  %v3825_v16 = vcombine.high %v8030_v10, %v8030_v10  ;;  %v3826_v42 = vcombine.high %v3786_v37, %v3786_v37  ;;  %v8113_v45 = vrot.slane %v3786_v37, %v6946_v29  ;;  %v6627_v51 = vld [vmem:[%s8368_s10 + $0x200] sm:$0xff]   ;;  %v6633_v57 = vld [vmem:[%s8368_s10 + $0x2c8] sm:$0xff]   ;;  %v6635_v60 = vld [vmem:[%s8368_s10 + $0x250] sm:$0xff]  }
 0x2ef   :  { %6141 = vmatpush3.bf16.msra.mxu1 %v6593_v3  ;;  %4995 = vmatprep.mubr.bf16.mxu0 %v3879_v11  ;;  %v6629_v55 = vld [vmem:[%s8368_s10 + $0x280] sm:$0xff]   ;;  %v3882_v56 = vpack.c.bf16 %v8030_v10, %v8030_v10  ;;  %v6632_v59 = vld [vmem:[%s8368_s10 + $0x208] sm:$0xff]   ;;  %v6637_v62 = vld [vmem:[%s8368_s10 + $0x2d0] sm:$0xff]  }
 0x2f0   :  { %5035 = vmatprep.mubr.bf16.mxu1 %v3881_v12  ;;  %4996 = vmatmul.mubr.bf16.vlgmr.msra.gmra.mrb[40].mxu0 %v3878_v15  ;;  %v3883_v19 = vpack.c.bf16 %v3825_v16, %v3825_v16  ;;  %v8122_v47 = vrot.slane %v3826_v42, %v6946_v29  ;;  %v3841_v50 = vcombine.high %v8113_v45, %v8113_v45  ;;  %v6634_v61 = vld [vmem:[%s8368_s10 + $0x288] sm:$0xff]   ;;  %v6636_v63 = vld [vmem:[%s8368_s10 + $0x210] sm:$0xff]   ;;  %v6639_v0 = vld [vmem:[%s8368_s10 + $0x258] sm:$0xff]  }
 0x2f1   :  { %6163 = vmatpush3.bf16.msra.mxu0 %v6596_v13  ;;  %6142 = vmatprep.subr.bf16.mxu1 %v6597_v14  ;;  %v6638_v1 = vld [vmem:[%s8368_s10 + $0x290] sm:$0xff]   ;;  %v6641_v2 = vld [vmem:[%s8368_s10 + $0x2d8] sm:$0xff]   ;;  %v6643_v5 = vld [vmem:[%s8368_s10 + $0x260] sm:$0xff]  }
 0x2f2   :  { %5075 = vmatprep.mubr.bf16.mxu0 %v3883_v19  ;;  %6164 = vmatprep.subr.bf16.mxu0 %v6600_v17  ;;  %v3842_v52 = vcombine.high %v8122_v47, %v8122_v47  ;;  %v3885_v54 = vpack.c.bf16 %v3841_v50, %v3841_v50  ;;  %v6640_v3 = vld [vmem:[%s8368_s10 + $0x218] sm:$0xff]   ;;  %v6645_v9 = vld [vmem:[%s8368_s10 + $0x2e0] sm:$0xff]   ;;  %v6647_v11 = vld [vmem:[%s8368_s10 + $0x268] sm:$0xff]  }
 0x2f3   :  { %6143 = vmatpush3.bf16.msra.mxu1 %v6599_v18  ;;  %v6642_v8 = vld [vmem:[%s8368_s10 + $0x298] sm:$0xff]   ;;  %v6644_v10 = vld [vmem:[%s8368_s10 + $0x220] sm:$0xff]   ;;  %v6649_v13 = vld [vmem:[%s8368_s10 + $0x2e8] sm:$0xff]  }
 0x2f4   :  { %6144 = vmatprep.subr.bf16.mxu1 %v6602_v20  ;;  %v3887_v58 = vpack.c.bf16 %v3842_v52, %v3842_v52  ;;  %v6646_v12 = vld [vmem:[%s8368_s10 + $0x2a0] sm:$0xff]   ;;  %v6648_v14 = vld [vmem:[%s8368_s10 + $0x228] sm:$0xff]   ;;  %v6651_v15 = vld [vmem:[%s8368_s10 + $0x270] sm:$0xff]  }
 0x2f5   :  { %6165 = vmatpush3.bf16.msra.mxu0 %v6601_v7  ;;  %v3787_v16 = vld [vmem:[#allocation4 + $0x18] sm:$0xff]  ;;  %v6650_v17 = vld [vmem:[%s8368_s10 + $0x2a8] sm:$0xff]   ;;  %v6653_v18 = vld [vmem:[%s8368_s10 + $0x2f0] sm:$0xff]  }
 0x2f6   :  { %6166 = vmatprep.subr.bf16.mxu0 %v6604_v21  ;;  %v6652_v19 = vld [vmem:[%s8368_s10 + $0x230] sm:$0xff]   ;;  %v3843_v20 = vcombine.high %v3787_v16, %v3787_v16  ;;  %v6655_v7 = vld [vmem:[%s8368_s10 + $0x278] sm:$0xff]   ;;  %v6666_v37 = vld [vmem:[%s8368_s10 + $0x3c8] sm:$0xff]  }
 0x2f7   :  { %6145 = vmatpush3.bf16.msra.mxu1 %v6603_v22  ;;  %v6654_v21 = vld [vmem:[%s8368_s10 + $0x2b0] sm:$0xff]   ;;  %v8223_v22 = vrot.slane %v3787_v16, %v6946_v29  ;;  %v6667_v42 = vld [vmem:[%s8368_s10 + $0x388] sm:$0xff]   ;;  %v6678_v50 = vld [vmem:[%s8368_s10 + $0x3e0] sm:$0xff]  }
 0x2f8   :  { %6146 = vmatprep.subr.bf16.mxu1 %v6606_v23  ;;  %v6657_v23 = vld [vmem:[%s8368_s10 + $0x2f8] sm:$0xff]   ;;  %v6679_v52 = vld [vmem:[%s8368_s10 + $0x3a0] sm:$0xff]  }
 0x2f9   :  { %6167 = vmatpush3.bf16.msra.mxu0 %v6605_v24  ;;  %v6656_v24 = vld [vmem:[%s8368_s10 + $0x238] sm:$0xff]  }
 0x2fa   :  { %6168 = vmatprep.subr.bf16.mxu0 %v6608_v4  ;;  %v8232_v4 = vrot.slane %v3843_v20, %v6946_v29  ;;  %v6660_v29 = vld [vmem:[%s8368_s10 + $0x300] sm:$0xff]  }
 0x2fb   :  { %6147 = vmatpush3.bf16.msra.mxu1 %v6607_v25  ;;  %v6659_v25 = vld [vmem:[%s8368_s10 + $0x340] sm:$0xff]  }
 0x2fc   :  { %6148 = vmatprep.subr.bf16.mxu1 %v6610_v26  ;;  %v6658_v26 = vld [vmem:[%s8368_s10 + $0x2b8] sm:$0xff]  }
 0x2fd   :  { %6169 = vmatpush3.bf16.msra.mxu0 %v6609_v27  ;;  %v3858_v27 = vcombine.high %v8223_v22, %v8223_v22 }
 0x2fe   :  { %6170 = vmatprep.subr.bf16.mxu0 %v6612_v30  ;;  %v6661_v30 = vld [vmem:[%s8368_s10 + $0x3c0] sm:$0xff]  }
 0x2ff   :  { %6149 = vmatpush3.bf16.msra.mxu1 %v6611_v31  ;;  %v3859_v31 = vcombine.high %v8232_v4, %v8232_v4 }
 0x300   :  { %6150 = vmatprep.subr.bf16.mxu1 %v6614_v32  ;;  %v3884_v32 = vpack.c.bf16 %v8113_v45, %v8113_v45  ;;  %v6672_v45 = vld [vmem:[%s8368_s10 + $0x358] sm:$0xff]  }
 0x301   :  { %6171 = vmatpush3.bf16.msra.mxu0 %v6613_v33  ;;  %v6664_v33 = vld [vmem:[%s8368_s10 + $0x348] sm:$0xff]  }
 0x302   :  { %6172 = vmatprep.subr.bf16.mxu0 %v6616_v34  ;;  %v3889_v34 = vpack.c.bf16 %v3858_v27, %v3858_v27 }
 0x303   :  { %6151 = vmatpush3.bf16.msra.mxu1 %v6615_v28  ;;  %v6662_v28 = vld [vmem:[%s8368_s10 + $0x380] sm:$0xff]  }
 0x304   :  { %6152 = vmatprep.subr.bf16.mxu1 %v6618_v35  ;;  %v3886_v35 = vpack.c.bf16 %v8122_v47, %v8122_v47  ;;  %v6673_v47 = vld [vmem:[%s8368_s10 + $0x318] sm:$0xff]  }
 0x305   :  { %6173 = vmatpush3.bf16.msra.mxu0 %v6617_v38  ;;  %v3891_v38 = vpack.c.bf16 %v3859_v31, %v3859_v31 }
 0x306   :  { %6174 = vmatprep.subr.bf16.mxu0 %v6620_v40  ;;  %v6665_v40 = vld [vmem:[%s8368_s10 + $0x308] sm:$0xff]  }
 0x307   :  { %6153 = vmatpush3.bf16.msra.mxu1 %v6619_v41  ;;  %v6668_v41 = vld [vmem:[%s8368_s10 + $0x350] sm:$0xff]  }
 0x308   :  { %6154 = vmatprep.subr.bf16.mxu1 %v6622_v43  ;;  %v6670_v43 = vld [vmem:[%s8368_s10 + $0x3d0] sm:$0xff]  }
 0x309   :  { %6175 = vmatpush3.bf16.msra.mxu0 %v6621_v44  ;;  %v6669_v44 = vld [vmem:[%s8368_s10 + $0x310] sm:$0xff]  }
 0x30a   :  { %6176 = vmatprep.subr.bf16.mxu0 %v6624_v36  ;;  %v6671_v36 = vld [vmem:[%s8368_s10 + $0x390] sm:$0xff]  }
 0x30b   :  { %6155 = vmatpush3.bf16.msra.mxu1 %v6623_v46  ;;  %v6674_v46 = vld [vmem:[%s8368_s10 + $0x3d8] sm:$0xff]  }
 0x30c   :  { %6184 = vmatprep.subr.bf16.mxu1 %v6626_v48  ;;  %v6676_v48 = vld [vmem:[%s8368_s10 + $0x360] sm:$0xff]  }
 0x30d   :  { %6177 = vmatpush3.bf16.msra.mxu0 %v6625_v49  ;;  %v6675_v49 = vld [vmem:[%s8368_s10 + $0x398] sm:$0xff]  }
 0x30e   :  { %5036 = vmatmul.mubr.bf16.vlgmr.msra.gmra.mrb[40].mxu1 %v3880_v6  ;;  %6206 = vmatprep.subr.bf16.mxu0 %v6628_v39  ;;  %v6677_v39 = vld [vmem:[%s8368_s10 + $0x320] sm:$0xff]   ;;  %v6682_v6 = vld [vmem:[%s8368_s10 + $0x3e8] sm:$0xff]  }
 0x30f   :  { %6185 = vmatpush3.bf16.msra.mxu1 %v6627_v51  ;;  %5115 = vmatprep.mubr.bf16.mxu1 %v3885_v54  ;;  %v6680_v51 = vld [vmem:[%s8368_s10 + $0x368] sm:$0xff]   ;;  %v6684_v54 = vld [vmem:[%s8368_s10 + $0x370] sm:$0xff]  }
 0x310   :  { %5076 = vmatmul.mubr.bf16.vlgmr.msra.gmra.mrb[44].mxu0 %v3882_v56  ;;  %6186 = vmatprep.subr.bf16.mxu1 %v6631_v53  ;;  %v6681_v53 = vld [vmem:[%s8368_s10 + $0x328] sm:$0xff]   ;;  %v6686_v56 = vld [vmem:[%s8368_s10 + $0x3f0] sm:$0xff]  }
 0x311   :  { %6207 = vmatpush3.bf16.msra.mxu0 %v6629_v55  ;;  %5155 = vmatprep.mubr.bf16.mxu0 %v3887_v58  ;;  %v6683_v55 = vld [vmem:[%s8368_s10 + $0x3a8] sm:$0xff]   ;;  %v6688_v58 = vld [vmem:[%s8368_s10 + $0x378] sm:$0xff]  }
 0x312   :  { %6208 = vmatprep.subr.bf16.mxu0 %v6633_v57  ;;  %v6685_v57 = vld [vmem:[%s8368_s10 + $0x330] sm:$0xff]  }
 0x313   :  { %6187 = vmatpush3.bf16.msra.mxu1 %v6632_v59  ;;  %v6687_v59 = vld [vmem:[%s8368_s10 + $0x3b0] sm:$0xff]  }
 0x314   :  { %6188 = vmatprep.subr.bf16.mxu1 %v6635_v60  ;;  %v6690_v60 = vld [vmem:[%s8368_s10 + $0x3f8] sm:$0xff]  }
 0x315   :  { %6209 = vmatpush3.bf16.msra.mxu0 %v6634_v61  ;;  %v6689_v61 = vld [vmem:[%s8368_s10 + $0x338] sm:$0xff]  }
 0x316   :  { %6210 = vmatprep.subr.bf16.mxu0 %v6637_v62  ;;  %v6691_v62 = vld [vmem:[%s8368_s10 + $0x3b8] sm:$0xff]  }
 0x317   :  { %6189 = vmatpush3.bf16.msra.mxu1 %v6636_v63  ;;  %v3888_v63 = vpack.c.bf16 %v8223_v22, %v8223_v22 }
 0x318   :  { %6190 = vmatprep.subr.bf16.mxu1 %v6639_v0  ;;  %v3890_v0 = vpack.c.bf16 %v8232_v4, %v8232_v4 }
 0x319   :  { %6211 = vmatpush3.bf16.msra.mxu0 %v6638_v1 }
 0x31a   :  { %6212 = vmatprep.subr.bf16.mxu0 %v6641_v2  ;;  %v5612_v2 = vld [vmem:[%s8369_s11] ss:$0 sm:$0xff] }
 0x31b   :  { %6191 = vmatpush3.bf16.msra.mxu1 %v6640_v3 }
 0x31c   :  { %6192 = vmatprep.subr.bf16.mxu1 %v6643_v5 }
 0x31d   :  { %6213 = vmatpush3.bf16.msra.mxu0 %v6642_v8 }
 0x31e   :  { %6214 = vmatprep.subr.bf16.mxu0 %v6645_v9 }
 0x31f   :  { %6193 = vmatpush3.bf16.msra.mxu1 %v6644_v10 }
 0x320   :  { %6194 = vmatprep.subr.bf16.mxu1 %v6647_v11 }
 0x321   :  { %6215 = vmatpush3.bf16.msra.mxu0 %v6646_v12 }
 0x322   :  { %6216 = vmatprep.subr.bf16.mxu0 %v6649_v13 }
 0x323   :  { %6195 = vmatpush3.bf16.msra.mxu1 %v6648_v14 }
 0x324   :  { %6196 = vmatprep.subr.bf16.mxu1 %v6651_v15 }
 0x325   :  { %6217 = vmatpush3.bf16.msra.mxu0 %v6650_v17 }
 0x326   :  { %6218 = vmatprep.subr.bf16.mxu0 %v6653_v18 }
 0x327   :  { %6197 = vmatpush3.bf16.msra.mxu1 %v6652_v19 }
 0x328   :  { %6198 = vmatprep.subr.bf16.mxu1 %v6655_v7 }
 0x329   :  { %6219 = vmatpush3.bf16.msra.mxu0 %v6654_v21 }
 0x32a   :  { %6220 = vmatprep.subr.bf16.mxu0 %v6657_v23 }
 0x32b   :  { %6199 = vmatpush3.bf16.msra.mxu1 %v6656_v24 }
 0x32c   :  { %6228 = vmatprep.subr.bf16.mxu1 %v6659_v25 }
 0x32d   :  { %6221 = vmatpush3.bf16.msra.mxu0 %v6658_v26 }
 0x32e   :  { %5116 = vmatmul.mubr.bf16.vlgmr.msra.gmra.mrb[44].mxu1 %v3884_v32  ;;  %6250 = vmatprep.subr.bf16.mxu0 %v6661_v30 }
 0x32f   :  { %6229 = vmatpush3.bf16.msra.mxu1 %v6660_v29  ;;  %5195 = vmatprep.mubr.bf16.mxu1 %v3889_v34 }
 0x330   :  { %5156 = vmatmul.mubr.bf16.vlgmr.msra.gmra.mrb[48].mxu0 %v3886_v35  ;;  %6230 = vmatprep.subr.bf16.mxu1 %v6664_v33 }
 0x331   :  { %6251 = vmatpush3.bf16.msra.mxu0 %v6662_v28  ;;  %5235 = vmatprep.mubr.bf16.mxu0 %v3891_v38 }
 0x332   :  { %6252 = vmatprep.subr.bf16.mxu0 %v6666_v37 }
 0x333   :  { %6231 = vmatpush3.bf16.msra.mxu1 %v6665_v40 }
 0x334   :  { %6232 = vmatprep.subr.bf16.mxu1 %v6668_v41 }
 0x335   :  { %6253 = vmatpush3.bf16.msra.mxu0 %v6667_v42 }
 0x336   :  { %6254 = vmatprep.subr.bf16.mxu0 %v6670_v43 }
 0x337   :  { %6233 = vmatpush3.bf16.msra.mxu1 %v6669_v44 }
 0x338   :  { %6234 = vmatprep.subr.bf16.mxu1 %v6672_v45 }
 0x339   :  { %6255 = vmatpush3.bf16.msra.mxu0 %v6671_v36 }
 0x33a   :  { %6256 = vmatprep.subr.bf16.mxu0 %v6674_v46 }
 0x33b   :  { %6235 = vmatpush3.bf16.msra.mxu1 %v6673_v47 }
 0x33c   :  { %6236 = vmatprep.subr.bf16.mxu1 %v6676_v48 }
 0x33d   :  { %6257 = vmatpush3.bf16.msra.mxu0 %v6675_v49 }
 0x33e   :  { %6258 = vmatprep.subr.bf16.mxu0 %v6678_v50 }
 0x33f   :  { %6237 = vmatpush3.bf16.msra.mxu1 %v6677_v39  ;;  %v5743_v39 = vld [vmem:[%s8372_s14] ss:$0 sm:$0xff] }
 0x340   :  { %6238 = vmatprep.subr.bf16.mxu1 %v6680_v51 }
 0x341   :  { %6259 = vmatpush3.bf16.msra.mxu0 %v6679_v52 }
 0x342   :  { %6260 = vmatprep.subr.bf16.mxu0 %v6682_v6 }
 0x343   :  { %6239 = vmatpush3.bf16.msra.mxu1 %v6681_v53 }
 0x344   :  { %6240 = vmatprep.subr.bf16.mxu1 %v6684_v54  ;;  %v5254_v54 = vpop.xlane.xlu0 %5253 }
 0x345   :  { %6261 = vmatpush3.bf16.msra.mxu0 %v6683_v55 }
 0x346   :  { %6262 = vmatprep.subr.bf16.mxu0 %v6686_v56  ;;  %v5280_v56 = vstv %s8373_s15 }
 0x347   :  { %6241 = vmatpush3.bf16.msra.mxu1 %v6685_v57 }
 0x348   :  { %6242 = vmatprep.subr.bf16.mxu1 %v6688_v58 }
 0x349   :  { %6263 = vmatpush3.bf16.msra.mxu0 %v6687_v59 }
 0x34a   :  { %6264 = vmatprep.subr.bf16.mxu0 %v6690_v60 }
 0x34b   :  { %6243 = vmatpush3.bf16.msra.mxu1 %v6689_v61 }
 0x34d   :  { %6265 = vmatpush3.bf16.msra.mxu0 %v6691_v62 }
 0x34e   :  { %5196 = vmatmul.mubr.bf16.vlgmr.msra.gmra.mrb[48].mxu1 %v3888_v63 }
 0x350   :  { %5236 = vmatmul.mubr.bf16.vlgmr.msra.gmra.mrb[52].mxu0 %v3890_v0 }
 0x361   :  { %v5265_v53 = vpop.xlane.xlu1 %5264 }
 0x362   :  { %v5266_v55 = vadd.f32 %v5265_v53, %v5254_v54 }
 0x3c1   :  { %v6112_v1 = vpop.f32.mrb[36].mxu1 }
 0x3c2   :  { %v6113_v3 = vpop.f32.mrb[37].mxu1 }
 0x3c3   :  { %v6114_v5 = vadd.f32 %v6113_v3, %v6112_v1  ;;  %v6115_v8 = vpop.f32.mrb[38].mxu1  ;;  %v6134_v9 = vpop.f32.mrb[40].mxu0 }
 0x3c4   :  { %v6116_v10 = vpop.f32.mrb[39].mxu1  ;;  %v6135_v11 = vpop.f32.mrb[41].mxu0 }
 0x3c5   :  { %v4958_v12 = vadd.f32 %v6114_v5, %v5612_v2  ;;  %v6136_v13 = vadd.f32 %v6135_v11, %v6134_v9  ;;  %v6137_v14 = vpop.f32.mrb[42].mxu0 }
 0x3c6   :  { %v6138_v15 = vpop.f32.mrb[43].mxu0 }
 0x3c7   :  { %v4998_v16 = vadd.f32 %v6136_v13, %v4958_v12 }
 0x3e1   :  { %v6156_v17 = vpop.f32.mrb[40].mxu1 }
 0x3e2   :  { %v6157_v18 = vpop.f32.mrb[41].mxu1 }
 0x3e3   :  { %v6158_v19 = vadd.f32 %v6157_v18, %v6156_v17  ;;  %v6159_v20 = vpop.f32.mrb[42].mxu1  ;;  %v6178_v7 = vpop.f32.mrb[44].mxu0 }
 0x3e4   :  { %v6160_v21 = vpop.f32.mrb[43].mxu1  ;;  %v6179_v22 = vpop.f32.mrb[45].mxu0 }
 0x3e5   :  { %v5038_v23 = vadd.f32 %v6158_v19, %v4998_v16  ;;  %v6180_v24 = vadd.f32 %v6179_v22, %v6178_v7  ;;  %v6181_v4 = vpop.f32.mrb[46].mxu0 }
 0x3e6   :  { %v6182_v25 = vpop.f32.mrb[47].mxu0 }
 0x3e7   :  { %v5078_v26 = vadd.f32 %v6180_v24, %v5038_v23 }
 0x401   :  { %v6200_v27 = vpop.f32.mrb[44].mxu1 }
 0x402   :  { %v6201_v30 = vpop.f32.mrb[45].mxu1 }
 0x403   :  { %v6202_v29 = vadd.f32 %v6201_v30, %v6200_v27  ;;  %v6203_v31 = vpop.f32.mrb[46].mxu1  ;;  %v6222_v32 = vpop.f32.mrb[48].mxu0 }
 0x404   :  { %v6204_v33 = vpop.f32.mrb[47].mxu1  ;;  %v6223_v34 = vpop.f32.mrb[49].mxu0 }
 0x405   :  { %v5118_v28 = vadd.f32 %v6202_v29, %v5078_v26  ;;  %v6224_v35 = vadd.f32 %v6223_v34, %v6222_v32  ;;  %v6225_v37 = vpop.f32.mrb[50].mxu0 }
 0x406   :  { %v6226_v38 = vpop.f32.mrb[51].mxu0 }
 0x407   :  { %v5158_v40 = vadd.f32 %v6224_v35, %v5118_v28 }
 0x421   :  { %v6244_v41 = vpop.f32.mrb[48].mxu1 }
 0x422   :  { %v6245_v42 = vpop.f32.mrb[49].mxu1 }
 0x423   :  { %v6246_v43 = vadd.f32 %v6245_v42, %v6244_v41  ;;  %v6247_v44 = vpop.f32.mrb[50].mxu1  ;;  %v6266_v45 = vpop.f32.mrb[52].mxu0 }
 0x424   :  { %v6248_v36 = vpop.f32.mrb[51].mxu1  ;;  %v6267_v46 = vpop.f32.mrb[53].mxu0 }
 0x425   :  { %v5198_v47 = vadd.f32 %v6246_v43, %v5158_v40  ;;  %v6268_v48 = vadd.f32 %v6267_v46, %v6266_v45  ;;  %v6269_v49 = vpop.f32.mrb[54].mxu0 }
 0x426   :  { %v6270_v50 = vpop.f32.mrb[55].mxu0 }
 0x427   :  { %v5238_v51 = vadd.f32 %v6268_v48, %v5198_v47 }
 0x429   :  { %v5274_v52 = vmul.f32 %v5743_v39, %v5238_v51 }
 0x42b   :  { %v5275_v6 = vsel %vm5251_vm7, %v5274_v52, 0.0 }
 0x42c   :  { %5276 = vadd.xlane.f32.xlu0 %v5275_v6 }
 0x4b9   :  { %v5277_v57 = vpop.xlane.xlu0 %5276 }
 0x4ba   :  { %v5278_v58 = vadd.f32 %v5277_v57, %v5266_v55 }
 0x4bc   :  { %v5281_v59 = vadd.f32 %v5280_v56, %v5278_v58 }
 0x4be   :  { %5283 = vst.msk [vmem:[%s8374_s16] sm:$0x3] %vm5282_vm8, %v5281_v59 }
 0x4bf   :  { %5288 = vsyncpa [#allocation7], 1 }

</bundles_post_ra>
